<compile_context>
chip_gen: v6e
topology: v6e:2x2x1
jax: 0.10.0
libtpu: 0.0.40
codegen_flags: <defaults>
</compile_context>

<pallas_src>
import jax
import jax.numpy as jnp
from jax.experimental import pallas as pl
from jax.experimental.pallas import tpu as pltpu

# Problem sizes fixed by the module definition.
N, H, W = 1, 7, 7
HW = H * W
C_IN, C_MID, C_OUT = 1760, 128, 32
EPS = 1e-5


def _fused_kernel(x_ref, w1_ref, gamma_ref, beta_ref, w2_ref, o_ref):
    # x_ref:     (C_IN, HW)        f32   channel-major, spatial on lanes
    # w1_ref:    (C_MID, C_IN)     bf16  native PyTorch layout
    # gamma_ref: (C_MID, 1)        f32
    # beta_ref:  (C_MID, 1)        f32
    # w2_ref:    (C_OUT, 9*C_MID)  bf16  column = tap*C_MID + ci, tap = kh*3+kw
    # o_ref:     (C_OUT, HW)       f32

    # ---- 1x1 conv: single MXU matmul (bf16 operands, f32 accumulation) ----
    x_bf16 = x_ref[...].astype(jnp.bfloat16)
    y = jnp.dot(w1_ref[...], x_bf16, preferred_element_type=jnp.float32)  # (C_MID, HW)

    # ---- BatchNorm2d, training-mode batch stats over N*H*W, in f32 ----
    mean = jnp.mean(y, axis=1, keepdims=True)                      # (C_MID, 1)
    centered = y - mean
    var = jnp.mean(centered * centered, axis=1, keepdims=True)     # biased, no cancellation
    inv = jax.lax.rsqrt(var + EPS)
    y = centered * (inv * gamma_ref[...]) + beta_ref[...]

    # ---- ReLU ----
    y = jnp.maximum(y, 0.0).astype(jnp.bfloat16)                   # (C_MID, HW)

    # ---- 3x3 conv, padding=1, as one im2col K=1152 matmul ----
    # Only column-boundary masks are needed: row boundaries are handled by the
    # zero fill of the flat lane shifts below.  Masks are built purely from
    # lane-index equality compares (no integer div/mod).
    lane = jax.lax.broadcasted_iota(jnp.int32, (1, HW), 1)
    is_col_first = lane == 0
    is_col_last = lane == (W - 1)
    for row in range(1, H):
        is_col_first = jnp.logical_or(is_col_first, lane == row * W)
        is_col_last = jnp.logical_or(is_col_last, lane == row * W + (W - 1))
    ok_left = jnp.logical_not(is_col_first)    # input column c-1 exists
    ok_right = jnp.logical_not(is_col_last)    # input column c+1 exists

    def zeros_cols(n):
        return jnp.zeros((C_MID, n), jnp.bfloat16)

    taps = []
    for kh in range(3):
        for kw in range(3):
            off = (kh - 1) * W + (kw - 1)      # flat lane offset of this tap
            if off > 0:
                shifted = jnp.concatenate([y[:, off:], zeros_cols(off)], axis=1)
            elif off < 0:
                shifted = jnp.concatenate([zeros_cols(-off), y[:, :HW + off]], axis=1)
            else:
                shifted = y
            if kw == 0:
                shifted = jnp.where(ok_left, shifted, jnp.zeros_like(shifted))
            elif kw == 2:
                shifted = jnp.where(ok_right, shifted, jnp.zeros_like(shifted))
            taps.append(shifted)
    patches = jnp.concatenate(taps, axis=0)                        # (9*C_MID, HW) bf16

    out = jnp.dot(w2_ref[...], patches, preferred_element_type=jnp.float32)
    o_ref[...] = out                                               # (C_OUT, HW) f32


def prepare_params(w1, gamma, beta, w2):
    """One-time weight preprocessing (keep out of the per-call path)."""
    w1_2d = jnp.asarray(w1).reshape(C_MID, C_IN).astype(jnp.bfloat16)          # no transpose
    gamma_c = jnp.asarray(gamma).reshape(C_MID, 1).astype(jnp.float32)
    beta_c = jnp.asarray(beta).reshape(C_MID, 1).astype(jnp.float32)
    # (C_OUT, C_MID, 3, 3) -> (C_OUT, 3, 3, C_MID) -> (C_OUT, 9*C_MID); col = tap*C_MID + ci
    w2_flat = (jnp.transpose(jnp.asarray(w2), (0, 2, 3, 1))
               .reshape(C_OUT, 9 * C_MID).astype(jnp.bfloat16))
    return w1_2d, gamma_c, beta_c, w2_flat


_COST = pl.CostEstimate(
    flops=2 * HW * C_IN * C_MID + 2 * HW * 9 * C_MID * C_OUT,
    transcendentals=C_MID,
    bytes_accessed=(C_IN * HW * 4            # x (f32)
                    + C_MID * C_IN * 2       # w1 (bf16)
                    + 2 * C_MID * 4          # gamma, beta
                    + C_OUT * 9 * C_MID * 2  # w2 (bf16)
                    + C_OUT * HW * 4),       # output
)

_VMEM = pl.BlockSpec(memory_space=pltpu.MemorySpace.VMEM)


@jax.jit
def fused_forward(x_nchw, w1_2d, gamma_c, beta_c, w2_flat):
    """x_nchw: (1, 1760, 7, 7) f32; params from prepare_params().
    Returns (1, 32, 7, 7) f32, matching the PyTorch module in training mode."""
    x2d = x_nchw.reshape(C_IN, HW)            # free reshape, no transpose
    out = pl.pallas_call(
        _fused_kernel,
        out_shape=jax.ShapeDtypeStruct((C_OUT, HW), jnp.float32),
        in_specs=[_VMEM, _VMEM, _VMEM, _VMEM, _VMEM],
        out_specs=_VMEM,
        cost_estimate=_COST,
    )(x2d, w1_2d, gamma_c, beta_c, w2_flat)
    return out.reshape(N, C_OUT, H, W)        # free reshape, no transpose


def _reference(x, w1, gamma, beta, w2):
    """Pure-JAX f32 reference of the PyTorch module (training-mode BN)."""
    y = jax.lax.conv_general_dilated(
        x, w1, window_strides=(1, 1), padding='VALID',
        dimension_numbers=('NCHW', 'OIHW', 'NCHW'))
    mean = jnp.mean(y, axis=(0, 2, 3), keepdims=True)
    var = jnp.mean((y - mean) ** 2, axis=(0, 2, 3), keepdims=True)
    y = (y - mean) * jax.lax.rsqrt(var + EPS)
    y = y * gamma.reshape(1, -1, 1, 1) + beta.reshape(1, -1, 1, 1)
    y = jnp.maximum(y, 0.0)
    return jax.lax.conv_general_dilated(
        y, w2, window_strides=(1, 1), padding=((1, 1), (1, 1)),
        dimension_numbers=('NCHW', 'OIHW', 'NCHW'))


if __name__ == "__main__":
    key = jax.random.PRNGKey(0)
    k_x, k_w1, k_g, k_b, k_w2 = jax.random.split(key, 5)

    # Deterministic synthetic inputs at the module's shapes.
    x = jax.random.normal(k_x, (N, C_IN, H, W), jnp.float32)
    w1 = jax.random.normal(k_w1, (C_MID, C_IN, 1, 1), jnp.float32) * 0.02
    gamma = 1.0 + 0.1 * jax.random.normal(k_g, (C_MID,), jnp.float32)
    beta = 0.1 * jax.random.normal(k_b, (C_MID,), jnp.float32)
    w2 = jax.random.normal(k_w2, (C_OUT, C_MID, 3, 3), jnp.float32) * 0.02

    params = prepare_params(w1, gamma, beta, w2)
    out = fused_forward(x, *params)
    jax.block_until_ready(out)
    assert out.shape == (N, C_OUT, H, W), out.shape

    # Loose tolerance to accommodate bf16 MXU operands (f32 accumulation).
    ref = _reference(x, w1, gamma, beta, w2)
    max_err = float(jnp.max(jnp.abs(out - ref)))
    assert max_err < 0.1, f"max abs error vs reference too large: {max_err}"
    print("KERNEL_OK")
</pallas_src>

<mosaic_0001>
module attributes {stable_mosaic.version = 11 : i64} {
  func.func @_fused_kernel(%arg0: memref<1760x49xf32, #tpu.memory_space<vmem>>, %arg1: memref<128x1760xbf16, #tpu.memory_space<vmem>>, %arg2: memref<128x1xf32, #tpu.memory_space<vmem>>, %arg3: memref<128x1xf32, #tpu.memory_space<vmem>>, %arg4: memref<32x1152xbf16, #tpu.memory_space<vmem>>, %arg5: memref<32x49xf32, #tpu.memory_space<vmem>>) attributes {dimension_semantics = [], scalar_prefetch = 0 : i64, scratch_operands = 0 : i64, tpu.core_type = #tpu.core_type<tc>} {
    %c0 = arith.constant 0 : index
    %c0_0 = arith.constant 0 : index
    %0 = vector.load %arg0[%c0, %c0_0] : memref<1760x49xf32, #tpu.memory_space<vmem>>, vector<1760x49xf32>
    %1 = arith.truncf %0 : vector<1760x49xf32> to vector<1760x49xbf16>
    %c0_1 = arith.constant 0 : index
    %c0_2 = arith.constant 0 : index
    %2 = vector.load %arg1[%c0_1, %c0_2] : memref<128x1760xbf16, #tpu.memory_space<vmem>>, vector<128x1760xbf16>
    %cst = arith.constant dense<0.000000e+00> : vector<128x49xf32>
    %3 = tpu.matmul %2, %1, %cst {dimension_numbers = #tpu.dot_dimension_numbers<[1], [0], [0], [1], [0, 0, 1, 1], [], []>} : vector<128x1760xbf16>, vector<1760x49xbf16>, vector<128x49xf32> -> vector<128x49xf32>
    %cst_3 = arith.constant dense<0.000000e+00> : vector<128xf32>
    %4 = vector.multi_reduction <add>, %3, %cst_3 [1] : vector<128x49xf32> to vector<128xf32>
    %5 = vector.shape_cast %4 : vector<128xf32> to vector<128x1xf32>
    %cst_4 = arith.constant 4.900000e+01 : f32
    %6 = vector.broadcast %cst_4 : f32 to vector<128x1xf32>
    %7 = arith.divf %5, %6 : vector<128x1xf32>
    %8 = vector.broadcast %7 : vector<128x1xf32> to vector<128x49xf32>
    %9 = arith.subf %3, %8 : vector<128x49xf32>
    %10 = arith.mulf %9, %9 : vector<128x49xf32>
    %cst_5 = arith.constant dense<0.000000e+00> : vector<128xf32>
    %11 = vector.multi_reduction <add>, %10, %cst_5 [1] : vector<128x49xf32> to vector<128xf32>
    %12 = vector.shape_cast %11 : vector<128xf32> to vector<128x1xf32>
    %cst_6 = arith.constant 4.900000e+01 : f32
    %13 = vector.broadcast %cst_6 : f32 to vector<128x1xf32>
    %14 = arith.divf %12, %13 : vector<128x1xf32>
    %cst_7 = arith.constant 9.99999974E-6 : f32
    %15 = vector.broadcast %cst_7 : f32 to vector<128x1xf32>
    %16 = arith.addf %14, %15 : vector<128x1xf32>
    %17 = math.rsqrt %16 : vector<128x1xf32>
    %c0_8 = arith.constant 0 : index
    %c0_9 = arith.constant 0 : index
    %18 = vector.load %arg2[%c0_8, %c0_9] : memref<128x1xf32, #tpu.memory_space<vmem>>, vector<128x1xf32>
    %19 = arith.mulf %17, %18 : vector<128x1xf32>
    %20 = vector.broadcast %19 : vector<128x1xf32> to vector<128x49xf32>
    %21 = arith.mulf %9, %20 : vector<128x49xf32>
    %c0_10 = arith.constant 0 : index
    %c0_11 = arith.constant 0 : index
    %22 = vector.load %arg3[%c0_10, %c0_11] : memref<128x1xf32, #tpu.memory_space<vmem>>, vector<128x1xf32>
    %23 = vector.broadcast %22 : vector<128x1xf32> to vector<128x49xf32>
    %24 = arith.addf %21, %23 : vector<128x49xf32>
    %cst_12 = arith.constant 0.000000e+00 : f32
    %25 = vector.broadcast %cst_12 : f32 to vector<128x49xf32>
    %26 = arith.maximumf %24, %25 : vector<128x49xf32>
    %27 = arith.truncf %26 : vector<128x49xf32> to vector<128x49xbf16>
    %28 = tpu.iota {dimensions = array<i32: 1>} : vector<1x49xi32>
    %c0_i32 = arith.constant 0 : i32
    %29 = vector.broadcast %c0_i32 : i32 to vector<1x49xi32>
    %30 = arith.cmpi eq, %28, %29 : vector<1x49xi32>
    %c6_i32 = arith.constant 6 : i32
    %31 = vector.broadcast %c6_i32 : i32 to vector<1x49xi32>
    %32 = arith.cmpi eq, %28, %31 : vector<1x49xi32>
    %c7_i32 = arith.constant 7 : i32
    %33 = vector.broadcast %c7_i32 : i32 to vector<1x49xi32>
    %34 = arith.cmpi eq, %28, %33 : vector<1x49xi32>
    %35 = arith.ori %30, %34 : vector<1x49xi1>
    %c13_i32 = arith.constant 13 : i32
    %36 = vector.broadcast %c13_i32 : i32 to vector<1x49xi32>
    %37 = arith.cmpi eq, %28, %36 : vector<1x49xi32>
    %38 = arith.ori %32, %37 : vector<1x49xi1>
    %c14_i32 = arith.constant 14 : i32
    %39 = vector.broadcast %c14_i32 : i32 to vector<1x49xi32>
    %40 = arith.cmpi eq, %28, %39 : vector<1x49xi32>
    %41 = arith.ori %35, %40 : vector<1x49xi1>
    %c20_i32 = arith.constant 20 : i32
    %42 = vector.broadcast %c20_i32 : i32 to vector<1x49xi32>
    %43 = arith.cmpi eq, %28, %42 : vector<1x49xi32>
    %44 = arith.ori %38, %43 : vector<1x49xi1>
    %c21_i32 = arith.constant 21 : i32
    %45 = vector.broadcast %c21_i32 : i32 to vector<1x49xi32>
    %46 = arith.cmpi eq, %28, %45 : vector<1x49xi32>
    %47 = arith.ori %41, %46 : vector<1x49xi1>
    %c27_i32 = arith.constant 27 : i32
    %48 = vector.broadcast %c27_i32 : i32 to vector<1x49xi32>
    %49 = arith.cmpi eq, %28, %48 : vector<1x49xi32>
    %50 = arith.ori %44, %49 : vector<1x49xi1>
    %c28_i32 = arith.constant 28 : i32
    %51 = vector.broadcast %c28_i32 : i32 to vector<1x49xi32>
    %52 = arith.cmpi eq, %28, %51 : vector<1x49xi32>
    %53 = arith.ori %47, %52 : vector<1x49xi1>
    %c34_i32 = arith.constant 34 : i32
    %54 = vector.broadcast %c34_i32 : i32 to vector<1x49xi32>
    %55 = arith.cmpi eq, %28, %54 : vector<1x49xi32>
    %56 = arith.ori %50, %55 : vector<1x49xi1>
    %c35_i32 = arith.constant 35 : i32
    %57 = vector.broadcast %c35_i32 : i32 to vector<1x49xi32>
    %58 = arith.cmpi eq, %28, %57 : vector<1x49xi32>
    %59 = arith.ori %53, %58 : vector<1x49xi1>
    %c41_i32 = arith.constant 41 : i32
    %60 = vector.broadcast %c41_i32 : i32 to vector<1x49xi32>
    %61 = arith.cmpi eq, %28, %60 : vector<1x49xi32>
    %62 = arith.ori %56, %61 : vector<1x49xi1>
    %c42_i32 = arith.constant 42 : i32
    %63 = vector.broadcast %c42_i32 : i32 to vector<1x49xi32>
    %64 = arith.cmpi eq, %28, %63 : vector<1x49xi32>
    %65 = arith.ori %59, %64 : vector<1x49xi1>
    %c48_i32 = arith.constant 48 : i32
    %66 = vector.broadcast %c48_i32 : i32 to vector<1x49xi32>
    %67 = arith.cmpi eq, %28, %66 : vector<1x49xi32>
    %68 = arith.ori %62, %67 : vector<1x49xi1>
    %cst_13 = arith.constant dense<true> : vector<1x49xi1>
    %69 = arith.xori %65, %cst_13 : vector<1x49xi1>
    %cst_14 = arith.constant dense<true> : vector<1x49xi1>
    %70 = arith.xori %68, %cst_14 : vector<1x49xi1>
    %cst_15 = arith.constant 0.000000e+00 : bf16
    %71 = vector.broadcast %cst_15 : bf16 to vector<128x8xbf16>
    %72 = vector.extract_strided_slice %27 {offsets = [0, 0], sizes = [128, 41], strides = [1, 1]} : vector<128x49xbf16> to vector<128x41xbf16>
    %73 = tpu.concatenate %71, %72 in 1 : vector<128x8xbf16>, vector<128x41xbf16> -> vector<128x49xbf16>
    %cst_16 = arith.constant 0.000000e+00 : bf16
    %74 = vector.broadcast %cst_16 : bf16 to vector<128x49xbf16>
    %75 = vector.shape_cast %69 : vector<1x49xi1> to vector<1x49xi1>
    %76 = vector.broadcast %75 : vector<1x49xi1> to vector<128x49xi1>
    %77 = arith.select %76, %73, %74 : vector<128x49xi1>, vector<128x49xbf16>
    %cst_17 = arith.constant 0.000000e+00 : bf16
    %78 = vector.broadcast %cst_17 : bf16 to vector<128x7xbf16>
    %79 = vector.extract_strided_slice %27 {offsets = [0, 0], sizes = [128, 42], strides = [1, 1]} : vector<128x49xbf16> to vector<128x42xbf16>
    %80 = tpu.concatenate %78, %79 in 1 : vector<128x7xbf16>, vector<128x42xbf16> -> vector<128x49xbf16>
    %cst_18 = arith.constant 0.000000e+00 : bf16
    %81 = vector.broadcast %cst_18 : bf16 to vector<128x6xbf16>
    %82 = vector.extract_strided_slice %27 {offsets = [0, 0], sizes = [128, 43], strides = [1, 1]} : vector<128x49xbf16> to vector<128x43xbf16>
    %83 = tpu.concatenate %81, %82 in 1 : vector<128x6xbf16>, vector<128x43xbf16> -> vector<128x49xbf16>
    %cst_19 = arith.constant 0.000000e+00 : bf16
    %84 = vector.broadcast %cst_19 : bf16 to vector<128x49xbf16>
    %85 = vector.shape_cast %70 : vector<1x49xi1> to vector<1x49xi1>
    %86 = vector.broadcast %85 : vector<1x49xi1> to vector<128x49xi1>
    %87 = arith.select %86, %83, %84 : vector<128x49xi1>, vector<128x49xbf16>
    %cst_20 = arith.constant 0.000000e+00 : bf16
    %88 = vector.broadcast %cst_20 : bf16 to vector<128x1xbf16>
    %89 = vector.extract_strided_slice %27 {offsets = [0, 0], sizes = [128, 48], strides = [1, 1]} : vector<128x49xbf16> to vector<128x48xbf16>
    %90 = tpu.concatenate %88, %89 in 1 : vector<128x1xbf16>, vector<128x48xbf16> -> vector<128x49xbf16>
    %cst_21 = arith.constant 0.000000e+00 : bf16
    %91 = vector.broadcast %cst_21 : bf16 to vector<128x49xbf16>
    %92 = vector.shape_cast %69 : vector<1x49xi1> to vector<1x49xi1>
    %93 = vector.broadcast %92 : vector<1x49xi1> to vector<128x49xi1>
    %94 = arith.select %93, %90, %91 : vector<128x49xi1>, vector<128x49xbf16>
    %95 = vector.extract_strided_slice %27 {offsets = [0, 1], sizes = [128, 48], strides = [1, 1]} : vector<128x49xbf16> to vector<128x48xbf16>
    %cst_22 = arith.constant 0.000000e+00 : bf16
    %96 = vector.broadcast %cst_22 : bf16 to vector<128x1xbf16>
    %97 = tpu.concatenate %95, %96 in 1 : vector<128x48xbf16>, vector<128x1xbf16> -> vector<128x49xbf16>
    %cst_23 = arith.constant 0.000000e+00 : bf16
    %98 = vector.broadcast %cst_23 : bf16 to vector<128x49xbf16>
    %99 = vector.shape_cast %70 : vector<1x49xi1> to vector<1x49xi1>
    %100 = vector.broadcast %99 : vector<1x49xi1> to vector<128x49xi1>
    %101 = arith.select %100, %97, %98 : vector<128x49xi1>, vector<128x49xbf16>
    %102 = vector.extract_strided_slice %27 {offsets = [0, 6], sizes = [128, 43], strides = [1, 1]} : vector<128x49xbf16> to vector<128x43xbf16>
    %cst_24 = arith.constant 0.000000e+00 : bf16
    %103 = vector.broadcast %cst_24 : bf16 to vector<128x6xbf16>
    %104 = tpu.concatenate %102, %103 in 1 : vector<128x43xbf16>, vector<128x6xbf16> -> vector<128x49xbf16>
    %cst_25 = arith.constant 0.000000e+00 : bf16
    %105 = vector.broadcast %cst_25 : bf16 to vector<128x49xbf16>
    %106 = vector.shape_cast %69 : vector<1x49xi1> to vector<1x49xi1>
    %107 = vector.broadcast %106 : vector<1x49xi1> to vector<128x49xi1>
    %108 = arith.select %107, %104, %105 : vector<128x49xi1>, vector<128x49xbf16>
    %109 = vector.extract_strided_slice %27 {offsets = [0, 7], sizes = [128, 42], strides = [1, 1]} : vector<128x49xbf16> to vector<128x42xbf16>
    %cst_26 = arith.constant 0.000000e+00 : bf16
    %110 = vector.broadcast %cst_26 : bf16 to vector<128x7xbf16>
    %111 = tpu.concatenate %109, %110 in 1 : vector<128x42xbf16>, vector<128x7xbf16> -> vector<128x49xbf16>
    %112 = vector.extract_strided_slice %27 {offsets = [0, 8], sizes = [128, 41], strides = [1, 1]} : vector<128x49xbf16> to vector<128x41xbf16>
    %cst_27 = arith.constant 0.000000e+00 : bf16
    %113 = vector.broadcast %cst_27 : bf16 to vector<128x8xbf16>
    %114 = tpu.concatenate %112, %113 in 1 : vector<128x41xbf16>, vector<128x8xbf16> -> vector<128x49xbf16>
    %cst_28 = arith.constant 0.000000e+00 : bf16
    %115 = vector.broadcast %cst_28 : bf16 to vector<128x49xbf16>
    %116 = vector.shape_cast %70 : vector<1x49xi1> to vector<1x49xi1>
    %117 = vector.broadcast %116 : vector<1x49xi1> to vector<128x49xi1>
    %118 = arith.select %117, %114, %115 : vector<128x49xi1>, vector<128x49xbf16>
    %119 = tpu.concatenate %77, %80, %87, %94, %27, %101, %108, %111, %118 in 0 : vector<128x49xbf16>, vector<128x49xbf16>, vector<128x49xbf16>, vector<128x49xbf16>, vector<128x49xbf16>, vector<128x49xbf16>, vector<128x49xbf16>, vector<128x49xbf16>, vector<128x49xbf16> -> vector<1152x49xbf16>
    %c0_29 = arith.constant 0 : index
    %c0_30 = arith.constant 0 : index
    %120 = vector.load %arg4[%c0_29, %c0_30] : memref<32x1152xbf16, #tpu.memory_space<vmem>>, vector<32x1152xbf16>
    %cst_31 = arith.constant dense<0.000000e+00> : vector<32x49xf32>
    %121 = tpu.matmul %120, %119, %cst_31 {dimension_numbers = #tpu.dot_dimension_numbers<[1], [0], [0], [1], [0, 0, 1, 1], [], []>} : vector<32x1152xbf16>, vector<1152x49xbf16>, vector<32x49xf32> -> vector<32x49xf32>
    %c0_32 = arith.constant 0 : index
    %c0_33 = arith.constant 0 : index
    %122 = vector.load %arg5[%c0_32, %c0_33] : memref<32x49xf32, #tpu.memory_space<vmem>>, vector<32x49xf32>
    tpu.vector_store %arg5[%c0_32, %c0_33], %121 {strides = array<i32>} : memref<32x49xf32, #tpu.memory_space<vmem>>, vector<32x49xf32>,
    return
  }
}

</mosaic_0001>

<bundles_post_ra>
// kernel: fused_forward.1
= control target key start
LH: loop header
LB: loop body
LE: loop exit
PB: predicated region body
PF: predicated region fallthrough
CT: control target
= control target key end

     0   :  { %vm1017_vm0 = vcmask 785408   ;;  %vm1721_vm1 = vcmask 400384   ;;  %s3930_s14 = smov 1   ;;  %s3931_s15 = smov 6   ;;  %vm3936_vm15 = vmmov 1   ;;  %s5941_s0 = inlined_call_operand.vmem [shape: f32[1760,49], index: 0, kind: input, shape index: {}]   ;;  %s5942_s1 = inlined_call_operand.vmem [shape: bf16[128,1760], index: 1, kind: input, shape index: {}]   ;;  %s5943_s3 = inlined_call_operand.vmem [shape: f32[128,1], index: 3, kind: input, shape index: {}]   ;;  %s5944_s2 = inlined_call_operand.vmem [shape: f32[128,1], index: 2, kind: input, shape index: {}]   ;;  %s5945_s4 = inlined_call_operand.vmem [shape: bf16[32,1152], index: 4, kind: input, shape index: {}]   ;;  %s5946_s5 = inlined_call_operand.vmem [shape: f32[32,49], index: 5, kind: output, shape index: {}]  }
   0x1   :  { %v53_v0 = vld [vmem:[%s5941_s0 + $0xf0] sm:$0xff]  ;;  %v54_v1 = vld [vmem:[%s5941_s0 + $0xf8] sm:$0xff]  ;;  %v51_v11 = vld [vmem:[%s5941_s0 + $0xe0] sm:$0xff]  ;;  %s3932_s18 = smov 127   ;;  %s3933_s19 = smov 122  }
   0x2   :  { %v85_v2 = vld [vmem:[%s5941_s0 + $0x1f0] sm:$0xff]  ;;  %v258_v3 = vpack.c.bf16 %v54_v1, %v53_v0  ;;  %v86_v4 = vld [vmem:[%s5941_s0 + $0x1f8] sm:$0xff]  ;;  %v52_v13 = vld [vmem:[%s5941_s0 + $0xe8] sm:$0xff]  ;;  %s3934_s20 = smov 121   ;;  %s3935_s23 = smov 120  }
   0x3   :  { %v37_v5 = vld [vmem:[%s5941_s0 + $0x70] sm:$0xff]  ;;  %v38_v6 = vld [vmem:[%s5941_s0 + $0x78] sm:$0xff]  ;;  %v274_v7 = vpack.c.bf16 %v86_v4, %v85_v2  ;;  %v83_v14 = vld [vmem:[%s5941_s0 + $0x1e0] sm:$0xff]  ;;  %v257_v16 = vpack.c.bf16 %v52_v13, %v51_v11 }
   0x4   :  { %v250_v8 = vpack.c.bf16 %v38_v6, %v37_v5  ;;  %v69_v9 = vld [vmem:[%s5941_s0 + $0x170] sm:$0xff]  ;;  %v70_v10 = vld [vmem:[%s5941_s0 + $0x178] sm:$0xff]  ;;  %3131 = vmatprep.subr.bf16.mxu0 %v258_v3  ;;  %v84_v15 = vld [vmem:[%s5941_s0 + $0x1e8] sm:$0xff] }
   0x5   :  { %v266_v12 = vpack.c.bf16 %v70_v10, %v69_v9  ;;  %3195 = vmatprep.subr.bf16.mxu1 %v274_v7  ;;  %v273_v17 = vpack.c.bf16 %v84_v15, %v83_v14  ;;  %v35_v18 = vld [vmem:[%s5941_s0 + $0x60] sm:$0xff]  ;;  %v36_v19 = vld [vmem:[%s5941_s0 + $0x68] sm:$0xff]  ;;  %v49_v23 = vld [vmem:[%s5941_s0 + $0xd0] sm:$0xff] }
   0x6   :  { %3132 = vmatpush3.bf16.msra.mxu0 %v250_v8  ;;  %v67_v20 = vld [vmem:[%s5941_s0 + $0x160] sm:$0xff]  ;;  %v249_v21 = vpack.c.bf16 %v36_v19, %v35_v18  ;;  %v68_v22 = vld [vmem:[%s5941_s0 + $0x168] sm:$0xff]  ;;  %v50_v24 = vld [vmem:[%s5941_s0 + $0xd8] sm:$0xff] }
   0x7   :  { %3196 = vmatpush3.bf16.msra.mxu1 %v266_v12  ;;  %3133 = vmatprep.subr.bf16.mxu0 %v257_v16  ;;  %v265_v25 = vpack.c.bf16 %v68_v22, %v67_v20  ;;  %v256_v26 = vpack.c.bf16 %v50_v24, %v49_v23  ;;  %v81_v27 = vld [vmem:[%s5941_s0 + $0x1d0] sm:$0xff]  ;;  %v82_v28 = vld [vmem:[%s5941_s0 + $0x1d8] sm:$0xff]  ;;  %v47_v35 = vld [vmem:[%s5941_s0 + $0xc0] sm:$0xff] }
   0x8   :  { %3197 = vmatprep.subr.bf16.mxu1 %v273_v17  ;;  %v33_v29 = vld [vmem:[%s5941_s0 + $0x50] sm:$0xff]  ;;  %v272_v30 = vpack.c.bf16 %v82_v28, %v81_v27  ;;  %v34_v31 = vld [vmem:[%s5941_s0 + $0x58] sm:$0xff]  ;;  %v48_v36 = vld [vmem:[%s5941_s0 + $0xc8] sm:$0xff] }
   0x9   :  { %v65_v32 = vld [vmem:[%s5941_s0 + $0x150] sm:$0xff]  ;;  %v66_v33 = vld [vmem:[%s5941_s0 + $0x158] sm:$0xff]  ;;  %v248_v34 = vpack.c.bf16 %v34_v31, %v33_v29  ;;  %v79_v37 = vld [vmem:[%s5941_s0 + $0x1c0] sm:$0xff]  ;;  %v255_v39 = vpack.c.bf16 %v48_v36, %v47_v35 }
   0xa   :  { %3134 = vmatpush3.bf16.msra.mxu0 %v249_v21  ;;  %v264_v38 = vpack.c.bf16 %v66_v33, %v65_v32  ;;  %v80_v40 = vld [vmem:[%s5941_s0 + $0x1c8] sm:$0xff]  ;;  %v31_v41 = vld [vmem:[%s5941_s0 + $0x40] sm:$0xff]  ;;  %v45_v46 = vld [vmem:[%s5941_s0 + $0xb0] sm:$0xff] }
   0xb   :  { %3198 = vmatpush3.bf16.msra.mxu1 %v265_v25  ;;  %3135 = vmatprep.subr.bf16.mxu0 %v256_v26  ;;  %v32_v42 = vld [vmem:[%s5941_s0 + $0x48] sm:$0xff]  ;;  %v271_v43 = vpack.c.bf16 %v80_v40, %v79_v37  ;;  %v63_v44 = vld [vmem:[%s5941_s0 + $0x140] sm:$0xff]  ;;  %v46_v47 = vld [vmem:[%s5941_s0 + $0xb8] sm:$0xff] }
   0xc   :  { %3199 = vmatprep.subr.bf16.mxu1 %v272_v30  ;;  %v64_v45 = vld [vmem:[%s5941_s0 + $0x148] sm:$0xff]  ;;  %v77_v48 = vld [vmem:[%s5941_s0 + $0x1b0] sm:$0xff]  ;;  %v78_v49 = vld [vmem:[%s5941_s0 + $0x1b8] sm:$0xff]  ;;  %v247_v50 = vpack.c.bf16 %v32_v42, %v31_v41  ;;  %v254_v52 = vpack.c.bf16 %v46_v47, %v45_v46 }
   0xd   :  { %v263_v51 = vpack.c.bf16 %v64_v45, %v63_v44  ;;  %v29_v53 = vld [vmem:[%s5941_s0 + $0x30] sm:$0xff]  ;;  %v30_v54 = vld [vmem:[%s5941_s0 + $0x38] sm:$0xff]  ;;  %v270_v56 = vpack.c.bf16 %v78_v49, %v77_v48  ;;  %v43_v58 = vld [vmem:[%s5941_s0 + $0xa0] sm:$0xff] }
   0xe   :  { %3136 = vmatpush3.bf16.msra.mxu0 %v248_v34  ;;  %v61_v55 = vld [vmem:[%s5941_s0 + $0x130] sm:$0xff]  ;;  %v62_v57 = vld [vmem:[%s5941_s0 + $0x138] sm:$0xff]  ;;  %v44_v59 = vld [vmem:[%s5941_s0 + $0xa8] sm:$0xff]  ;;  %v246_v62 = vpack.c.bf16 %v30_v54, %v29_v53 }
   0xf   :  { %3200 = vmatpush3.bf16.msra.mxu1 %v264_v38  ;;  %3137 = vmatprep.subr.bf16.mxu0 %v255_v39  ;;  %v75_v60 = vld [vmem:[%s5941_s0 + $0x1a0] sm:$0xff]  ;;  %v76_v61 = vld [vmem:[%s5941_s0 + $0x1a8] sm:$0xff]  ;;  %v262_v0 = vpack.c.bf16 %v62_v57, %v61_v55  ;;  %v253_v1 = vpack.c.bf16 %v44_v59, %v43_v58  ;;  %v41_v6 = vld [vmem:[%s5941_s0 + $0x90] sm:$0xff] }
  0x10   :  { %3201 = vmatprep.subr.bf16.mxu1 %v271_v43  ;;  %v27_v63 = vld [vmem:[%s5941_s0 + $0x20] sm:$0xff]  ;;  %v28_v2 = vld [vmem:[%s5941_s0 + $0x28] sm:$0xff]  ;;  %v269_v5 = vpack.c.bf16 %v76_v61, %v75_v60  ;;  %v42_v7 = vld [vmem:[%s5941_s0 + $0x98] sm:$0xff] }
  0x11   :  { %v59_v3 = vld [vmem:[%s5941_s0 + $0x120] sm:$0xff]  ;;  %v60_v4 = vld [vmem:[%s5941_s0 + $0x128] sm:$0xff]  ;;  %v73_v8 = vld [vmem:[%s5941_s0 + $0x190] sm:$0xff]  ;;  %v245_v12 = vpack.c.bf16 %v28_v2, %v27_v63  ;;  %v252_v17 = vpack.c.bf16 %v42_v7, %v41_v6 }
  0x12   :  { %3138 = vmatpush3.bf16.msra.mxu0 %v247_v50  ;;  %v74_v9 = vld [vmem:[%s5941_s0 + $0x198] sm:$0xff]  ;;  %v25_v10 = vld [vmem:[%s5941_s0 + $0x10] sm:$0xff]  ;;  %v39_v15 = vld [vmem:[%s5941_s0 + $0x80] sm:$0xff]  ;;  %v261_v16 = vpack.c.bf16 %v60_v4, %v59_v3 }
  0x13   :  { %3202 = vmatpush3.bf16.msra.mxu1 %v263_v51  ;;  %3139 = vmatprep.subr.bf16.mxu0 %v254_v52  ;;  %v26_v11 = vld [vmem:[%s5941_s0 + $0x18] sm:$0xff]  ;;  %v57_v13 = vld [vmem:[%s5941_s0 + $0x110] sm:$0xff]  ;;  %v40_v18 = vld [vmem:[%s5941_s0 + $0x88] sm:$0xff]  ;;  %v268_v19 = vpack.c.bf16 %v74_v9, %v73_v8 }
  0x14   :  { %3203 = vmatprep.subr.bf16.mxu1 %v270_v56  ;;  %v58_v14 = vld [vmem:[%s5941_s0 + $0x118] sm:$0xff]  ;;  %v71_v20 = vld [vmem:[%s5941_s0 + $0x180] sm:$0xff]  ;;  %v72_v22 = vld [vmem:[%s5941_s0 + $0x188] sm:$0xff]  ;;  %v244_v24 = vpack.c.bf16 %v26_v11, %v25_v10  ;;  %v251_v27 = vpack.c.bf16 %v40_v18, %v39_v15 }
  0x15   :  { %v3703_v21 = vld [vmem:[%s5942_s1 + $0x4] ss:$56 sps:$4 sm:$0xff]   ;;  %v260_v26 = vpack.c.bf16 %v58_v14, %v57_v13  ;;  %v24_v28 = vld [vmem:[%s5941_s0 + $0x8] sm:$0xff]  ;;  %v267_v29 = vpack.c.bf16 %v72_v22, %v71_v20  ;;  %v3701_v34 = vld [vmem:[%s5942_s1] ss:$56 sps:$4 sm:$0xff]   ;;  %v5947_v22 = vmov 0  }
  0x16   :  { %3140 = vmatpush3.bf16.msra.mxu0 %v246_v62  ;;  %v3706_v23 = vld [vmem:[%s5942_s1 + $0xc] ss:$56 sps:$4 sm:$0xff]   ;;  %1074 = vmatprep.mubr.bf16.mxu0 %v3703_v21  ;;  %v3704_v35 = vld [vmem:[%s5942_s1 + $0x8] ss:$56 sps:$4 sm:$0xff]   ;;  %v3709_v37 = vld [vmem:[%s5942_s1 + $0x7c] ss:$56 sps:$4 sm:$0xff]  }
  0x17   :  { %3204 = vmatpush3.bf16.msra.mxu1 %v262_v0  ;;  %3141 = vmatprep.subr.bf16.mxu0 %v253_v1  ;;  %v23_v25 = vld [vmem:[%s5941_s0] sm:$0xff]  ;;  %v56_v31 = vld [vmem:[%s5941_s0 + $0x108] sm:$0xff]  ;;  %v117_v38 = vld [vmem:[%s5941_s0 + $0x2f0] sm:$0xff] }
  0x18   :  { %3205 = vmatprep.subr.bf16.mxu1 %v269_v5  ;;  %v55_v30 = vld [vmem:[%s5941_s0 + $0x100] sm:$0xff]  ;;  %1171 = vmatprep.mubr.bf16.mxu1 %v3706_v23  ;;  %v243_v32 = vpack.c.bf16 %v24_v28, %v23_v25  ;;  %v3707_v36 = vld [vmem:[%s5942_s1 + $0x74] ss:$56 sps:$4 sm:$0xff]   ;;  %v118_v39 = vld [vmem:[%s5941_s0 + $0x2f8] sm:$0xff] }
  0x19   :  { %v259_v33 = vpack.c.bf16 %v56_v31, %v55_v30  ;;  %v101_v40 = vld [vmem:[%s5941_s0 + $0x270] sm:$0xff]  ;;  %v290_v41 = vpack.c.bf16 %v118_v39, %v117_v38  ;;  %v102_v42 = vld [vmem:[%s5941_s0 + $0x278] sm:$0xff]  ;;  %v115_v50 = vld [vmem:[%s5941_s0 + $0x2e0] sm:$0xff]  ;;  %3699 = vset.pattern.permute.xlu1 %v5947_v22  ;;  %3700 = vset.pattern.permute.xlu0 %v5947_v22 }
  0x1a   :  { %3142 = vmatpush3.bf16.msra.mxu0 %v245_v12  ;;  %v282_v43 = vpack.c.bf16 %v102_v42, %v101_v40  ;;  %v149_v44 = vld [vmem:[%s5941_s0 + $0x3f0] sm:$0xff]  ;;  %v150_v45 = vld [vmem:[%s5941_s0 + $0x3f8] sm:$0xff]  ;;  %v116_v51 = vld [vmem:[%s5941_s0 + $0x2e8] sm:$0xff] }
  0x1b   :  { %3206 = vmatpush3.bf16.msra.mxu1 %v261_v16  ;;  %3143 = vmatprep.subr.bf16.mxu0 %v252_v17  ;;  %v133_v46 = vld [vmem:[%s5941_s0 + $0x370] sm:$0xff]  ;;  %v306_v48 = vpack.c.bf16 %v150_v45, %v149_v44  ;;  %v134_v49 = vld [vmem:[%s5941_s0 + $0x378] sm:$0xff]  ;;  %v289_v54 = vpack.c.bf16 %v116_v51, %v115_v50  ;;  %v99_v55 = vld [vmem:[%s5941_s0 + $0x260] sm:$0xff] }
  0x1c   :  { %3207 = vmatprep.subr.bf16.mxu1 %v268_v19  ;;  %v3711_v47 = vld [vmem:[%s5942_s1 + $0x70] ss:$56 sps:$4 sm:$0xff]   ;;  %v298_v53 = vpack.c.bf16 %v134_v49, %v133_v46  ;;  %v147_v57 = vld [vmem:[%s5941_s0 + $0x3e0] sm:$0xff]  ;;  %v114_v3 = vld [vmem:[%s5941_s0 + $0x2d8] sm:$0xff] }
  0x1d   :  { %v3712_v52 = vld [vmem:[%s5942_s1 + $0x78] ss:$56 sps:$4 sm:$0xff]   ;;  %v100_v56 = vld [vmem:[%s5941_s0 + $0x268] sm:$0xff]  ;;  %v3713_v60 = vld [vmem:[%s5942_s1 + $0xe4] ss:$56 sps:$4 sm:$0xff]  }
  0x1e   :  { %3144 = vmatpush3.bf16.msra.mxu0 %v244_v24  ;;  %v281_v58 = vpack.c.bf16 %v100_v56, %v99_v55  ;;  %v148_v59 = vld [vmem:[%s5941_s0 + $0x3e8] sm:$0xff]  ;;  %v131_v63 = vld [vmem:[%s5941_s0 + $0x360] sm:$0xff]  ;;  %v113_v2 = vld [vmem:[%s5941_s0 + $0x2d0] sm:$0xff] }
  0x1f   :  { %3208 = vmatpush3.bf16.msra.mxu1 %v260_v26  ;;  %3145 = vmatprep.subr.bf16.mxu0 %v251_v27  ;;  %v305_v61 = vpack.c.bf16 %v148_v59, %v147_v57  ;;  %v3715_v62 = vld [vmem:[%s5942_s1 + $0xec] ss:$56 sps:$4 sm:$0xff]   ;;  %v97_v4 = vld [vmem:[%s5941_s0 + $0x250] sm:$0xff]  ;;  %v98_v5 = vld [vmem:[%s5941_s0 + $0x258] sm:$0xff]  ;;  %v288_v6 = vpack.c.bf16 %v114_v3, %v113_v2 }
  0x20   :  { %3209 = vmatprep.subr.bf16.mxu1 %v267_v29  ;;  %v132_v0 = vld [vmem:[%s5941_s0 + $0x368] sm:$0xff]  ;;  %v280_v7 = vpack.c.bf16 %v98_v5, %v97_v4  ;;  %v145_v8 = vld [vmem:[%s5941_s0 + $0x3d0] sm:$0xff]  ;;  %v146_v9 = vld [vmem:[%s5941_s0 + $0x3d8] sm:$0xff] }
  0x21   :  { %v297_v1 = vpack.c.bf16 %v132_v0, %v131_v63  ;;  %v129_v10 = vld [vmem:[%s5941_s0 + $0x350] sm:$0xff]  ;;  %v3717_v11 = vld [vmem:[%s5942_s1 + $0xe0] ss:$56 sps:$4 sm:$0xff]   ;;  %v304_v12 = vpack.c.bf16 %v146_v9, %v145_v8  ;;  %v112_v15 = vld [vmem:[%s5941_s0 + $0x2c8] sm:$0xff] }
  0x22   :  { %3146 = vmatpush3.bf16.msra.mxu0 %v243_v32  ;;  %v130_v13 = vld [vmem:[%s5941_s0 + $0x358] sm:$0xff]  ;;  %v111_v14 = vld [vmem:[%s5941_s0 + $0x2c0] sm:$0xff]  ;;  %v96_v20 = vld [vmem:[%s5941_s0 + $0x248] sm:$0xff] }
  0x23   :  { %3210 = vmatpush3.bf16.msra.mxu1 %v259_v33  ;;  %3259 = vmatprep.subr.bf16.mxu0 %v290_v41  ;;  %v3718_v16 = vld [vmem:[%s5942_s1 + $0xe8] ss:$56 sps:$4 sm:$0xff]   ;;  %v296_v17 = vpack.c.bf16 %v130_v13, %v129_v10  ;;  %v287_v18 = vpack.c.bf16 %v112_v15, %v111_v14  ;;  %v3719_v24 = vld [vmem:[%s5942_s1 + $0x154] ss:$56 sps:$4 sm:$0xff]   ;;  %v110_v32 = vld [vmem:[%s5941_s0 + $0x2b8] sm:$0xff] }
  0x24   :  { %3323 = vmatprep.subr.bf16.mxu1 %v306_v48  ;;  %v95_v19 = vld [vmem:[%s5941_s0 + $0x240] sm:$0xff]  ;;  %v144_v23 = vld [vmem:[%s5941_s0 + $0x3c8] sm:$0xff]  ;;  %v3721_v26 = vld [vmem:[%s5942_s1 + $0x15c] ss:$56 sps:$4 sm:$0xff]  }
  0x25   :  { %1075 = vmatmul.mubr.bf16.vlgmr.msra.gmra.mxu0 %v3701_v34  ;;  %v143_v21 = vld [vmem:[%s5941_s0 + $0x3c0] sm:$0xff]  ;;  %v279_v27 = vpack.c.bf16 %v96_v20, %v95_v19  ;;  %v128_v29 = vld [vmem:[%s5941_s0 + $0x348] sm:$0xff]  ;;  %v109_v31 = vld [vmem:[%s5941_s0 + $0x2b0] sm:$0xff] }
  0x26   :  { %1172 = vmatmul.mubr.bf16.vlgmr.msra.gmra.mxu1 %v3704_v35  ;;  %1082 = vmatprep.mubr.bf16.mxu0 %v3707_v36  ;;  %v303_v25 = vpack.c.bf16 %v144_v23, %v143_v21  ;;  %v127_v28 = vld [vmem:[%s5941_s0 + $0x340] sm:$0xff]  ;;  %v93_v33 = vld [vmem:[%s5941_s0 + $0x230] sm:$0xff]  ;;  %v94_v34 = vld [vmem:[%s5941_s0 + $0x238] sm:$0xff]  ;;  %v286_v35 = vpack.c.bf16 %v110_v32, %v109_v31 }
  0x27   :  { %1179 = vmatprep.mubr.bf16.mxu1 %v3709_v37  ;;  %3260 = vmatpush3.bf16.msra.mxu0 %v282_v43  ;;  %v295_v30 = vpack.c.bf16 %v128_v29, %v127_v28  ;;  %v141_v36 = vld [vmem:[%s5941_s0 + $0x3b0] sm:$0xff]  ;;  %v142_v37 = vld [vmem:[%s5941_s0 + $0x3b8] sm:$0xff]  ;;  %v278_v40 = vpack.c.bf16 %v94_v34, %v93_v33  ;;  %v107_v43 = vld [vmem:[%s5941_s0 + $0x2a0] sm:$0xff] }
  0x28   :  { %3324 = vmatpush3.bf16.msra.mxu1 %v298_v53  ;;  %3261 = vmatprep.subr.bf16.mxu0 %v289_v54  ;;  %v125_v38 = vld [vmem:[%s5941_s0 + $0x330] sm:$0xff]  ;;  %v302_v41 = vpack.c.bf16 %v142_v37, %v141_v36  ;;  %v126_v42 = vld [vmem:[%s5941_s0 + $0x338] sm:$0xff]  ;;  %v108_v44 = vld [vmem:[%s5941_s0 + $0x2a8] sm:$0xff] }
  0x29   :  { %3325 = vmatprep.subr.bf16.mxu1 %v305_v61  ;;  %v3723_v39 = vld [vmem:[%s5942_s1 + $0x150] ss:$56 sps:$4 sm:$0xff]   ;;  %v294_v46 = vpack.c.bf16 %v126_v42, %v125_v38  ;;  %v91_v48 = vld [vmem:[%s5941_s0 + $0x220] sm:$0xff]  ;;  %v182_v29 = vld [vmem:[%s5941_s0 + $0x4f8] sm:$0xff] }
  0x2a   :  { %v3724_v45 = vld [vmem:[%s5942_s1 + $0x158] ss:$56 sps:$4 sm:$0xff]   ;;  %v92_v49 = vld [vmem:[%s5941_s0 + $0x228] sm:$0xff]  ;;  %v139_v50 = vld [vmem:[%s5941_s0 + $0x3a0] sm:$0xff] }
  0x2b   :  { %3262 = vmatpush3.bf16.msra.mxu0 %v281_v58  ;;  %v140_v51 = vld [vmem:[%s5941_s0 + $0x3a8] sm:$0xff]  ;;  %v277_v55 = vpack.c.bf16 %v92_v49, %v91_v48  ;;  %v123_v56 = vld [vmem:[%s5941_s0 + $0x320] sm:$0xff]  ;;  %v105_v59 = vld [vmem:[%s5941_s0 + $0x290] sm:$0xff] }
  0x2c   :  { %3326 = vmatpush3.bf16.msra.mxu1 %v297_v1  ;;  %3263 = vmatprep.subr.bf16.mxu0 %v288_v6  ;;  %v301_v53 = vpack.c.bf16 %v140_v51, %v139_v50  ;;  %v3727_v54 = vld [vmem:[%s5942_s1 + $0x1cc] ss:$56 sps:$4 sm:$0xff]   ;;  %v89_v61 = vld [vmem:[%s5941_s0 + $0x210] sm:$0xff]  ;;  %v138_v1 = vld [vmem:[%s5941_s0 + $0x398] sm:$0xff] }
  0x2d   :  { %1083 = vmatmul.mubr.bf16.gmra.mxu0 %v3711_v47  ;;  %3327 = vmatprep.subr.bf16.mxu1 %v304_v12  ;;  %v285_v47 = vpack.c.bf16 %v108_v44, %v107_v43  ;;  %v124_v57 = vld [vmem:[%s5941_s0 + $0x328] sm:$0xff]  ;;  %v137_v0 = vld [vmem:[%s5941_s0 + $0x390] sm:$0xff]  ;;  %v3729_v3 = vld [vmem:[%s5942_s1 + $0x1c0] ss:$56 sps:$4 sm:$0xff]  }
  0x2e   :  { %1180 = vmatmul.mubr.bf16.gmra.mxu1 %v3712_v52  ;;  %1090 = vmatprep.mubr.bf16.mxu0 %v3713_v60  ;;  %v3725_v52 = vld [vmem:[%s5942_s1 + $0x1c4] ss:$56 sps:$4 sm:$0xff]   ;;  %v293_v58 = vpack.c.bf16 %v124_v57, %v123_v56  ;;  %v121_v2 = vld [vmem:[%s5941_s0 + $0x310] sm:$0xff]  ;;  %v300_v5 = vpack.c.bf16 %v138_v1, %v137_v0  ;;  %v104_v8 = vld [vmem:[%s5941_s0 + $0x288] sm:$0xff] }
  0x2f   :  { %1187 = vmatprep.mubr.bf16.mxu1 %v3715_v62  ;;  %3264 = vmatpush3.bf16.msra.mxu0 %v280_v7  ;;  %v106_v60 = vld [vmem:[%s5941_s0 + $0x298] sm:$0xff]  ;;  %v103_v7 = vld [vmem:[%s5941_s0 + $0x280] sm:$0xff]  ;;  %v88_v13 = vld [vmem:[%s5941_s0 + $0x208] sm:$0xff] }
  0x30   :  { %3265 = vmatprep.subr.bf16.mxu0 %v287_v18  ;;  %3328 = vmatpush3.bf16.msra.mxu1 %v296_v17  ;;  %v90_v62 = vld [vmem:[%s5941_s0 + $0x218] sm:$0xff]  ;;  %v284_v63 = vpack.c.bf16 %v106_v60, %v105_v59  ;;  %v3730_v9 = vld [vmem:[%s5942_s1 + $0x1c8] ss:$56 sps:$4 sm:$0xff]   ;;  %v181_v28 = vld [vmem:[%s5941_s0 + $0x4f0] sm:$0xff] }
  0x31   :  { %3329 = vmatprep.subr.bf16.mxu1 %v303_v25  ;;  %v276_v4 = vpack.c.bf16 %v90_v62, %v89_v61  ;;  %v122_v6 = vld [vmem:[%s5941_s0 + $0x318] sm:$0xff]  ;;  %v87_v12 = vld [vmem:[%s5941_s0 + $0x200] sm:$0xff]  ;;  %v136_v15 = vld [vmem:[%s5941_s0 + $0x388] sm:$0xff] }
  0x32   :  { %v292_v10 = vpack.c.bf16 %v122_v6, %v121_v2  ;;  %v135_v14 = vld [vmem:[%s5941_s0 + $0x380] sm:$0xff]  ;;  %v3733_v17 = vld [vmem:[%s5942_s1 + $0x23c] ss:$56 sps:$4 sm:$0xff]   ;;  %v275_v20 = vpack.c.bf16 %v88_v13, %v87_v12  ;;  %v120_v21 = vld [vmem:[%s5941_s0 + $0x308] sm:$0xff] }
  0x33   :  { %3266 = vmatpush3.bf16.msra.mxu0 %v279_v27  ;;  %v299_v18 = vpack.c.bf16 %v136_v15, %v135_v14  ;;  %v119_v19 = vld [vmem:[%s5941_s0 + $0x300] sm:$0xff]  ;;  %v3736_v25 = vld [vmem:[%s5942_s1 + $0x238] ss:$56 sps:$4 sm:$0xff]   ;;  %v3745_v37 = vld [vmem:[%s5942_s1 + $0x31c] ss:$56 sps:$4 sm:$0xff]  }
  0x34   :  { %3330 = vmatpush3.bf16.msra.mxu1 %v295_v30  ;;  %3267 = vmatprep.subr.bf16.mxu0 %v286_v35  ;;  %v291_v23 = vpack.c.bf16 %v120_v21, %v119_v19  ;;  %v3739_v27 = vld [vmem:[%s5942_s1 + $0x2ac] ss:$56 sps:$4 sm:$0xff]   ;;  %v322_v30 = vpack.c.bf16 %v182_v29, %v181_v28  ;;  %v213_v31 = vld [vmem:[%s5941_s0 + $0x5f0] sm:$0xff]  ;;  %v3741_v32 = vld [vmem:[%s5942_s1 + $0x2a0] ss:$56 sps:$4 sm:$0xff]  }
  0x35   :  { %1091 = vmatmul.mubr.bf16.gmra.mxu0 %v3717_v11  ;;  %3331 = vmatprep.subr.bf16.mxu1 %v302_v41  ;;  %v283_v11 = vpack.c.bf16 %v104_v8, %v103_v7  ;;  %v214_v33 = vld [vmem:[%s5941_s0 + $0x5f8] sm:$0xff]  ;;  %v3742_v34 = vld [vmem:[%s5942_s1 + $0x2a8] ss:$56 sps:$4 sm:$0xff]   ;;  %v3743_v35 = vld [vmem:[%s5942_s1 + $0x314] ss:$56 sps:$4 sm:$0xff]  }
  0x36   :  { %1188 = vmatmul.mubr.bf16.gmra.mxu1 %v3718_v16  ;;  %1098 = vmatprep.mubr.bf16.mxu0 %v3719_v24  ;;  %v3731_v16 = vld [vmem:[%s5942_s1 + $0x234] ss:$56 sps:$4 sm:$0xff]   ;;  %v3735_v24 = vld [vmem:[%s5942_s1 + $0x230] ss:$56 sps:$4 sm:$0xff]   ;;  %v338_v36 = vpack.c.bf16 %v214_v33, %v213_v31  ;;  %v179_v48 = vld [vmem:[%s5941_s0 + $0x4e0] sm:$0xff] }
  0x37   :  { %1195 = vmatprep.mubr.bf16.mxu1 %v3721_v26  ;;  %3268 = vmatpush3.bf16.msra.mxu0 %v278_v40  ;;  %v3737_v26 = vld [vmem:[%s5942_s1 + $0x2a4] ss:$56 sps:$4 sm:$0xff]   ;;  %v3747_v38 = vld [vmem:[%s5942_s1 + $0x310] ss:$56 sps:$4 sm:$0xff]   ;;  %v3751_v40 = vld [vmem:[%s5942_s1 + $0x14] ss:$56 sps:$4 sm:$0xff]  }
  0x38   :  { %3332 = vmatpush3.bf16.msra.mxu1 %v294_v46  ;;  %3269 = vmatprep.subr.bf16.mxu0 %v285_v47  ;;  %v3754_v41 = vld [vmem:[%s5942_s1 + $0x1c] ss:$56 sps:$4 sm:$0xff]   ;;  %v3749_v42 = vld [vmem:[%s5942_s1 + $0x10] ss:$56 sps:$4 sm:$0xff]   ;;  %v211_v51 = vld [vmem:[%s5941_s0 + $0x5e0] sm:$0xff] }
  0x39   :  { %3333 = vmatprep.subr.bf16.mxu1 %v301_v53  ;;  %v3752_v43 = vld [vmem:[%s5942_s1 + $0x18] ss:$56 sps:$4 sm:$0xff]   ;;  %v180_v49 = vld [vmem:[%s5941_s0 + $0x4e8] sm:$0xff]  ;;  %v3755_v50 = vld [vmem:[%s5942_s1 + $0x84] ss:$56 sps:$4 sm:$0xff]  }
  0x3a   :  { %v165_v44 = vld [vmem:[%s5941_s0 + $0x470] sm:$0xff]  ;;  %v198_v47 = vld [vmem:[%s5941_s0 + $0x578] sm:$0xff]  ;;  %v3758_v53 = vld [vmem:[%s5942_s1 + $0x8c] ss:$56 sps:$4 sm:$0xff]  }
  0x3b   :  { %3270 = vmatpush3.bf16.msra.mxu0 %v277_v55  ;;  %v197_v46 = vld [vmem:[%s5941_s0 + $0x570] sm:$0xff]  ;;  %v163_v55 = vld [vmem:[%s5941_s0 + $0x460] sm:$0xff]  ;;  %v164_v56 = vld [vmem:[%s5941_s0 + $0x468] sm:$0xff] }
  0x3c   :  { %3334 = vmatpush3.bf16.msra.mxu1 %v293_v58  ;;  %3271 = vmatprep.subr.bf16.mxu0 %v284_v63  ;;  %v330_v57 = vpack.c.bf16 %v198_v47, %v197_v46  ;;  %v321_v58 = vpack.c.bf16 %v180_v49, %v179_v48  ;;  %v195_v59 = vld [vmem:[%s5941_s0 + $0x560] sm:$0xff]  ;;  %v196_v61 = vld [vmem:[%s5941_s0 + $0x568] sm:$0xff]  ;;  %v177_v62 = vld [vmem:[%s5941_s0 + $0x4d0] sm:$0xff] }
  0x3d   :  { %1099 = vmatmul.mubr.bf16.gmra.mxu0 %v3723_v39  ;;  %3335 = vmatprep.subr.bf16.mxu1 %v300_v5  ;;  %v3748_v39 = vld [vmem:[%s5942_s1 + $0x318] ss:$56 sps:$4 sm:$0xff]   ;;  %v3761_v5 = vld [vmem:[%s5942_s1 + $0xf4] ss:$56 sps:$4 sm:$0xff]   ;;  %v329_v6 = vpack.c.bf16 %v196_v61, %v195_v59  ;;  %v175_v13 = vld [vmem:[%s5941_s0 + $0x4c0] sm:$0xff] }
  0x3e   :  { %1196 = vmatmul.mubr.bf16.gmra.mxu1 %v3724_v45  ;;  %1106 = vmatprep.mubr.bf16.mxu0 %v3725_v52  ;;  %v166_v45 = vld [vmem:[%s5941_s0 + $0x478] sm:$0xff]  ;;  %v212_v52 = vld [vmem:[%s5941_s0 + $0x5e8] sm:$0xff]  ;;  %v209_v0 = vld [vmem:[%s5941_s0 + $0x5d0] sm:$0xff] }
  0x3f   :  { %1203 = vmatprep.mubr.bf16.mxu1 %v3727_v54  ;;  %3272 = vmatpush3.bf16.msra.mxu0 %v276_v4  ;;  %v314_v54 = vpack.c.bf16 %v166_v45, %v165_v44  ;;  %v337_v60 = vpack.c.bf16 %v212_v52, %v211_v51  ;;  %v178_v63 = vld [vmem:[%s5941_s0 + $0x4d8] sm:$0xff]  ;;  %v3760_v4 = vld [vmem:[%s5942_s1 + $0x88] ss:$56 sps:$4 sm:$0xff]   ;;  %v161_v8 = vld [vmem:[%s5941_s0 + $0x450] sm:$0xff] }
  0x40   :  { %3336 = vmatpush3.bf16.msra.mxu1 %v292_v10  ;;  %3273 = vmatprep.subr.bf16.mxu0 %v283_v11  ;;  %v210_v1 = vld [vmem:[%s5941_s0 + $0x5d8] sm:$0xff]  ;;  %v320_v7 = vpack.c.bf16 %v178_v63, %v177_v62  ;;  %v193_v10 = vld [vmem:[%s5941_s0 + $0x550] sm:$0xff]  ;;  %v176_v14 = vld [vmem:[%s5941_s0 + $0x4c8] sm:$0xff] }
  0x41   :  { %3337 = vmatprep.subr.bf16.mxu1 %v299_v18  ;;  %v3757_v2 = vld [vmem:[%s5942_s1 + $0x80] ss:$56 sps:$4 sm:$0xff]   ;;  %v336_v11 = vpack.c.bf16 %v210_v1, %v209_v0  ;;  %v3764_v15 = vld [vmem:[%s5942_s1 + $0xfc] ss:$56 sps:$4 sm:$0xff]   ;;  %v172_v44 = vld [vmem:[%s5941_s0 + $0x4a8] sm:$0xff] }
  0x42   :  { %v194_v12 = vld [vmem:[%s5941_s0 + $0x558] sm:$0xff]  ;;  %v159_v19 = vld [vmem:[%s5941_s0 + $0x440] sm:$0xff]  ;;  %v205_v29 = vld [vmem:[%s5941_s0 + $0x5b0] sm:$0xff] }
  0x43   :  { %3274 = vmatpush3.bf16.msra.mxu0 %v275_v20  ;;  %v160_v20 = vld [vmem:[%s5941_s0 + $0x448] sm:$0xff]  ;;  %v191_v21 = vld [vmem:[%s5941_s0 + $0x540] sm:$0xff]  ;;  %v174_v28 = vld [vmem:[%s5941_s0 + $0x4b8] sm:$0xff] }
  0x44   :  { %3338 = vmatpush3.bf16.msra.mxu1 %v291_v23  ;;  %3387 = vmatprep.subr.bf16.mxu0 %v322_v30  ;;  %v328_v23 = vpack.c.bf16 %v194_v12, %v193_v10  ;;  %v157_v30 = vld [vmem:[%s5941_s0 + $0x430] sm:$0xff]  ;;  %v206_v31 = vld [vmem:[%s5941_s0 + $0x5b8] sm:$0xff]  ;;  %v311_v33 = vpack.c.bf16 %v160_v20, %v159_v19  ;;  %v155_v45 = vld [vmem:[%s5941_s0 + $0x420] sm:$0xff] }
  0x45   :  { %1107 = vmatmul.mubr.bf16.gmra.mxu0 %v3729_v3  ;;  %3451 = vmatprep.subr.bf16.mxu1 %v338_v36  ;;  %v313_v3 = vpack.c.bf16 %v164_v56, %v163_v55  ;;  %v3767_v36 = vld [vmem:[%s5942_s1 + $0x164] ss:$56 sps:$4 sm:$0xff]   ;;  %v204_v47 = vld [vmem:[%s5941_s0 + $0x5a8] sm:$0xff]  ;;  %v169_v55 = vld [vmem:[%s5941_s0 + $0x490] sm:$0xff] }
  0x46   :  { %1204 = vmatmul.mubr.bf16.gmra.mxu1 %v3730_v9  ;;  %1114 = vmatprep.mubr.bf16.mxu0 %v3731_v16  ;;  %v162_v9 = vld [vmem:[%s5941_s0 + $0x458] sm:$0xff]  ;;  %v207_v16 = vld [vmem:[%s5941_s0 + $0x5c0] sm:$0xff]  ;;  %v156_v49 = vld [vmem:[%s5941_s0 + $0x428] sm:$0xff] }
  0x47   :  { %1211 = vmatprep.mubr.bf16.mxu1 %v3733_v17  ;;  %v208_v17 = vld [vmem:[%s5941_s0 + $0x5c8] sm:$0xff]  ;;  %v312_v18 = vpack.c.bf16 %v162_v9, %v161_v8  ;;  %v203_v46 = vld [vmem:[%s5941_s0 + $0x5a0] sm:$0xff]  ;;  %v170_v56 = vld [vmem:[%s5941_s0 + $0x498] sm:$0xff]  ;;  %v309_v61 = vpack.c.bf16 %v156_v49, %v155_v45 }
  0x48   :  { %v187_v52 = vld [vmem:[%s5941_s0 + $0x520] sm:$0xff]  ;;  %v202_v59 = vld [vmem:[%s5941_s0 + $0x598] sm:$0xff]  ;;  %v316_v1 = vpack.c.bf16 %v170_v56, %v169_v55  ;;  %v200_v9 = vld [vmem:[%s5941_s0 + $0x588] sm:$0xff] }
  0x49   :  { %v154_v62 = vld [vmem:[%s5941_s0 + $0x418] sm:$0xff]  ;;  %v3772_v63 = vld [vmem:[%s5942_s1 + $0x168] ss:$56 sps:$4 sm:$0xff]  }
  0x4a   :  { %v199_v8 = vld [vmem:[%s5941_s0 + $0x580] sm:$0xff]  ;;  %v3776_v10 = vld [vmem:[%s5942_s1 + $0x1dc] ss:$56 sps:$4 sm:$0xff]   ;;  %v224_v56 = vld [vmem:[%s5941_s0 + $0x648] sm:$0xff] }
  0x4b   :  { %v227_v45 = vld [vmem:[%s5941_s0 + $0x660] sm:$0xff]  ;;  %v226_v49 = vld [vmem:[%s5941_s0 + $0x658] sm:$0xff] }
  0x4c   :  { %v223_v55 = vld [vmem:[%s5941_s0 + $0x640] sm:$0xff] }
  0x4d   :  { %1115 = vmatmul.mubr.bf16.gmra.mxu0 %v3735_v24  ;;  %v319_v24 = vpack.c.bf16 %v176_v14, %v175_v13  ;;  %v151_v14 = vld [vmem:[%s5941_s0 + $0x400] sm:$0xff] }
  0x4e   :  { %1212 = vmatmul.mubr.bf16.gmra.mxu1 %v3736_v25  ;;  %1122 = vmatprep.mubr.bf16.mxu0 %v3737_v26  ;;  %v192_v25 = vld [vmem:[%s5941_s0 + $0x548] sm:$0xff]  ;;  %v335_v26 = vpack.c.bf16 %v208_v17, %v207_v16  ;;  %v331_v16 = vpack.c.bf16 %v200_v9, %v199_v8  ;;  %v183_v17 = vld [vmem:[%s5941_s0 + $0x500] sm:$0xff] }
  0x4f   :  { %1219 = vmatprep.mubr.bf16.mxu1 %v3739_v27  ;;  %v173_v27 = vld [vmem:[%s5941_s0 + $0x4b0] sm:$0xff]  ;;  %v3821_v8 = vld [vmem:[%s5942_s1 + $0x1e4] ss:$56 sps:$4 sm:$0xff]  }
  0x50   :  { %v3824_v9 = vld [vmem:[%s5942_s1 + $0x1ec] ss:$56 sps:$4 sm:$0xff]  }
  0x55   :  { %1123 = vmatmul.mubr.bf16.gmra.mxu0 %v3741_v32  ;;  %v3763_v32 = vld [vmem:[%s5942_s1 + $0xf0] ss:$56 sps:$4 sm:$0xff]  }
  0x56   :  { %1220 = vmatmul.mubr.bf16.gmra.mxu1 %v3742_v34  ;;  %1130 = vmatprep.mubr.bf16.mxu0 %v3743_v35  ;;  %v158_v34 = vld [vmem:[%s5941_s0 + $0x438] sm:$0xff] }
  0x57   :  { %1227 = vmatprep.mubr.bf16.mxu1 %v3745_v37  ;;  %v3766_v35 = vld [vmem:[%s5942_s1 + $0xf8] ss:$56 sps:$4 sm:$0xff]   ;;  %v327_v37 = vpack.c.bf16 %v192_v25, %v191_v21  ;;  %v310_v48 = vpack.c.bf16 %v158_v34, %v157_v30  ;;  %v3782_v25 = vld [vmem:[%s5942_s1 + $0x24c] ss:$56 sps:$4 sm:$0xff]  }
  0x58   :  { %v3775_v21 = vld [vmem:[%s5942_s1 + $0x1d0] ss:$56 sps:$4 sm:$0xff]   ;;  %v3793_v34 = vld [vmem:[%s5942_s1 + $0x320] ss:$56 sps:$4 sm:$0xff]  }
  0x59   :  { %v3787_v30 = vld [vmem:[%s5942_s1 + $0x2b0] ss:$56 sps:$4 sm:$0xff]  }
  0x5d   :  { %1131 = vmatmul.mubr.bf16.gmra.mxu0 %v3747_v38  ;;  %v318_v38 = vpack.c.bf16 %v174_v28, %v173_v27  ;;  %v3784_v27 = vld [vmem:[%s5942_s1 + $0x248] ss:$56 sps:$4 sm:$0xff]   ;;  %v3785_v28 = vld [vmem:[%s5942_s1 + $0x2b4] ss:$56 sps:$4 sm:$0xff]  }
  0x5e   :  { %1228 = vmatmul.mubr.bf16.gmra.mxu1 %v3748_v39  ;;  %1268 = vmatprep.mubr.bf16.mxu0 %v3751_v40  ;;  %v189_v39 = vld [vmem:[%s5941_s0 + $0x530] sm:$0xff]  ;;  %v190_v40 = vld [vmem:[%s5941_s0 + $0x538] sm:$0xff] }
  0x5f   :  { %1365 = vmatprep.mubr.bf16.mxu1 %v3754_v41  ;;  %v3770_v41 = vld [vmem:[%s5942_s1 + $0x16c] ss:$56 sps:$4 sm:$0xff]  }
  0x65   :  { %1269 = vmatmul.mubr.bf16.vlgmr.msra.gmra.mxu0 %v3749_v42  ;;  %v334_v42 = vpack.c.bf16 %v206_v31, %v205_v29  ;;  %v3788_v29 = vld [vmem:[%s5942_s1 + $0x2bc] ss:$56 sps:$4 sm:$0xff]   ;;  %v3790_v31 = vld [vmem:[%s5942_s1 + $0x2b8] ss:$56 sps:$4 sm:$0xff]  }
  0x66   :  { %1366 = vmatmul.mubr.bf16.vlgmr.msra.gmra.mxu1 %v3752_v43  ;;  %1276 = vmatprep.mubr.bf16.mxu0 %v3755_v50  ;;  %v171_v43 = vld [vmem:[%s5941_s0 + $0x4a0] sm:$0xff]  ;;  %v326_v50 = vpack.c.bf16 %v190_v40, %v189_v39  ;;  %v230_v39 = vld [vmem:[%s5941_s0 + $0x678] sm:$0xff] }
  0x67   :  { %1373 = vmatprep.mubr.bf16.mxu1 %v3758_v53  ;;  %3388 = vmatpush3.bf16.msra.mxu0 %v314_v54  ;;  %v317_v51 = vpack.c.bf16 %v172_v44, %v171_v43  ;;  %v188_v53 = vld [vmem:[%s5941_s0 + $0x528] sm:$0xff]  ;;  %v333_v54 = vpack.c.bf16 %v204_v47, %v203_v46  ;;  %v3797_v40 = vld [vmem:[%s5942_s1 + $0x20] ss:$56 sps:$4 sm:$0xff]   ;;  %v3806_v43 = vld [vmem:[%s5942_s1 + $0x9c] ss:$56 sps:$4 sm:$0xff]  }
  0x68   :  { %3452 = vmatpush3.bf16.msra.mxu1 %v330_v57  ;;  %3389 = vmatprep.subr.bf16.mxu0 %v321_v58  ;;  %v153_v57 = vld [vmem:[%s5941_s0 + $0x410] sm:$0xff]  ;;  %v325_v0 = vpack.c.bf16 %v188_v53, %v187_v52  ;;  %v228_v46 = vld [vmem:[%s5941_s0 + $0x668] sm:$0xff]  ;;  %v3809_v52 = vld [vmem:[%s5942_s1 + $0x104] ss:$56 sps:$4 sm:$0xff]  }
  0x69   :  { %3453 = vmatprep.subr.bf16.mxu1 %v337_v60  ;;  %v201_v58 = vld [vmem:[%s5941_s0 + $0x590] sm:$0xff]  ;;  %v3769_v60 = vld [vmem:[%s5942_s1 + $0x160] ss:$56 sps:$4 sm:$0xff]   ;;  %v345_v47 = vpack.c.bf16 %v228_v46, %v227_v45  ;;  %v3812_v53 = vld [vmem:[%s5942_s1 + $0x10c] ss:$56 sps:$4 sm:$0xff]  }
  0x6a   :  { %v3841_v45 = vld [vmem:[%s5942_s1 + $0x330] ss:$56 sps:$4 sm:$0xff]  }
  0x6b   :  { %3390 = vmatpush3.bf16.msra.mxu0 %v313_v3  ;;  %v186_v3 = vld [vmem:[%s5941_s0 + $0x518] sm:$0xff] }
  0x6c   :  { %3454 = vmatpush3.bf16.msra.mxu1 %v329_v6  ;;  %3391 = vmatprep.subr.bf16.mxu0 %v320_v7  ;;  %v168_v6 = vld [vmem:[%s5941_s0 + $0x488] sm:$0xff]  ;;  %v3844_v46 = vld [vmem:[%s5942_s1 + $0x338] ss:$56 sps:$4 sm:$0xff]  }
  0x6d   :  { %1277 = vmatmul.mubr.bf16.gmra.mxu0 %v3757_v2  ;;  %3455 = vmatprep.subr.bf16.mxu1 %v336_v11  ;;  %v185_v2 = vld [vmem:[%s5941_s0 + $0x510] sm:$0xff]  ;;  %v308_v11 = vpack.c.bf16 %v154_v62, %v153_v57  ;;  %v343_v57 = vpack.c.bf16 %v224_v56, %v223_v55 }
  0x6e   :  { %1374 = vmatmul.mubr.bf16.gmra.mxu1 %v3760_v4  ;;  %1284 = vmatprep.mubr.bf16.mxu0 %v3761_v5  ;;  %v332_v4 = vpack.c.bf16 %v202_v59, %v201_v58  ;;  %v167_v5 = vld [vmem:[%s5941_s0 + $0x480] sm:$0xff]  ;;  %v3773_v7 = vld [vmem:[%s5942_s1 + $0x1d4] ss:$56 sps:$4 sm:$0xff]   ;;  %v324_v12 = vpack.c.bf16 %v186_v3, %v185_v2  ;;  %v222_v59 = vld [vmem:[%s5941_s0 + $0x638] sm:$0xff] }
  0x6f   :  { %1381 = vmatprep.mubr.bf16.mxu1 %v3764_v15  ;;  %3392 = vmatpush3.bf16.msra.mxu0 %v312_v18  ;;  %v315_v13 = vpack.c.bf16 %v168_v6, %v167_v5  ;;  %v152_v15 = vld [vmem:[%s5941_s0 + $0x408] sm:$0xff]  ;;  %v221_v58 = vld [vmem:[%s5941_s0 + $0x630] sm:$0xff]  ;;  %v218_v5 = vld [vmem:[%s5941_s0 + $0x618] sm:$0xff] }
  0x70   :  { %3456 = vmatpush3.bf16.msra.mxu1 %v328_v23  ;;  %3393 = vmatprep.subr.bf16.mxu0 %v319_v24  ;;  %v184_v18 = vld [vmem:[%s5941_s0 + $0x508] sm:$0xff]  ;;  %v307_v19 = vpack.c.bf16 %v152_v15, %v151_v14  ;;  %v3778_v23 = vld [vmem:[%s5942_s1 + $0x1d8] ss:$56 sps:$4 sm:$0xff]   ;;  %v3779_v24 = vld [vmem:[%s5942_s1 + $0x244] ss:$56 sps:$4 sm:$0xff]  }
  0x71   :  { %3457 = vmatprep.subr.bf16.mxu1 %v335_v26  ;;  %v323_v20 = vpack.c.bf16 %v184_v18, %v183_v17  ;;  %v3781_v26 = vld [vmem:[%s5942_s1 + $0x240] ss:$56 sps:$4 sm:$0xff]   ;;  %v3815_v62 = vld [vmem:[%s5942_s1 + $0x174] ss:$56 sps:$4 sm:$0xff]   ;;  %v3817_v6 = vld [vmem:[%s5942_s1 + $0x170] ss:$56 sps:$4 sm:$0xff]  }
  0x72   :  { %v220_v2 = vld [vmem:[%s5941_s0 + $0x628] sm:$0xff]  ;;  %v241_v14 = vld [vmem:[%s5941_s0 + $0x6d0] sm:$0xff]  ;;  %v242_v15 = vld [vmem:[%s5941_s0 + $0x6d8] sm:$0xff] }
  0x73   :  { %3394 = vmatpush3.bf16.msra.mxu0 %v311_v33  ;;  %v3794_v33 = vld [vmem:[%s5942_s1 + $0x32c] ss:$56 sps:$4 sm:$0xff]   ;;  %v3826_v17 = vld [vmem:[%s5942_s1 + $0x1e8] ss:$56 sps:$4 sm:$0xff]  }
  0x74   :  { %3458 = vmatpush3.bf16.msra.mxu1 %v327_v37  ;;  %3395 = vmatprep.subr.bf16.mxu0 %v318_v38  ;;  %v3802_v37 = vld [vmem:[%s5942_s1 + $0x2c] ss:$56 sps:$4 sm:$0xff]   ;;  %v229_v38 = vld [vmem:[%s5941_s0 + $0x670] sm:$0xff] }
  0x75   :  { %1285 = vmatmul.mubr.bf16.gmra.mxu0 %v3763_v32  ;;  %3459 = vmatprep.subr.bf16.mxu1 %v334_v42  ;;  %v3791_v32 = vld [vmem:[%s5942_s1 + $0x324] ss:$56 sps:$4 sm:$0xff]   ;;  %v3803_v42 = vld [vmem:[%s5942_s1 + $0x94] ss:$56 sps:$4 sm:$0xff]   ;;  %v346_v44 = vpack.c.bf16 %v230_v39, %v229_v38  ;;  %v3838_v38 = vld [vmem:[%s5942_s1 + $0x2c8] ss:$56 sps:$4 sm:$0xff]  }
  0x76   :  { %1382 = vmatmul.mubr.bf16.gmra.mxu1 %v3766_v35  ;;  %1292 = vmatprep.mubr.bf16.mxu0 %v3767_v36  ;;  %v3796_v35 = vld [vmem:[%s5942_s1 + $0x328] ss:$56 sps:$4 sm:$0xff]   ;;  %v3799_v36 = vld [vmem:[%s5942_s1 + $0x24] ss:$56 sps:$4 sm:$0xff]   ;;  %v3827_v18 = vld [vmem:[%s5942_s1 + $0x254] ss:$56 sps:$4 sm:$0xff]  }
  0x77   :  { %1389 = vmatprep.mubr.bf16.mxu1 %v3770_v41  ;;  %3396 = vmatpush3.bf16.msra.mxu0 %v310_v48  ;;  %v3800_v41 = vld [vmem:[%s5942_s1 + $0x28] ss:$56 sps:$4 sm:$0xff]   ;;  %v225_v48 = vld [vmem:[%s5941_s0 + $0x650] sm:$0xff] }
  0x78   :  { %3460 = vmatpush3.bf16.msra.mxu1 %v326_v50  ;;  %3397 = vmatprep.subr.bf16.mxu0 %v317_v51  ;;  %v3805_v50 = vld [vmem:[%s5942_s1 + $0x90] ss:$56 sps:$4 sm:$0xff]   ;;  %v3839_v39 = vld [vmem:[%s5942_s1 + $0x334] ss:$56 sps:$4 sm:$0xff]  }
  0x79   :  { %3461 = vmatprep.subr.bf16.mxu1 %v333_v54  ;;  %v3808_v51 = vld [vmem:[%s5942_s1 + $0x98] ss:$56 sps:$4 sm:$0xff]   ;;  %v344_v54 = vpack.c.bf16 %v226_v49, %v225_v48  ;;  %v3848_v49 = vld [vmem:[%s5942_s1 + $0xa4] ss:$56 sps:$4 sm:$0xff]  }
  0x7a   :  { %v3845_v48 = vld [vmem:[%s5942_s1 + $0x30] ss:$56 sps:$4 sm:$0xff]  }
  0x7b   :  { %3398 = vmatpush3.bf16.msra.mxu0 %v309_v61  ;;  %v3814_v61 = vld [vmem:[%s5942_s1 + $0x108] ss:$56 sps:$4 sm:$0xff]  }
  0x7c   :  { %3462 = vmatpush3.bf16.msra.mxu1 %v325_v0  ;;  %3399 = vmatprep.subr.bf16.mxu0 %v316_v1  ;;  %v342_v0 = vpack.c.bf16 %v222_v59, %v221_v58  ;;  %v219_v1 = vld [vmem:[%s5941_s0 + $0x620] sm:$0xff]  ;;  %v3851_v59 = vld [vmem:[%s5942_s1 + $0x114] ss:$56 sps:$4 sm:$0xff]  }
  0x7d   :  { %1293 = vmatmul.mubr.bf16.gmra.mxu0 %v3769_v60  ;;  %3463 = vmatprep.subr.bf16.mxu1 %v332_v4  ;;  %v3811_v60 = vld [vmem:[%s5942_s1 + $0x100] ss:$56 sps:$4 sm:$0xff]   ;;  %v341_v3 = vpack.c.bf16 %v220_v2, %v219_v1  ;;  %v217_v4 = vld [vmem:[%s5941_s0 + $0x610] sm:$0xff] }
  0x7e   :  { %1390 = vmatmul.mubr.bf16.gmra.mxu1 %v3772_v63  ;;  %1300 = vmatprep.mubr.bf16.mxu0 %v3773_v7  ;;  %v3818_v63 = vld [vmem:[%s5942_s1 + $0x17c] ss:$56 sps:$4 sm:$0xff]   ;;  %v3820_v7 = vld [vmem:[%s5942_s1 + $0x178] ss:$56 sps:$4 sm:$0xff]  }
  0x7f   :  { %1397 = vmatprep.mubr.bf16.mxu1 %v3776_v10  ;;  %3400 = vmatpush3.bf16.msra.mxu0 %v308_v11  ;;  %v340_v10 = vpack.c.bf16 %v218_v5, %v217_v4  ;;  %v215_v11 = vld [vmem:[%s5941_s0 + $0x600] sm:$0xff] }
  0x80   :  { %3464 = vmatpush3.bf16.msra.mxu1 %v324_v12  ;;  %3401 = vmatprep.subr.bf16.mxu0 %v315_v13  ;;  %v216_v12 = vld [vmem:[%s5941_s0 + $0x608] sm:$0xff] }
  0x81   :  { %3465 = vmatprep.subr.bf16.mxu1 %v331_v16  ;;  %v339_v13 = vpack.c.bf16 %v216_v12, %v215_v11  ;;  %v3823_v16 = vld [vmem:[%s5942_s1 + $0x1e0] ss:$56 sps:$4 sm:$0xff]   ;;  %v3854_v11 = vld [vmem:[%s5942_s1 + $0x184] ss:$56 sps:$4 sm:$0xff]  }
  0x83   :  { %3402 = vmatpush3.bf16.msra.mxu0 %v307_v19  ;;  %v3830_v19 = vld [vmem:[%s5942_s1 + $0x25c] ss:$56 sps:$4 sm:$0xff]  }
  0x84   :  { %3466 = vmatpush3.bf16.msra.mxu1 %v323_v20  ;;  %1624 = vmatprep.subr.bf16.mxu0 %v5947_v22  ;;  %v352_v20 = vpack.c.bf16 %v242_v15, %v241_v14 }
  0x85   :  { %1301 = vmatmul.mubr.bf16.gmra.mxu0 %v3775_v21  ;;  %v239_v21 = vld [vmem:[%s5941_s0 + $0x6c0] sm:$0xff] }
  0x86   :  { %1398 = vmatmul.mubr.bf16.gmra.mxu1 %v3778_v23  ;;  %1308 = vmatprep.mubr.bf16.mxu0 %v3779_v24  ;;  %v240_v23 = vld [vmem:[%s5941_s0 + $0x6c8] sm:$0xff] }
  0x87   :  { %1405 = vmatprep.mubr.bf16.mxu1 %v3782_v25  ;;  %v351_v24 = vpack.c.bf16 %v240_v23, %v239_v21  ;;  %v237_v25 = vld [vmem:[%s5941_s0 + $0x6b0] sm:$0xff] }
  0x8d   :  { %1309 = vmatmul.mubr.bf16.gmra.mxu0 %v3781_v26  ;;  %v238_v26 = vld [vmem:[%s5941_s0 + $0x6b8] sm:$0xff] }
  0x8e   :  { %1406 = vmatmul.mubr.bf16.gmra.mxu1 %v3784_v27  ;;  %1316 = vmatprep.mubr.bf16.mxu0 %v3785_v28  ;;  %v3829_v27 = vld [vmem:[%s5942_s1 + $0x250] ss:$56 sps:$4 sm:$0xff]  }
  0x8f   :  { %1413 = vmatprep.mubr.bf16.mxu1 %v3788_v29  ;;  %v3832_v28 = vld [vmem:[%s5942_s1 + $0x258] ss:$56 sps:$4 sm:$0xff]   ;;  %v3833_v29 = vld [vmem:[%s5942_s1 + $0x2c4] ss:$56 sps:$4 sm:$0xff]  }
  0x95   :  { %1317 = vmatmul.mubr.bf16.gmra.mxu0 %v3787_v30  ;;  %v3836_v30 = vld [vmem:[%s5942_s1 + $0x2cc] ss:$56 sps:$4 sm:$0xff]  }
  0x96   :  { %1414 = vmatmul.mubr.bf16.gmra.mxu1 %v3790_v31  ;;  %1324 = vmatprep.mubr.bf16.mxu0 %v3791_v32  ;;  %v350_v31 = vpack.c.bf16 %v238_v26, %v237_v25  ;;  %v235_v32 = vld [vmem:[%s5941_s0 + $0x6a0] sm:$0xff] }
  0x97   :  { %1421 = vmatprep.mubr.bf16.mxu1 %v3794_v33  ;;  %v236_v33 = vld [vmem:[%s5941_s0 + $0x6a8] sm:$0xff]  ;;  %v3856_v26 = vld [vmem:[%s5942_s1 + $0x180] ss:$56 sps:$4 sm:$0xff]  }
  0x9d   :  { %1325 = vmatmul.mubr.bf16.gmra.mxu0 %v3793_v34  ;;  %v349_v34 = vpack.c.bf16 %v236_v33, %v235_v32 }
  0x9e   :  { %1422 = vmatmul.mubr.bf16.gmra.mxu1 %v3796_v35  ;;  %1462 = vmatprep.mubr.bf16.mxu0 %v3799_v36  ;;  %v233_v35 = vld [vmem:[%s5941_s0 + $0x690] sm:$0xff]  ;;  %v234_v36 = vld [vmem:[%s5941_s0 + $0x698] sm:$0xff] }
  0x9f   :  { %1559 = vmatprep.mubr.bf16.mxu1 %v3802_v37  ;;  %v3835_v37 = vld [vmem:[%s5942_s1 + $0x2c0] ss:$56 sps:$4 sm:$0xff]  }
  0xa5   :  { %1463 = vmatmul.mubr.bf16.vlgmr.msra.gmra.mxu0 %v3797_v40  ;;  %v3842_v40 = vld [vmem:[%s5942_s1 + $0x33c] ss:$56 sps:$4 sm:$0xff]  }
  0xa6   :  { %1560 = vmatmul.mubr.bf16.vlgmr.msra.gmra.mxu1 %v3800_v41  ;;  %1470 = vmatprep.mubr.bf16.mxu0 %v3803_v42  ;;  %v348_v41 = vpack.c.bf16 %v234_v36, %v233_v35  ;;  %v231_v42 = vld [vmem:[%s5941_s0 + $0x680] sm:$0xff] }
  0xa7   :  { %1567 = vmatprep.mubr.bf16.mxu1 %v3806_v43  ;;  %1625 = vmatpush1.bf16.msra.mxu0 %v346_v44  ;;  %v232_v43 = vld [vmem:[%s5941_s0 + $0x688] sm:$0xff] }
  0xa8   :  { %1626 = vmatprep.subr.bf16.mxu0 %v5947_v22  ;;  %v347_v44 = vpack.c.bf16 %v232_v43, %v231_v42  ;;  %v3859_v42 = vld [vmem:[%s5942_s1 + $0x1f0] ss:$56 sps:$4 sm:$0xff]  }
  0xab   :  { %1627 = vmatpush1.bf16.msra.mxu0 %v345_v47  ;;  %v3847_v47 = vld [vmem:[%s5942_s1 + $0x34] ss:$56 sps:$4 sm:$0xff]  }
  0xac   :  { %1628 = vmatprep.subr.bf16.mxu0 %v5947_v22 }
  0xad   :  { %1471 = vmatmul.mubr.bf16.gmra.mxu0 %v3805_v50 }
  0xae   :  { %1568 = vmatmul.mubr.bf16.gmra.mxu1 %v3808_v51  ;;  %1478 = vmatprep.mubr.bf16.mxu0 %v3809_v52 }
  0xaf   :  { %1575 = vmatprep.mubr.bf16.mxu1 %v3812_v53  ;;  %1629 = vmatpush1.bf16.msra.mxu0 %v344_v54 }
  0xb0   :  { %1630 = vmatprep.subr.bf16.mxu0 %v5947_v22 }
  0xb3   :  { %1631 = vmatpush1.bf16.msra.mxu0 %v343_v57  ;;  %v3850_v57 = vld [vmem:[%s5942_s1 + $0xa0] ss:$56 sps:$4 sm:$0xff]  }
  0xb4   :  { %1632 = vmatprep.subr.bf16.mxu0 %v5947_v22 }
  0xb5   :  { %1479 = vmatmul.mubr.bf16.gmra.mxu0 %v3811_v60 }
  0xb6   :  { %1576 = vmatmul.mubr.bf16.gmra.mxu1 %v3814_v61  ;;  %1486 = vmatprep.mubr.bf16.mxu0 %v3815_v62 }
  0xb7   :  { %1583 = vmatprep.mubr.bf16.mxu1 %v3818_v63  ;;  %1633 = vmatpush1.bf16.msra.mxu0 %v342_v0 }
  0xb8   :  { %1634 = vmatprep.subr.bf16.mxu0 %v5947_v22 }
  0xbb   :  { %1635 = vmatpush1.bf16.msra.mxu0 %v341_v3 }
  0xbc   :  { %1636 = vmatprep.subr.bf16.mxu0 %v5947_v22 }
  0xbd   :  { %1487 = vmatmul.mubr.bf16.gmra.mxu0 %v3817_v6 }
  0xbe   :  { %1584 = vmatmul.mubr.bf16.gmra.mxu1 %v3820_v7  ;;  %1494 = vmatprep.mubr.bf16.mxu0 %v3821_v8 }
  0xbf   :  { %1591 = vmatprep.mubr.bf16.mxu1 %v3824_v9  ;;  %1637 = vmatpush1.bf16.msra.mxu0 %v340_v10  ;;  %v3853_v9 = vld [vmem:[%s5942_s1 + $0x110] ss:$56 sps:$4 sm:$0xff]  }
  0xc0   :  { %1638 = vmatprep.subr.bf16.mxu0 %v5947_v22 }
  0xc3   :  { %1639 = vmatpush1.bf16.msra.mxu0 %v339_v13 }
  0xc4   :  { %1644 = vmatprep.subr.bf16.mxu0 %v5947_v22 }
  0xc5   :  { %1495 = vmatmul.mubr.bf16.gmra.mxu0 %v3823_v16 }
  0xc6   :  { %1592 = vmatmul.mubr.bf16.gmra.mxu1 %v3826_v17  ;;  %1502 = vmatprep.mubr.bf16.mxu0 %v3827_v18 }
  0xc7   :  { %1599 = vmatprep.mubr.bf16.mxu1 %v3830_v19  ;;  %1645 = vmatpush2.bf16.msra.mxu0 %v352_v20 }
  0xc8   :  { %1646 = vmatprep.subr.bf16.mxu0 %v5947_v22 }
  0xcb   :  { %1647 = vmatpush2.bf16.msra.mxu0 %v351_v24 }
  0xcc   :  { %1648 = vmatprep.subr.bf16.mxu0 %v5947_v22 }
  0xcd   :  { %1503 = vmatmul.mubr.bf16.gmra.mxu0 %v3829_v27 }
  0xce   :  { %1600 = vmatmul.mubr.bf16.gmra.mxu1 %v3832_v28  ;;  %1510 = vmatprep.mubr.bf16.mxu0 %v3833_v29  ;;  %v3857_v28 = vld [vmem:[%s5942_s1 + $0x1f4] ss:$56 sps:$4 sm:$0xff]  }
  0xcf   :  { %1607 = vmatprep.mubr.bf16.mxu1 %v3836_v30  ;;  %1649 = vmatpush2.bf16.msra.mxu0 %v350_v31 }
  0xd0   :  { %1650 = vmatprep.subr.bf16.mxu0 %v5947_v22 }
  0xd3   :  { %1651 = vmatpush2.bf16.msra.mxu0 %v349_v34 }
  0xd4   :  { %1652 = vmatprep.subr.bf16.mxu0 %v5947_v22 }
  0xd5   :  { %1511 = vmatmul.mubr.bf16.gmra.mxu0 %v3835_v37 }
  0xd6   :  { %1608 = vmatmul.mubr.bf16.gmra.mxu1 %v3838_v38  ;;  %1518 = vmatprep.mubr.bf16.mxu0 %v3839_v39 }
  0xd7   :  { %1615 = vmatprep.mubr.bf16.mxu1 %v3842_v40  ;;  %1653 = vmatpush2.bf16.msra.mxu0 %v348_v41 }
  0xd8   :  { %1654 = vmatprep.subr.bf16.mxu0 %v5947_v22 }
  0xdb   :  { %1655 = vmatpush2.bf16.msra.mxu0 %v347_v44  ;;  %v3860_v44 = vld [vmem:[%s5942_s1 + $0x264] ss:$56 sps:$4 sm:$0xff]  }
  0xdd   :  { %1519 = vmatmul.mubr.bf16.gmra.mxu0 %v3841_v45 }
  0xde   :  { %1616 = vmatmul.mubr.bf16.gmra.mxu1 %v3844_v46  ;;  %3089 = vmatprep.mubr.msk.bf16.mxu0 %vm1017_vm0, %v3847_v47 }
  0xe5   :  { %v3147_v50 = vpop.f32.mrf.mxu0  ;;  %1657 = vmatmul.mubr.bf16.vlgmr.msra.gmra.mxu0 %v3845_v48 }
  0xe6   :  { %v3211_v51 = vpop.f32.mrf.mxu1  ;;  %3090 = vmatprep.mubr.msk.bf16.mxu0 %vm1017_vm0, %v3848_v49 }
  0xe7   :  { %v3148_v52 = vpop.f32.mrf.mxu0 }
  0xe8   :  { %v3149_v53 = vadd.f32 %v3148_v52, %v3147_v50  ;;  %v3212_v54 = vpop.f32.mrf.mxu1 }
  0xe9   :  { %v3213_v55 = vadd.f32 %v3212_v54, %v3211_v51  ;;  %v3150_v56 = vpop.f32.mrf.mxu0 }
  0xea   :  { %v3214_v58 = vpop.f32.mrf.mxu1 }
  0xeb   :  { %v4948_v60 = vadd.f32 %v3213_v55, %v3149_v53  ;;  %v3151_v61 = vpop.f32.mrf.mxu0 }
  0xec   :  { %v3152_v62 = vadd.f32 %v3151_v61, %v3150_v56  ;;  %v3215_v63 = vpop.f32.mrf.mxu1  ;;  %v3863_v61 = vld [vmem:[%s5942_s1 + $0x2d4] ss:$56 sps:$4 sm:$0xff]  }
  0xed   :  { %v3216_v0 = vadd.f32 %v3215_v63, %v3214_v58  ;;  %v3153_v1 = vpop.f32.mrf.mxu0  ;;  %1665 = vmatmul.mubr.bf16.gmra.mxu0 %v3850_v57  ;;  %v3862_v58 = vld [vmem:[%s5942_s1 + $0x260] ss:$56 sps:$4 sm:$0xff]  }
  0xee   :  { %v3217_v2 = vpop.f32.mrf.mxu1  ;;  %3091 = vmatprep.mubr.msk.bf16.mxu0 %vm1017_vm0, %v3851_v59 }
  0xef   :  { %v4951_v3 = vadd.f32 %v3216_v0, %v3152_v62  ;;  %v3154_v4 = vpop.f32.mrf.mxu0 }
  0xf0   :  { %v3155_v5 = vadd.f32 %v3154_v4, %v3153_v1  ;;  %v3218_v6 = vpop.f32.mrf.mxu1 }
  0xf1   :  { %v3219_v7 = vadd.f32 %v3218_v6, %v3217_v2  ;;  %v3156_v8 = vpop.f32.mrf.mxu0 }
  0xf2   :  { %v3220_v10 = vpop.f32.mrf.mxu1 }
  0xf3   :  { %v4959_v12 = vadd.f32 %v3219_v7, %v3155_v5  ;;  %v3157_v13 = vpop.f32.mrf.mxu0 }
  0xf4   :  { %v3158_v14 = vadd.f32 %v3157_v13, %v3156_v8  ;;  %v3221_v15 = vpop.f32.mrf.mxu1  ;;  %v3865_v13 = vld [vmem:[%s5942_s1 + $0x2d0] ss:$56 sps:$4 sm:$0xff]  }
  0xf5   :  { %v3222_v16 = vadd.f32 %v3221_v15, %v3220_v10  ;;  %v3159_v17 = vpop.f32.mrf.mxu0  ;;  %1673 = vmatmul.mubr.bf16.gmra.mxu0 %v3853_v9  ;;  %v3866_v15 = vld [vmem:[%s5942_s1 + $0x344] ss:$56 sps:$4 sm:$0xff]  }
  0xf6   :  { %v3223_v18 = vpop.f32.mrf.mxu1  ;;  %3092 = vmatprep.mubr.msk.bf16.mxu0 %vm1017_vm0, %v3854_v11 }
  0xf7   :  { %v4962_v19 = vadd.f32 %v3222_v16, %v3158_v14  ;;  %v3160_v20 = vpop.f32.mrf.mxu0 }
  0xf8   :  { %v3161_v21 = vadd.f32 %v3160_v20, %v3159_v17  ;;  %v3224_v23 = vpop.f32.mrf.mxu1 }
  0xf9   :  { %v3225_v24 = vadd.f32 %v3224_v23, %v3223_v18  ;;  %v3162_v25 = vpop.f32.mrf.mxu0 }
  0xfa   :  { %v3226_v27 = vpop.f32.mrf.mxu1 }
  0xfb   :  { %v4970_v29 = vadd.f32 %v3225_v24, %v3161_v21  ;;  %v3163_v30 = vpop.f32.mrf.mxu0 }
  0xfc   :  { %v3164_v31 = vadd.f32 %v3163_v30, %v3162_v25  ;;  %v3227_v32 = vpop.f32.mrf.mxu1 }
  0xfd   :  { %v3228_v33 = vadd.f32 %v3227_v32, %v3226_v27  ;;  %v3165_v34 = vpop.f32.mrf.mxu0  ;;  %1681 = vmatmul.mubr.bf16.gmra.mxu0 %v3856_v26  ;;  %v3868_v32 = vld [vmem:[%s5942_s1 + $0x340] ss:$56 sps:$4 sm:$0xff]  }
  0xfe   :  { %v3229_v35 = vpop.f32.mrf.mxu1  ;;  %3093 = vmatprep.mubr.msk.bf16.mxu0 %vm1017_vm0, %v3857_v28 }
  0xff   :  { %v4973_v36 = vadd.f32 %v3228_v33, %v3164_v31  ;;  %v3166_v37 = vpop.f32.mrf.mxu0 }
 0x100   :  { %v3167_v38 = vadd.f32 %v3166_v37, %v3165_v34  ;;  %v3230_v39 = vpop.f32.mrf.mxu1 }
 0x101   :  { %v3231_v40 = vadd.f32 %v3230_v39, %v3229_v35  ;;  %v3168_v41 = vpop.f32.mrf.mxu0 }
 0x102   :  { %v3232_v43 = vpop.f32.mrf.mxu1 }
 0x103   :  { %v4981_v45 = vadd.f32 %v3231_v40, %v3167_v38  ;;  %v3169_v46 = vpop.f32.mrf.mxu0 }
 0x104   :  { %v3170_v47 = vadd.f32 %v3169_v46, %v3168_v41  ;;  %v3233_v48 = vpop.f32.mrf.mxu1 }
 0x105   :  { %v3234_v49 = vadd.f32 %v3233_v48, %v3232_v43  ;;  %v3171_v50 = vpop.f32.mrf.mxu0  ;;  %1689 = vmatmul.mubr.bf16.gmra.mxu0 %v3859_v42 }
 0x106   :  { %v3235_v51 = vpop.f32.mrf.mxu1  ;;  %3094 = vmatprep.mubr.msk.bf16.mxu0 %vm1017_vm0, %v3860_v44 }
 0x107   :  { %v4984_v52 = vadd.f32 %v3234_v49, %v3170_v47  ;;  %v3172_v53 = vpop.f32.mrf.mxu0 }
 0x108   :  { %v3173_v54 = vadd.f32 %v3172_v53, %v3171_v50  ;;  %v3236_v55 = vpop.f32.mrf.mxu1 }
 0x109   :  { %v3237_v56 = vadd.f32 %v3236_v55, %v3235_v51  ;;  %v3174_v57 = vpop.f32.mrf.mxu0 }
 0x10a   :  { %v3238_v59 = vpop.f32.mrf.mxu1 }
 0x10b   :  { %v4992_v62 = vadd.f32 %v3237_v56, %v3173_v54  ;;  %v3175_v63 = vpop.f32.mrf.mxu0 }
 0x10c   :  { %v3176_v0 = vadd.f32 %v3175_v63, %v3174_v57  ;;  %v3239_v1 = vpop.f32.mrf.mxu1 }
 0x10d   :  { %v3240_v2 = vadd.f32 %v3239_v1, %v3238_v59  ;;  %v3177_v4 = vpop.f32.mrf.mxu0  ;;  %1697 = vmatmul.mubr.bf16.gmra.mxu0 %v3862_v58 }
 0x10e   :  { %v3241_v5 = vpop.f32.mrf.mxu1  ;;  %3095 = vmatprep.mubr.msk.bf16.mxu0 %vm1017_vm0, %v3863_v61 }
 0x10f   :  { %v4995_v6 = vadd.f32 %v3240_v2, %v3176_v0  ;;  %v3178_v7 = vpop.f32.mrf.mxu0 }
 0x110   :  { %v3179_v8 = vadd.f32 %v3178_v7, %v3177_v4  ;;  %v3242_v9 = vpop.f32.mrf.mxu1 }
 0x111   :  { %v3243_v10 = vadd.f32 %v3242_v9, %v3241_v5  ;;  %v3180_v11 = vpop.f32.mrf.mxu0 }
 0x112   :  { %v3244_v14 = vpop.f32.mrf.mxu1 }
 0x113   :  { %v5003_v16 = vadd.f32 %v3243_v10, %v3179_v8  ;;  %v3181_v17 = vpop.f32.mrf.mxu0 }
 0x114   :  { %v3182_v18 = vadd.f32 %v3181_v17, %v3180_v11  ;;  %v3245_v20 = vpop.f32.mrf.mxu1 }
 0x115   :  { %v3246_v21 = vadd.f32 %v3245_v20, %v3244_v14  ;;  %v3183_v23 = vpop.f32.mrf.mxu0  ;;  %1705 = vmatmul.mubr.bf16.gmra.mxu0 %v3865_v13 }
 0x116   :  { %v3247_v24 = vpop.f32.mrf.mxu1  ;;  %3096 = vmatprep.mubr.msk.bf16.mxu0 %vm1017_vm0, %v3866_v15 }
 0x117   :  { %v5006_v25 = vadd.f32 %v3246_v21, %v3182_v18  ;;  %v3184_v26 = vpop.f32.mrf.mxu0 }
 0x118   :  { %v3185_v27 = vadd.f32 %v3184_v26, %v3183_v23  ;;  %v3248_v28 = vpop.f32.mrf.mxu1 }
 0x119   :  { %v3249_v30 = vadd.f32 %v3248_v28, %v3247_v24  ;;  %v3186_v31 = vpop.f32.mrf.mxu0 }
 0x11a   :  { %v3250_v33 = vpop.f32.mrf.mxu1 }
 0x11b   :  { %v5011_v34 = vadd.f32 %v3249_v30, %v3185_v27  ;;  %v3187_v35 = vpop.f32.mrf.mxu0 }
 0x11c   :  { %v3188_v37 = vadd.f32 %v3187_v35, %v3186_v31  ;;  %v3251_v38 = vpop.f32.mrf.mxu1 }
 0x11d   :  { %v3252_v39 = vadd.f32 %v3251_v38, %v3250_v33  ;;  %v3189_v40 = vpop.f32.mrf.mxu0  ;;  %1713 = vmatmul.mubr.bf16.gmra.mxu0 %v3868_v32 }
 0x11e   :  { %v3253_v41 = vpop.f32.mrf.mxu1 }
 0x11f   :  { %v5013_v42 = vadd.f32 %v3252_v39, %v3188_v37  ;;  %v3190_v43 = vpop.f32.mrf.mxu0 }
 0x120   :  { %v3191_v44 = vadd.f32 %v3190_v43, %v3189_v40  ;;  %v3254_v46 = vpop.f32.mrf.mxu1 }
 0x121   :  { %v3255_v47 = vadd.f32 %v3254_v46, %v3253_v41  ;;  %v3192_v48 = vpop.f32.mrf.mxu0 }
 0x122   :  { %v3256_v49 = vpop.f32.mrf.mxu1 }
 0x123   :  { %v5015_v50 = vadd.f32 %v3255_v47, %v3191_v44  ;;  %v3193_v51 = vpop.f32.mrf.mxu0 }
 0x124   :  { %v3194_v53 = vadd.f32 %v3193_v51, %v3192_v48  ;;  %v3257_v54 = vpop.f32.mrf.mxu1 }
 0x125   :  { %v3258_v55 = vadd.f32 %v3257_v54, %v3256_v49  ;;  %v3275_v56 = vpop.f32.mrf.mxu0 }
 0x126   :  { %v3339_v57 = vpop.f32.mrf.mxu1 }
 0x127   :  { %v5017_v58 = vadd.f32 %v3258_v55, %v3194_v53  ;;  %v3276_v59 = vpop.f32.mrf.mxu0 }
 0x128   :  { %v3277_v61 = vadd.f32 %v3276_v59, %v3275_v56  ;;  %v3340_v63 = vpop.f32.mrf.mxu1 }
 0x129   :  { %v3278_v0 = vpop.f32.mrf.mxu0  ;;  %v3341_v1 = vadd.f32 %v3340_v63, %v3339_v57 }
 0x12a   :  { %v1271_v2 = vadd.f32 %v3277_v61, %v4948_v60  ;;  %v3342_v4 = vpop.f32.mrf.mxu1 }
 0x12b   :  { %v3279_v5 = vpop.f32.mrf.mxu0 }
 0x12c   :  { %v5020_v7 = vadd.f32 %v3341_v1, %v1271_v2  ;;  %v3280_v8 = vadd.f32 %v3279_v5, %v3278_v0  ;;  %v3343_v9 = vpop.f32.mrf.mxu1 }
 0x12d   :  { %v3281_v10 = vpop.f32.mrf.mxu0  ;;  %v3344_v11 = vadd.f32 %v3343_v9, %v3342_v4 }
 0x12e   :  { %v1274_v13 = vadd.f32 %v3280_v8, %v4951_v3  ;;  %v3345_v14 = vpop.f32.mrf.mxu1 }
 0x12f   :  { %v3282_v15 = vpop.f32.mrf.mxu0 }
 0x130   :  { %v5023_v17 = vadd.f32 %v3344_v11, %v1274_v13  ;;  %v3283_v18 = vadd.f32 %v3282_v15, %v3281_v10  ;;  %v3346_v20 = vpop.f32.mrf.mxu1 }
 0x131   :  { %v3284_v21 = vpop.f32.mrf.mxu0  ;;  %v3347_v23 = vadd.f32 %v3346_v20, %v3345_v14 }
 0x132   :  { %v1279_v60 = vadd.f32 %v3283_v18, %v4959_v12  ;;  %v3348_v24 = vpop.f32.mrf.mxu1 }
 0x133   :  { %v3285_v26 = vpop.f32.mrf.mxu0 }
 0x134   :  { %v5026_v27 = vadd.f32 %v3347_v23, %v1279_v60  ;;  %v3286_v28 = vadd.f32 %v3285_v26, %v3284_v21  ;;  %v3349_v30 = vpop.f32.mrf.mxu1 }
 0x135   :  { %v3287_v31 = vpop.f32.mrf.mxu0  ;;  %v3350_v32 = vadd.f32 %v3349_v30, %v3348_v24 }
 0x136   :  { %v1282_v3 = vadd.f32 %v3286_v28, %v4962_v19  ;;  %v3351_v33 = vpop.f32.mrf.mxu1 }
 0x137   :  { %v3288_v35 = vpop.f32.mrf.mxu0 }
 0x138   :  { %v5029_v37 = vadd.f32 %v3350_v32, %v1282_v3  ;;  %v3289_v38 = vadd.f32 %v3288_v35, %v3287_v31  ;;  %v3352_v39 = vpop.f32.mrf.mxu1 }
 0x139   :  { %v3290_v40 = vpop.f32.mrf.mxu0  ;;  %v3353_v41 = vadd.f32 %v3352_v39, %v3351_v33 }
 0x13a   :  { %v1287_v12 = vadd.f32 %v3289_v38, %v4970_v29  ;;  %v3354_v43 = vpop.f32.mrf.mxu1 }
 0x13b   :  { %v3291_v44 = vpop.f32.mrf.mxu0 }
 0x13c   :  { %v5032_v46 = vadd.f32 %v3353_v41, %v1287_v12  ;;  %v3292_v47 = vadd.f32 %v3291_v44, %v3290_v40  ;;  %v3355_v48 = vpop.f32.mrf.mxu1 }
 0x13d   :  { %v3293_v49 = vpop.f32.mrf.mxu0  ;;  %v3356_v51 = vadd.f32 %v3355_v48, %v3354_v43 }
 0x13e   :  { %v1290_v19 = vadd.f32 %v3292_v47, %v4973_v36  ;;  %v3357_v53 = vpop.f32.mrf.mxu1 }
 0x13f   :  { %v3294_v54 = vpop.f32.mrf.mxu0 }
 0x140   :  { %v5035_v55 = vadd.f32 %v3356_v51, %v1290_v19  ;;  %v3295_v56 = vadd.f32 %v3294_v54, %v3293_v49  ;;  %v3358_v57 = vpop.f32.mrf.mxu1 }
 0x141   :  { %v3296_v59 = vpop.f32.mrf.mxu0  ;;  %v3359_v61 = vadd.f32 %v3358_v57, %v3357_v53 }
 0x142   :  { %v1295_v29 = vadd.f32 %v3295_v56, %v4981_v45  ;;  %v3360_v63 = vpop.f32.mrf.mxu1 }
 0x143   :  { %v3297_v0 = vpop.f32.mrf.mxu0 }
 0x144   :  { %v5038_v1 = vadd.f32 %v3359_v61, %v1295_v29  ;;  %v3298_v2 = vadd.f32 %v3297_v0, %v3296_v59  ;;  %v3361_v4 = vpop.f32.mrf.mxu1 }
 0x145   :  { %v3299_v5 = vpop.f32.mrf.mxu0  ;;  %v3362_v8 = vadd.f32 %v3361_v4, %v3360_v63 }
 0x146   :  { %v1298_v36 = vadd.f32 %v3298_v2, %v4984_v52  ;;  %v3363_v9 = vpop.f32.mrf.mxu1 }
 0x147   :  { %v3300_v10 = vpop.f32.mrf.mxu0 }
 0x148   :  { %v5041_v11 = vadd.f32 %v3362_v8, %v1298_v36  ;;  %v3301_v13 = vadd.f32 %v3300_v10, %v3299_v5  ;;  %v3364_v14 = vpop.f32.mrf.mxu1 }
 0x149   :  { %v3302_v15 = vpop.f32.mrf.mxu0  ;;  %v3365_v18 = vadd.f32 %v3364_v14, %v3363_v9 }
 0x14a   :  { %v1303_v45 = vadd.f32 %v3301_v13, %v4992_v62  ;;  %v3366_v20 = vpop.f32.mrf.mxu1 }
 0x14b   :  { %v3303_v21 = vpop.f32.mrf.mxu0 }
 0x14c   :  { %v5044_v23 = vadd.f32 %v3365_v18, %v1303_v45  ;;  %v3304_v60 = vadd.f32 %v3303_v21, %v3302_v15  ;;  %v3367_v24 = vpop.f32.mrf.mxu1 }
 0x14d   :  { %v3305_v26 = vpop.f32.mrf.mxu0  ;;  %v3368_v28 = vadd.f32 %v3367_v24, %v3366_v20 }
 0x14e   :  { %v1306_v52 = vadd.f32 %v3304_v60, %v4995_v6  ;;  %v3369_v30 = vpop.f32.mrf.mxu1 }
 0x14f   :  { %v3306_v31 = vpop.f32.mrf.mxu0 }
 0x150   :  { %v5047_v32 = vadd.f32 %v3368_v28, %v1306_v52  ;;  %v3307_v3 = vadd.f32 %v3306_v31, %v3305_v26  ;;  %v3370_v33 = vpop.f32.mrf.mxu1 }
 0x151   :  { %v3308_v35 = vpop.f32.mrf.mxu0  ;;  %v3371_v38 = vadd.f32 %v3370_v33, %v3369_v30 }
 0x152   :  { %v1311_v62 = vadd.f32 %v3307_v3, %v5003_v16  ;;  %v3372_v39 = vpop.f32.mrf.mxu1 }
 0x153   :  { %v3309_v40 = vpop.f32.mrf.mxu0 }
 0x154   :  { %v5050_v41 = vadd.f32 %v3371_v38, %v1311_v62  ;;  %v3310_v12 = vadd.f32 %v3309_v40, %v3308_v35  ;;  %v3373_v43 = vpop.f32.mrf.mxu1 }
 0x155   :  { %v3311_v44 = vpop.f32.mrf.mxu0  ;;  %v3374_v47 = vadd.f32 %v3373_v43, %v3372_v39 }
 0x156   :  { %v1314_v6 = vadd.f32 %v3310_v12, %v5006_v25  ;;  %v5053_v48 = vpop.f32.mrf.mxu1 }
 0x157   :  { %v3312_v49 = vpop.f32.mrf.mxu0 }
 0x158   :  { %v5055_v51 = vadd.f32 %v3374_v47, %v1314_v6  ;;  %v3313_v19 = vadd.f32 %v3312_v49, %v3311_v44  ;;  %v5057_v53 = vpop.f32.mrf.mxu1 }
 0x159   :  { %v3314_v54 = vpop.f32.mrf.mxu0 }
 0x15a   :  { %v5060_v16 = vadd.f32 %v3313_v19, %v5011_v34  ;;  %v5062_v56 = vpop.f32.mrf.mxu1 }
 0x15b   :  { %v3315_v57 = vpop.f32.mrf.mxu0 }
 0x15c   :  { %v3316_v59 = vadd.f32 %v3315_v57, %v3314_v54  ;;  %v5064_v61 = vpop.f32.mrf.mxu1 }
 0x15d   :  { %v3317_v29 = vpop.f32.mrf.mxu0 }
 0x15e   :  { %v5067_v25 = vadd.f32 %v3316_v59, %v5013_v42  ;;  %v5069_v63 = vpop.f32.mrf.mxu1 }
 0x15f   :  { %v3318_v0 = vpop.f32.mrf.mxu0 }
 0x160   :  { %v3319_v2 = vadd.f32 %v3318_v0, %v3317_v29  ;;  %v5071_v4 = vpop.f32.mrf.mxu1 }
 0x161   :  { %v3320_v5 = vpop.f32.mrf.mxu0 }
 0x162   :  { %v5074_v34 = vadd.f32 %v3319_v2, %v5015_v50  ;;  %v5076_v8 = vpop.f32.mrf.mxu1 }
 0x163   :  { %v3321_v36 = vpop.f32.mrf.mxu0 }
 0x164   :  { %v3322_v9 = vadd.f32 %v3321_v36, %v3320_v5  ;;  %v5078_v10 = vpop.f32.mrf.mxu1 }
 0x165   :  { %v3403_v13 = vpop.f32.mrf.mxu0 }
 0x166   :  { %v5081_v42 = vadd.f32 %v3322_v9, %v5017_v58  ;;  %v3467_v14 = vpop.f32.mrf.mxu1 }
 0x167   :  { %v3404_v15 = vpop.f32.mrf.mxu0 }
 0x168   :  { %v3405_v18 = vadd.f32 %v3404_v15, %v3403_v13  ;;  %v3468_v45 = vpop.f32.mrf.mxu1 }
 0x169   :  { %v3406_v20 = vpop.f32.mrf.mxu0  ;;  %v3469_v21 = vadd.f32 %v3468_v45, %v3467_v14 }
 0x16a   :  { %v1465_v60 = vadd.f32 %v3405_v18, %v5020_v7  ;;  %v3470_v50 = vpop.f32.mrf.mxu1 }
 0x16b   :  { %v3407_v24 = vpop.f32.mrf.mxu0 }
 0x16c   :  { %v3408_v26 = vadd.f32 %v3407_v24, %v3406_v20  ;;  %v3471_v28 = vpop.f32.mrf.mxu1  ;;  %v5084_v52 = vadd.f32 %v3469_v21, %v1465_v60 }
 0x16d   :  { %v3409_v30 = vpop.f32.mrf.mxu0  ;;  %v3472_v31 = vadd.f32 %v3471_v28, %v3470_v50 }
 0x16e   :  { %v1468_v3 = vadd.f32 %v3408_v26, %v5023_v17  ;;  %v3473_v58 = vpop.f32.mrf.mxu1 }
 0x16f   :  { %v3410_v33 = vpop.f32.mrf.mxu0 }
 0x170   :  { %v3411_v35 = vadd.f32 %v3410_v33, %v3409_v30  ;;  %v3474_v38 = vpop.f32.mrf.mxu1  ;;  %v5087_v62 = vadd.f32 %v3472_v31, %v1468_v3 }
 0x171   :  { %v3412_v39 = vpop.f32.mrf.mxu0  ;;  %v3475_v40 = vadd.f32 %v3474_v38, %v3473_v58 }
 0x172   :  { %v1473_v7 = vadd.f32 %v3411_v35, %v5026_v27  ;;  %v5092_v47 = vpop.f32.mrf.mxu1 }
 0x173   :  { %v3413_v12 = vpop.f32.mrf.mxu0 }
 0x174   :  { %v3414_v43 = vadd.f32 %v3413_v12, %v3412_v39  ;;  %v5090_v44 = vadd.f32 %v3475_v40, %v1473_v7  ;;  %v5097_v54 = vpop.f32.mrf.mxu1 }
 0x175   :  { %v3415_v6 = vpop.f32.mrf.mxu0 }
 0x176   :  { %v5095_v49 = vadd.f32 %v3414_v43, %v5029_v37  ;;  %v5102_v0 = vpop.f32.mrf.mxu1 }
 0x177   :  { %v3416_v17 = vpop.f32.mrf.mxu0  ;;  %5954 = vst [vmem:[#allocation4_spill] sm:$0xff] %v5102_v0 }
 0x178   :  { %5952 = vst [vmem:[#allocation2_spill] sm:$0xff] %v5095_v49  ;;  %v3417_v19 = vadd.f32 %v3416_v17, %v3415_v6  ;;  %v5107_v37 = vpop.f32.mrf.mxu1 }
 0x179   :  { %v3418_v57 = vpop.f32.mrf.mxu0  ;;  %5955 = vst [vmem:[#allocation5_spill] sm:$0xff] %v5107_v37 }
 0x17a   :  { %v5100_v59 = vadd.f32 %v3417_v19, %v5032_v46  ;;  %v5112_v46 = vpop.f32.mrf.mxu1 }
 0x17b   :  { %v3419_v29 = vpop.f32.mrf.mxu0 }
 0x17c   :  { %5953 = vst [vmem:[#allocation3_spill] sm:$0xff] %v5100_v59  ;;  %v3420_v27 = vadd.f32 %v3419_v29, %v3418_v57 }
 0x17d   :  { %v3421_v2 = vpop.f32.mrf.mxu0 }
 0x17e   :  { %v5105_v5 = vadd.f32 %v3420_v27, %v5035_v55  ;;  %v5117_v55 = vpop.f32.mrf.mxu1 }
 0x17f   :  { %v3422_v36 = vpop.f32.mrf.mxu0 }
 0x180   :  { %v3423_v9 = vadd.f32 %v3422_v36, %v3421_v2 }
 0x181   :  { %v3424_v13 = vpop.f32.mrf.mxu0 }
 0x182   :  { %v5110_v14 = vadd.f32 %v3423_v9, %v5038_v1  ;;  %v5122_v1 = vpop.f32.mrf.mxu1 }
 0x183   :  { %v3425_v15 = vpop.f32.mrf.mxu0 }
 0x184   :  { %5956 = vst [vmem:[#allocation6_spill] sm:$0xff] %v5110_v14  ;;  %v3426_v18 = vadd.f32 %v3425_v15, %v3424_v13 }
 0x185   :  { %v3427_v45 = vpop.f32.mrf.mxu0 }
 0x186   :  { %v5115_v20 = vadd.f32 %v3426_v18, %v5041_v11  ;;  %v5127_v11 = vpop.f32.mrf.mxu1 }
 0x187   :  { %v3428_v21 = vpop.f32.mrf.mxu0 }
 0x188   :  { %v3429_v60 = vadd.f32 %v3428_v21, %v3427_v45 }
 0x189   :  { %v3430_v50 = vpop.f32.mrf.mxu0 }
 0x18a   :  { %v5120_v24 = vadd.f32 %v3429_v60, %v5044_v23  ;;  %v5132_v23 = vpop.f32.mrf.mxu1 }
 0x18b   :  { %v3431_v26 = vpop.f32.mrf.mxu0 }
 0x18c   :  { %v3432_v28 = vadd.f32 %v3431_v26, %v3430_v50  ;;  %v5137_v43 = vpop.f32.mrf.mxu1 }
 0x18d   :  { %v3433_v30 = vpop.f32.mrf.mxu0 }
 0x18e   :  { %v5125_v31 = vadd.f32 %v3432_v28, %v5047_v32  ;;  %v5139_v17 = vpop.f32.mrf.mxu1 }
 0x18f   :  { %v3434_v3 = vpop.f32.mrf.mxu0 }
 0x190   :  { %v3435_v58 = vadd.f32 %v3434_v3, %v3433_v30  ;;  %v5141_v29 = vpop.f32.mrf.mxu1 }
 0x191   :  { %v3436_v33 = vpop.f32.mrf.mxu0 }
 0x192   :  { %v5130_v35 = vadd.f32 %v3435_v58, %v5050_v41  ;;  %v5147_v2 = vpop.f32.mrf.mxu1 }
 0x193   :  { %v3437_v38 = vpop.f32.mrf.mxu0 }
 0x194   :  { %v3438_v39 = vadd.f32 %v3437_v38, %v3436_v33  ;;  %v5152_v13 = vpop.f32.mrf.mxu1 }
 0x195   :  { %v3439_v40 = vpop.f32.mrf.mxu0 }
 0x196   :  { %v5135_v7 = vadd.f32 %v3438_v39, %v5055_v51  ;;  %v5157_v21 = vpop.f32.mrf.mxu1 }
 0x197   :  { %v3440_v12 = vpop.f32.mrf.mxu0 }
 0x198   :  { %v5162_v28 = vpop.f32.mrf.mxu1 }
 0x199   :  { %v3442_v32 = vpop.f32.mrf.mxu0 }
 0x19a   :  { %v3500_v3 = vpop.f32.mrf.mxu1 }
 0x19b   :  { %v3443_v6 = vpop.f32.mrf.mxu0 }
 0x19c   :  { %v3501_v38 = vpop.f32.mrf.mxu1  ;;  %v3444_v49 = vadd.f32 %v3443_v6, %v3442_v32 }
 0x19d   :  { %v3445_v19 = vpop.f32.mrf.mxu0  ;;  %v3502_v32 = vadd.f32 %v3501_v38, %v3500_v3 }
 0x19f   :  { %v3446_v57 = vpop.f32.mrf.mxu0 }
 0x1a1   :  { %v5143_v41 = vpop.f32.mrf.mxu0 }
 0x1a3   :  { %v5145_v27 = vpop.f32.mrf.mxu0 }
 0x1a5   :  { %v1658_v36 = vpop.f32.mrf.mxu0 }
 0x1a6   :  { %v5150_v51 = vadd.f32 %v1658_v36, %v5084_v52  ;;  %v3503_v36 = vpop.f32.mrf.mxu1 }
 0x1a7   :  { %v1660_v9 = vpop.f32.mrf.mxu0 }
 0x1a8   :  { %5957 = vst [vmem:[#allocation7_spill] sm:$0xff] %v5150_v51 }
 0x1a9   :  { %v1661_v15 = vpop.f32.mrf.mxu0 }
 0x1aa   :  { %v5155_v18 = vadd.f32 %v1661_v15, %v5087_v62 }
 0x1ab   :  { %v1663_v45 = vpop.f32.mrf.mxu0 }
 0x1ac   :  { %5958 = vst [vmem:[#allocation8_spill] sm:$0xff] %v5155_v18 }
 0x1ad   :  { %v1666_v60 = vpop.f32.mrf.mxu0 }
 0x1ae   :  { %v5160_v50 = vadd.f32 %v1666_v60, %v5090_v44  ;;  %v3504_v44 = vpop.f32.mrf.mxu1 }
 0x1af   :  { %v1668_v26 = vpop.f32.mrf.mxu0  ;;  %v3505_v14 = vadd.f32 %v3504_v44, %v3503_v36 }
 0x1b0   :  { %5959 = vst [vmem:[#allocation9_spill] sm:$0xff] %v5160_v50  ;;  %v3506_v26 = vpop.f32.mrf.mxu1 }
 0x1b1   :  { %v5164_v30 = vpop.f32.mrf.mxu0 }
 0x1b2   :  { %5960 = vst [vmem:[#allocation10_spill] sm:$0xff] %v5164_v30  ;;  %v3507_v51 = vpop.f32.mrf.mxu1 }
 0x1b3   :  { %v1671_v52 = vpop.f32.mrf.mxu0 }
 0x1b5   :  { %v5166_v58 = vpop.f32.mrf.mxu0 }
 0x1b6   :  { %5961 = vst [vmem:[#allocation11_spill] sm:$0xff] %v5166_v58  ;;  %v3441_v58 = vadd.f32 %v3440_v12, %v3439_v40 }
 0x1b7   :  { %v1676_v33 = vpop.f32.mrf.mxu0 }
 0x1b8   :  { %v3377_v33 = vadd.f32 %v5057_v53, %v5053_v48  ;;  %v3447_v53 = vadd.f32 %v3446_v57, %v3445_v19 }
 0x1b9   :  { %v5168_v62 = vpop.f32.mrf.mxu0 }
 0x1bb   :  { %v1679_v39 = vpop.f32.mrf.mxu0 }
 0x1bc   :  { %v3509_v39 = vpop.f32.mrf.mxu1 }
 0x1bd   :  { %v5170_v9 = vpop.f32.mrf.mxu0 }
 0x1be   :  { %5962 = vst [vmem:[#allocation12_spill] sm:$0xff] %v5170_v9  ;;  %v3380_v9 = vadd.f32 %v5064_v61, %v5062_v56  ;;  %v3510_v37 = vpop.f32.mrf.mxu1  ;;  %v3386_v61 = vadd.f32 %v5078_v10, %v5076_v8  ;;  %v1605_v8 = vadd.f32 %v3502_v32, %v5135_v7 }
 0x1bf   :  { %v1684_v15 = vpop.f32.mrf.mxu0 }
 0x1c0   :  { %v1416_v15 = vadd.f32 %v3377_v33, %v5060_v16  ;;  %v1419_v48 = vadd.f32 %v3380_v9, %v5067_v25  ;;  %v3512_v33 = vpop.f32.mrf.mxu1  ;;  %v3450_v25 = vadd.f32 %v5145_v27, %v5143_v41  ;;  %v1427_v57 = vadd.f32 %v3386_v61, %v5081_v42  ;;  %v5971_v61 = vld [vmem:[#allocation3_spill] sm:$0xff] }
 0x1c1   :  { %v5172_v45 = vpop.f32.mrf.mxu0  ;;  %v3490_v42 = vadd.f32 %v5137_v43, %v5132_v23  ;;  %v3484_v23 = vadd.f32 %v5117_v55, %v5112_v46 }
 0x1c2   :  { %v1513_v30 = vadd.f32 %v3441_v58, %v1416_v15  ;;  %v1516_v12 = vadd.f32 %v3444_v49, %v1419_v48 }
 0x1c3   :  { %v1687_v60 = vpop.f32.mrf.mxu0 }
 0x1c5   :  { %v5174_v22 = vpop.f32.mrf.mxu0 }
 0x1c6   :  { %5963 = vst [vmem:[#allocation13_spill] sm:$0xff] %v5174_v22  ;;  %v1610_v22 = vadd.f32 %v3505_v14, %v1513_v30  ;;  %v1524_v30 = vadd.f32 %v3450_v25, %v1427_v57 }
 0x1c7   :  { %v1692_v52 = vpop.f32.mrf.mxu0 }
 0x1c8   :  { %v3383_v52 = vadd.f32 %v5071_v4, %v5069_v63  ;;  %v3511_v4 = vadd.f32 %v3510_v37, %v3509_v39 }
 0x1c9   :  { %v1693_v50 = vpop.f32.mrf.mxu0 }
 0x1ca   :  { %v1424_v16 = vadd.f32 %v3383_v52, %v5074_v34  ;;  %v3513_v34 = vpop.f32.mrf.mxu1 }
 0x1cb   :  { %v1695_v18 = vpop.f32.mrf.mxu0  ;;  %v3514_v41 = vadd.f32 %v3513_v34, %v3512_v33 }
 0x1cc   :  { %v3508_v18 = vadd.f32 %v3507_v51, %v3506_v26  ;;  %v1521_v63 = vadd.f32 %v3447_v53, %v1424_v16 }
 0x1cd   :  { %v5178_v59 = vpop.f32.mrf.mxu0 }
 0x1ce   :  { %v1613_v49 = vadd.f32 %v3508_v18, %v1516_v12  ;;  %v1618_v51 = vadd.f32 %v3511_v4, %v1521_v63  ;;  %v5970_v18 = vld [vmem:[#allocation12_spill] sm:$0xff]  ;;  %v5972_v63 = vld [vmem:[#allocation11_spill] sm:$0xff] }
 0x1cf   :  { %v1700_v60 = vpop.f32.mrf.mxu0 }
 0x1d1   :  { %v1701_v0 = vpop.f32.mrf.mxu0 }
 0x1d2   :  { %v5201_v27 = vadd.f32 %v1701_v0, %v1605_v8  ;;  %v1621_v0 = vadd.f32 %v3514_v41, %v1524_v30 }
 0x1d3   :  { %v1703_v40 = vpop.f32.mrf.mxu0 }
 0x1d4   :  { %v1755_v26 = vsel %vm1721_vm1, %v5201_v27, 0.0 }
 0x1d5   :  { %v1706_v56 = vpop.f32.mrf.mxu0 }
 0x1d6   :  { %v5189_v6 = vadd.f32 %v1706_v56, %v1610_v22  ;;  %v3496_v22 = vadd.f32 %v5152_v13, %v5147_v2  ;;  %v3499_v2 = vadd.f32 %v5162_v28, %v5157_v21  ;;  %v1589_v21 = vadd.f32 %v3490_v42, %v5115_v20 }
 0x1d7   :  { %v1708_v58 = vpop.f32.mrf.mxu0  ;;  %v3478_v20 = vadd.f32 %v5097_v54, %v5092_v47  ;;  %v5965_v47 = vld [vmem:[#allocation4_spill] sm:$0xff]  ;;  %v5966_v54 = vld [vmem:[#allocation5_spill] sm:$0xff] }
 0x1d8   :  { %v1758_v14 = vsel %vm1721_vm1, %v5189_v6, 0.0  ;;  %v1597_v7 = vadd.f32 %v3496_v22, %v5125_v31  ;;  %v3493_v31 = vadd.f32 %v5141_v29, %v5139_v17  ;;  %v5227_v15 = vadd.f32 %v5172_v45, %v1589_v21  ;;  %v5964_v45 = vld [vmem:[#allocation13_spill] sm:$0xff]  ;;  %v5975_v22 = vld [vmem:[#allocation7_spill] sm:$0xff] }
 0x1d9   :  { %v1709_v19 = vpop.f32.mrf.mxu0  ;;  %1759 = vadd.xlane.f32.xlu1 %v1758_v14  ;;  %v1581_v17 = vadd.f32 %v3484_v23, %v5105_v5  ;;  %v5967_v5 = vld [vmem:[#allocation2_spill] sm:$0xff]  ;;  %v5973_v14 = vld [vmem:[#allocation8_spill] sm:$0xff]  ;;  %v1722_v8 = vsel %vm1721_vm1, %v5975_v22, 0.0 }
 0x1da   :  { %v5199_v10 = vadd.f32 %v1709_v19, %v1613_v49  ;;  %v5212_v9 = vadd.f32 %v1693_v50, %v1597_v7  ;;  %v1602_v50 = vadd.f32 %v3499_v2, %v5130_v35  ;;  %v3487_v35 = vadd.f32 %v5127_v11, %v5122_v1  ;;  %v5974_v19 = vld [vmem:[#allocation9_spill] sm:$0xff] }
 0x1db   :  { %v1711_v37 = vpop.f32.mrf.mxu0  ;;  %v1594_v29 = vadd.f32 %v3493_v31, %v5120_v24  ;;  %v1743_v53 = vsel %vm1721_vm1, %v5227_v15, 0.0  ;;  %v3481_v1 = vadd.f32 %v5966_v54, %v5965_v47  ;;  %v1573_v11 = vadd.f32 %v3478_v20, %v5967_v5  ;;  %v5968_v24 = vld [vmem:[#allocation6_spill] sm:$0xff] }
 0x1dc   :  { %v1761_v3 = vsel %vm1721_vm1, %v5199_v10, 0.0  ;;  %v5230_v60 = vadd.f32 %v5178_v59, %v1602_v50  ;;  %v1749_v55 = vsel %vm1721_vm1, %v5212_v9, 0.0  ;;  %v5243_v59 = vadd.f32 %v5168_v62, %v1581_v17  ;;  %v5969_v62 = vld [vmem:[#allocation10_spill] sm:$0xff] }
 0x1dd   :  { %v1714_v38 = vpop.f32.mrf.mxu0  ;;  %1762 = vadd.xlane.f32.xlu1 %v1761_v3  ;;  %v5246_v52 = vadd.f32 %v5964_v45, %v1594_v29  ;;  %v1586_v40 = vadd.f32 %v3487_v35, %v5968_v24  ;;  %v5257_v12 = vadd.f32 %v5969_v62, %v1573_v11  ;;  %v1578_v32 = vadd.f32 %v3481_v1, %v5971_v61 }
 0x1de   :  { %v5210_v13 = vadd.f32 %v1714_v38, %v1618_v51  ;;  %v1752_v48 = vsel %vm1721_vm1, %v5230_v60, 0.0  ;;  %v1737_v56 = vsel %vm1721_vm1, %v5243_v59, 0.0  ;;  %v1725_v34 = vsel %vm1721_vm1, %v5973_v14, 0.0 }
 0x1df   :  { %v1716_v36 = vpop.f32.mrf.mxu0  ;;  %v5260_v16 = vadd.f32 %v5970_v18, %v1586_v40  ;;  %v1746_v33 = vsel %vm1721_vm1, %v5246_v52, 0.0  ;;  %v5268_v4 = vadd.f32 %v5972_v63, %v1578_v32  ;;  %v1731_v25 = vsel %vm1721_vm1, %v5257_v12, 0.0 }
 0x1e0   :  { %v1764_v44 = vsel %vm1721_vm1, %v5210_v13, 0.0  ;;  %v1728_v57 = vsel %vm1721_vm1, %v5974_v19, 0.0 }
 0x1e1   :  { %v1717_v43 = vpop.f32.mrf.mxu0  ;;  %1765 = vadd.xlane.f32.xlu0 %v1764_v44  ;;  %1756 = vadd.xlane.f32.xlu1 %v1755_v26  ;;  %v1740_v58 = vsel %vm1721_vm1, %v5260_v16, 0.0  ;;  %v1734_v49 = vsel %vm1721_vm1, %v5268_v4, 0.0 }
 0x1e2   :  { %v5224_v28 = vadd.f32 %v1717_v43, %v1621_v0 }
 0x1e3   :  { %v1719_v39 = vpop.f32.mrf.mxu0 }
 0x1e4   :  { %v1767_v46 = vsel %vm1721_vm1, %v5224_v28, 0.0 }
 0x1e5   :  { %1768 = vadd.xlane.f32.xlu0 %v1767_v46  ;;  %1750 = vadd.xlane.f32.xlu1 %v1749_v55 }
 0x1e9   :  { %1753 = vadd.xlane.f32.xlu0 %v1752_v48  ;;  %1744 = vadd.xlane.f32.xlu1 %v1743_v53 }
 0x1ed   :  { %1747 = vadd.xlane.f32.xlu0 %v1746_v33  ;;  %1738 = vadd.xlane.f32.xlu1 %v1737_v56 }
 0x1f1   :  { %1741 = vadd.xlane.f32.xlu0 %v1740_v58  ;;  %1732 = vadd.xlane.f32.xlu1 %v1731_v25 }
 0x1f5   :  { %1735 = vadd.xlane.f32.xlu0 %v1734_v49  ;;  %1726 = vadd.xlane.f32.xlu1 %v1725_v34 }
 0x1f9   :  { %1729 = vadd.xlane.f32.xlu0 %v1728_v57 }
 0x1fd   :  { %1723 = vadd.xlane.f32.xlu0 %v1722_v8 }
 0x262   :  { %v1760_v37 = vpop.xlane.xlu1 %1759 }
 0x263   :  { %v1783_v41 = vmul.f32 0.020408163, %v1760_v37 }
 0x265   :  { %v5288_v0 = vsub.f32 %v5189_v6, %v1783_v41 }
 0x266   :  { %v1763_v51 = vpop.xlane.xlu1 %1762 }
 0x267   :  { %v1784_v30 = vmul.f32 0.020408163, %v1763_v51  ;;  %v1815_v46 = vmul.f32 %v5288_v0, %v5288_v0 }
 0x269   :  { %v5283_v3 = vsub.f32 %v5199_v10, %v1784_v30  ;;  %v1855_v47 = vsel %vm1721_vm1, %v1815_v46, 0.0  ;;  %v2055_v46 = vld [vmem:[%s5943_s3 + $0x60] sm:$0xff] }
 0x26a   :  { %v1766_v38 = vpop.xlane.xlu0 %1765  ;;  %v1757_v42 = vpop.xlane.xlu1 %1756 }
 0x26b   :  { %v1785_v2 = vmul.f32 0.020408163, %v1766_v38  ;;  %v1782_v7 = vmul.f32 0.020408163, %v1757_v42  ;;  %v1816_v36 = vmul.f32 %v5283_v3, %v5283_v3 }
 0x26d   :  { %v5291_v44 = vsub.f32 %v5210_v13, %v1785_v2  ;;  %v5294_v26 = vsub.f32 %v5201_v27, %v1782_v7  ;;  %v1858_v23 = vsel %vm1721_vm1, %v1816_v36, 0.0 }
 0x26e   :  { %v1769_v10 = vpop.xlane.xlu0 %1768  ;;  %v1751_v43 = vpop.xlane.xlu1 %1750  ;;  %1859 = vadd.xlane.f32.xlu1 %v1858_v23 }
 0x26f   :  { %v1780_v31 = vmul.f32 0.020408163, %v1751_v43  ;;  %v1814_v21 = vmul.f32 %v5294_v26, %v5294_v26  ;;  %v1817_v50 = vmul.f32 %v5291_v44, %v5291_v44  ;;  %v1786_v6 = vmul.f32 0.020408163, %v1769_v10 }
 0x271   :  { %v5302_v39 = vsub.f32 %v5212_v9, %v1780_v31  ;;  %v1852_v13 = vsel %vm1721_vm1, %v1814_v21, 0.0  ;;  %v1861_v27 = vsel %vm1721_vm1, %v1817_v50, 0.0  ;;  %v5311_v45 = vsub.f32 %v5224_v28, %v1786_v6 }
 0x272   :  { %v1754_v55 = vpop.xlane.xlu0 %1753  ;;  %v1745_v20 = vpop.xlane.xlu1 %1744  ;;  %1853 = vadd.xlane.f32.xlu1 %v1852_v13  ;;  %1862 = vadd.xlane.f32.xlu0 %v1861_v27  ;;  %v2057_v27 = vld [vmem:[%s5943_s3 + $0x70] sm:$0xff] }
 0x273   :  { %v1781_v35 = vmul.f32 0.020408163, %v1754_v55  ;;  %v1778_v17 = vmul.f32 0.020408163, %v1745_v20  ;;  %v1812_v29 = vmul.f32 %v5302_v39, %v5302_v39  ;;  %v2054_v55 = vld [vmem:[%s5943_s3 + $0x58] sm:$0xff]  ;;  %v2056_v20 = vld [vmem:[%s5943_s3 + $0x68] sm:$0xff] }
 0x275   :  { %v5314_v9 = vsub.f32 %v5230_v60, %v1781_v35  ;;  %v5317_v48 = vsub.f32 %v5227_v15, %v1778_v17  ;;  %v1846_v53 = vsel %vm1721_vm1, %v1812_v29, 0.0  ;;  %v1818_v15 = vmul.f32 %v5311_v45, %v5311_v45  ;;  %v2052_v35 = vld [vmem:[%s5943_s3 + $0x48] sm:$0xff]  ;;  %v2053_v17 = vld [vmem:[%s5943_s3 + $0x50] sm:$0xff]  ;;  %v2051_v29 = vld [vmem:[%s5943_s3 + $0x40] sm:$0xff] }
 0x276   :  { %v1748_v54 = vpop.xlane.xlu0 %1747  ;;  %v1739_v1 = vpop.xlane.xlu1 %1738  ;;  %1847 = vadd.xlane.f32.xlu1 %v1846_v53  ;;  %1856 = vadd.xlane.f32.xlu0 %v1855_v47 }
 0x277   :  { %v1779_v5 = vmul.f32 0.020408163, %v1748_v54  ;;  %v1776_v11 = vmul.f32 0.020408163, %v1739_v1  ;;  %v1810_v28 = vmul.f32 %v5317_v48, %v5317_v48  ;;  %v1813_v60 = vmul.f32 %v5314_v9, %v5314_v9 }
 0x278   :  { %v1864_v25 = vsel %vm1721_vm1, %v1818_v15, 0.0 }
 0x279   :  { %v5328_v24 = vsub.f32 %v5246_v52, %v1779_v5  ;;  %v5331_v40 = vsub.f32 %v5243_v59, %v1776_v11  ;;  %v1840_v62 = vsel %vm1721_vm1, %v1810_v28, 0.0  ;;  %v1849_v18 = vsel %vm1721_vm1, %v1813_v60, 0.0 }
 0x27a   :  { %v1742_v33 = vpop.xlane.xlu0 %1741  ;;  %v1733_v56 = vpop.xlane.xlu1 %1732  ;;  %1841 = vadd.xlane.f32.xlu1 %v1840_v62  ;;  %1850 = vadd.xlane.f32.xlu0 %v1849_v18 }
 0x27b   :  { %v1777_v61 = vmul.f32 0.020408163, %v1742_v33  ;;  %v1774_v32 = vmul.f32 0.020408163, %v1733_v56  ;;  %v1811_v63 = vmul.f32 %v5328_v24, %v5328_v24  ;;  %v1808_v52 = vmul.f32 %v5331_v40, %v5331_v40 }
 0x27d   :  { %v5340_v58 = vsub.f32 %v5260_v16, %v1777_v61  ;;  %v5343_v59 = vsub.f32 %v5257_v12, %v1774_v32  ;;  %v1843_v49 = vsel %vm1721_vm1, %v1811_v63, 0.0  ;;  %v1834_v30 = vsel %vm1721_vm1, %v1808_v52, 0.0 }
 0x27e   :  { %v1736_v34 = vpop.xlane.xlu0 %1735  ;;  %1865 = vadd.xlane.f32.xlu1 %v1864_v25  ;;  %v1727_v57 = vpop.xlane.xlu1 %1726  ;;  %1844 = vadd.xlane.f32.xlu0 %v1843_v49 }
 0x27f   :  { %v1775_v8 = vmul.f32 0.020408163, %v1736_v34  ;;  %v1772_v37 = vmul.f32 0.020408163, %v1727_v57  ;;  %v1809_v51 = vmul.f32 %v5340_v58, %v5340_v58  ;;  %v1806_v38 = vmul.f32 %v5343_v59, %v5343_v59 }
 0x281   :  { %v5351_v16 = vsub.f32 %v5268_v4, %v1775_v8  ;;  %v5354_v12 = vsub.f32 %v5973_v14, %v1772_v37  ;;  %v1837_v41 = vsel %vm1721_vm1, %v1809_v51, 0.0  ;;  %v1828_v4 = vsel %vm1721_vm1, %v1806_v38, 0.0  ;;  %v1924_v38 = vld [vmem:[%s5944_s2 + $0x48] sm:$0xff] }
 0x282   :  { %v1730_v42 = vpop.xlane.xlu0 %1729  ;;  %1835 = vadd.xlane.f32.xlu1 %v1834_v30  ;;  %1838 = vadd.xlane.f32.xlu0 %v1837_v41 }
 0x283   :  { %v1773_v2 = vmul.f32 0.020408163, %v1730_v42  ;;  %v1807_v7 = vmul.f32 %v5351_v16, %v5351_v16  ;;  %v1804_v23 = vmul.f32 %v5354_v12, %v5354_v12 }
 0x285   :  { %v5362_v36 = vsub.f32 %v5974_v19, %v1773_v2  ;;  %v1831_v14 = vsel %vm1721_vm1, %v1807_v7, 0.0  ;;  %v1822_v19 = vsel %vm1721_vm1, %v1804_v23, 0.0 }
 0x286   :  { %1829 = vadd.xlane.f32.xlu1 %v1828_v4  ;;  %1832 = vadd.xlane.f32.xlu0 %v1831_v14  ;;  %v1724_v10 = vpop.xlane.xlu0 %1723 }
 0x287   :  { %v1771_v43 = vmul.f32 0.020408163, %v1724_v10  ;;  %v1805_v31 = vmul.f32 %v5362_v36, %v5362_v36 }
 0x289   :  { %v5371_v21 = vsub.f32 %v5975_v22, %v1771_v43  ;;  %v1825_v50 = vsel %vm1721_vm1, %v1805_v31, 0.0  ;;  %v2058_v22 = vld [vmem:[%s5943_s3 + $0x78] sm:$0xff] }
 0x28a   :  { %1823 = vadd.xlane.f32.xlu1 %v1822_v19  ;;  %1826 = vadd.xlane.f32.xlu0 %v1825_v50  ;;  %v1926_v43 = vld [vmem:[%s5944_s2 + $0x58] sm:$0xff] }
 0x28b   :  { %v1803_v6 = vmul.f32 %v5371_v21, %v5371_v21 }
 0x28d   :  { %v1819_v13 = vsel %vm1721_vm1, %v1803_v6, 0.0 }
 0x28e   :  { %1820 = vadd.xlane.f32.xlu0 %v1819_v13 }
 0x29b   :  { %2131 = vperm.xlu1 %3699, %v2057_v27  }
 0x29f   :  { %2136 = vperm.xlu1 %3699, %v2058_v22   ;;  %v1929_v22 = vld [vmem:[%s5944_s2 + $0x70] sm:$0xff] }
 0x2a3   :  { %2121 = vperm.xlu1 %3699, %v2055_v46   ;;  %v1923_v46 = vld [vmem:[%s5944_s2 + $0x40] sm:$0xff] }
 0x2a4   :  { %2116 = vperm.xlu0 %3700, %v2054_v55  }
 0x2a7   :  { %2126 = vperm.xlu1 %3699, %v2056_v20  }
 0x2a8   :  { %2106 = vperm.xlu0 %3700, %v2052_v35  }
 0x2ab   :  { %2111 = vperm.xlu1 %3699, %v2053_v17  }
 0x2af   :  { %2101 = vperm.xlu1 %3699, %v2051_v29  }
 0x2f7   :  { %v1860_v53 = vpop.xlane.xlu1 %1859 }
 0x2f8   :  { %v1880_v30 = vmul.f32 0.020408163, %v1860_v53 }
 0x2fa   :  { %v1896_v14 = vadd.f32 1e-05, %v1880_v30 }
 0x2fb   :  { %v1854_v47 = vpop.xlane.xlu1 %1853  ;;  %v1863_v54 = vpop.xlane.xlu0 %1862 }
 0x2fc   :  { %v1878_v1 = vmul.f32 0.020408163, %v1854_v47  ;;  %v1881_v15 = vmul.f32 0.020408163, %v1863_v54  ;;  %v1922_v54 = vld [vmem:[%s5944_s2 + $0x38] sm:$0xff] }
 0x2fe   :  { %v1894_v60 = vadd.f32 1e-05, %v1878_v1  ;;  %v1897_v56 = vadd.f32 1e-05, %v1881_v15 }
 0x2ff   :  { %v1848_v5 = vpop.xlane.xlu1 %1847  ;;  %v1857_v11 = vpop.xlane.xlu0 %1856 }
 0x300   :  { %v1876_v28 = vmul.f32 0.020408163, %v1848_v5  ;;  %v1879_v57 = vmul.f32 0.020408163, %v1857_v11  ;;  %v1925_v11 = vld [vmem:[%s5944_s2 + $0x50] sm:$0xff] }
 0x302   :  { %v1892_v62 = vadd.f32 1e-05, %v1876_v28  ;;  %v1895_v41 = vadd.f32 1e-05, %v1879_v57  ;;  %v1928_v57 = vld [vmem:[%s5944_s2 + $0x68] sm:$0xff] }
 0x303   :  { %v1842_v18 = vpop.xlane.xlu1 %1841  ;;  %v1851_v33 = vpop.xlane.xlu0 %1850 }
 0x304   :  { %3895 = vrsqrt.f32 %v1892_v62  ;;  %v1874_v61 = vmul.f32 0.020408163, %v1842_v18  ;;  %v1877_v32 = vmul.f32 0.020408163, %v1851_v33  ;;  %v1927_v33 = vld [vmem:[%s5944_s2 + $0x60] sm:$0xff] }
 0x305   :  { %3897 = vrsqrt.f32 %v1894_v60 }
 0x306   :  { %3899 = vrsqrt.f32 %v1897_v56  ;;  %v1890_v49 = vadd.f32 1e-05, %v1874_v61  ;;  %v1893_v8 = vadd.f32 1e-05, %v1877_v32  ;;  %v2050_v56 = vld [vmem:[%s5943_s3 + $0x38] sm:$0xff] }
 0x307   :  { %v1866_v63 = vpop.xlane.xlu1 %1865  ;;  %v1845_v52 = vpop.xlane.xlu0 %1844 }
 0x308   :  { %v1875_v25 = vmul.f32 0.020408163, %v1845_v52  ;;  %v1882_v23 = vmul.f32 0.020408163, %v1866_v63 }
 0x30a   :  { %v1891_v34 = vadd.f32 1e-05, %v1875_v25  ;;  %v1898_v13 = vadd.f32 1e-05, %v1882_v23  ;;  %v1920_v25 = vld [vmem:[%s5944_s2 + $0x28] sm:$0xff] }
 0x30b   :  { %v1836_v37 = vpop.xlane.xlu1 %1835  ;;  %v1839_v31 = vpop.xlane.xlu0 %1838 }
 0x30c   :  { %3901 = vrsqrt.f32 %v1891_v34  ;;  %v1872_v51 = vmul.f32 0.020408163, %v1836_v37  ;;  %v1873_v27 = vmul.f32 0.020408163, %v1839_v31 }
 0x30d   :  { %3903 = vrsqrt.f32 %v1890_v49 }
 0x30e   :  { %3905 = vrsqrt.f32 %v1893_v8  ;;  %v1888_v2 = vadd.f32 1e-05, %v1872_v51  ;;  %v1889_v29 = vadd.f32 1e-05, %v1873_v27 }
 0x30f   :  { %3907 = vrsqrt.f32 %v1895_v41  ;;  %v1830_v10 = vpop.xlane.xlu1 %1829  ;;  %v1833_v5 = vpop.xlane.xlu0 %1832  ;;  %v1930_v41 = vld [vmem:[%s5944_s2 + $0x78] sm:$0xff] }
 0x310   :  { %3909 = vrsqrt.f32 %v1888_v2  ;;  %v1870_v19 = vmul.f32 0.020408163, %v1830_v10  ;;  %v1871_v15 = vmul.f32 0.020408163, %v1833_v5  ;;  %v1921_v10 = vld [vmem:[%s5944_s2 + $0x30] sm:$0xff] }
 0x311   :  { %v3896_v42 = vpop.eup %3895  ;;  %3911 = vrsqrt.f32 %v1896_v14 }
 0x312   :  { %v1940_v7 = vmul.f32 %v3896_v42, %v1924_v38  ;;  %v3898_v4 = vpop.eup %3897  ;;  %v1886_v20 = vadd.f32 1e-05, %v1870_v19  ;;  %3913 = vrsqrt.f32 %v1898_v13  ;;  %v1887_v63 = vadd.f32 1e-05, %v1871_v15  ;;  %v2048_v38 = vld [vmem:[%s5943_s3 + $0x28] sm:$0xff] }
 0x313   :  { %v1942_v50 = vmul.f32 %v3898_v4, %v1926_v43  ;;  %v3900_v6 = vpop.eup %3899  ;;  %v1824_v53 = vpop.xlane.xlu1 %1823  ;;  %v1918_v4 = vld [vmem:[%s5944_s2 + $0x18] sm:$0xff] }
 0x314   :  { %1994 = vperm.xlu0 %3700, %v1940_v7   ;;  %v1945_v35 = vmul.f32 %v3900_v6, %v1929_v22  ;;  %3915 = vrsqrt.f32 %v1886_v20  ;;  %v1868_v28 = vmul.f32 0.020408163, %v1824_v53  ;;  %v1827_v34 = vpop.xlane.xlu0 %1826  ;;  %v2049_v6 = vld [vmem:[%s5943_s3 + $0x30] sm:$0xff]  ;;  %v1916_v22 = vld [vmem:[%s5944_s2 + $0x8] sm:$0xff] }
 0x315   :  { %3917 = vrsqrt.f32 %v1889_v29  ;;  %v1869_v37 = vmul.f32 0.020408163, %v1827_v34  ;;  %v2047_v29 = vld [vmem:[%s5943_s3 + $0x20] sm:$0xff] }
 0x316   :  { %v1884_v61 = vadd.f32 1e-05, %v1868_v28 }
 0x317   :  { %v1885_v2 = vadd.f32 1e-05, %v1869_v37  ;;  %v5474_v15 = vpop.permute.xlu1 %2131 }
 0x318   :  { %2004 = vperm.xlu0 %3700, %v1942_v50   ;;  %3919 = vrsqrt.f32 %v1884_v61  ;;  %v1821_v23 = vpop.xlane.xlu0 %1820  ;;  %v2046_v50 = vld [vmem:[%s5943_s3 + $0x18] sm:$0xff] }
 0x319   :  { %v3902_v55 = vpop.eup %3901  ;;  %3921 = vrsqrt.f32 %v1887_v63  ;;  %v1867_v31 = vmul.f32 0.020408163, %v1821_v23 }
 0x31a   :  { %v3904_v17 = vpop.eup %3903  ;;  %v1939_v47 = vmul.f32 %v3902_v55, %v1923_v46  ;;  %3923 = vrsqrt.f32 %v1885_v2  ;;  %v1919_v55 = vld [vmem:[%s5944_s2 + $0x20] sm:$0xff] }
 0x31b   :  { %v3906_v1 = vpop.eup %3905  ;;  %v1938_v60 = vmul.f32 %v3904_v17, %v1922_v54  ;;  %v1883_v27 = vadd.f32 1e-05, %v1867_v31  ;;  %v2044_v17 = vld [vmem:[%s5943_s3 + $0x8] sm:$0xff] }
 0x31c   :  { %2019 = vperm.xlu0 %3700, %v1945_v35   ;;  %1989 = vperm.xlu1 %3699, %v1939_v47   ;;  %v1941_v62 = vmul.f32 %v3906_v1, %v1925_v11  ;;  %v3908_v18 = vpop.eup %3907  ;;  %v1917_v47 = vld [vmem:[%s5944_s2 + $0x10] sm:$0xff]  ;;  %v1915_v11 = vld [vmem:[%s5944_s2] sm:$0xff]  ;;  %s3928_s2 = smov 7  }
 0x31d   :  { %v3910_v32 = vpop.eup %3909  ;;  %v1943_v52 = vmul.f32 %v3908_v18, %v1927_v33  ;;  %3925 = vrsqrt.f32 %v1883_v27  ;;  %v2045_v1 = vld [vmem:[%s5943_s3 + $0x10] sm:$0xff] }
 0x31e   :  { %v3912_v49 = vpop.eup %3911  ;;  %v1936_v8 = vmul.f32 %v3910_v32, %v1920_v25 }
 0x31f   :  { %v1944_v51 = vmul.f32 %v3912_v49, %v1928_v57  ;;  %v3914_v30 = vpop.eup %3913  ;;  %v2117_v33 = vpop.permute.xlu0 %2116 }
 0x320   :  { %1984 = vperm.xlu0 %3700, %v1938_v60   ;;  %1999 = vperm.xlu1 %3699, %v1941_v62   ;;  %v1946_v7 = vmul.f32 %v3914_v30, %v1930_v41  ;;  %v2043_v60 = vld [vmem:[%s5943_s3] sm:$0xff]  ;;  %v5476_v62 = vpop.permute.xlu1 %2136  ;;  %s3929_s3 = smov 8  }
 0x321   :  { %v3916_v42 = vpop.eup %3915 }
 0x322   :  { %v3918_v14 = vpop.eup %3917  ;;  %v1934_v43 = vmul.f32 %v3916_v42, %v1918_v4 }
 0x323   :  { %v1937_v19 = vmul.f32 %v3918_v14, %v1921_v10  ;;  %v2107_v61 = vpop.permute.xlu0 %2106 }
 0x324   :  { %2096 = vperm.xlu0 %3700, %v2050_v56   ;;  %2009 = vperm.xlu1 %3699, %v1943_v52   ;;  %v5478_v18 = vpop.permute.xlu1 %2121 }
 0x325   :  { %v3920_v13 = vpop.eup %3919 }
 0x326   :  { %v3922_v46 = vpop.eup %3921  ;;  %v1932_v20 = vmul.f32 %v3920_v13, %v1916_v22 }
 0x327   :  { %v1935_v35 = vmul.f32 %v3922_v46, %v1919_v55  ;;  %v3924_v53 = vpop.eup %3923 }
 0x328   :  { %1974 = vperm.xlu0 %3700, %v1936_v8   ;;  %2014 = vperm.xlu1 %3699, %v1944_v51   ;;  %v1933_v54 = vmul.f32 %v3924_v53, %v1917_v47  ;;  %v5480_v56 = vpop.permute.xlu1 %2126 }
 0x32a   :  { %v3926_v5 = vpop.eup %3925 }
 0x32b   :  { %v1931_v28 = vmul.f32 %v3926_v5, %v1915_v11 }
 0x32c   :  { %2086 = vperm.xlu0 %3700, %v2048_v38   ;;  %2024 = vperm.xlu1 %3699, %v1946_v7   ;;  %v2112_v32 = vpop.permute.xlu1 %2111 }
 0x330   :  { %1964 = vperm.xlu0 %3700, %v1934_v43   ;;  %1979 = vperm.xlu1 %3699, %v1937_v19   ;;  %v2102_v25 = vpop.permute.xlu1 %2101 }
 0x334   :  { %2076 = vperm.xlu0 %3700, %v2046_v50   ;;  %2091 = vperm.xlu1 %3699, %v2049_v6  }
 0x338   :  { %1954 = vperm.xlu0 %3700, %v1932_v20   ;;  %1969 = vperm.xlu1 %3699, %v1935_v35  }
 0x33c   :  { %2066 = vperm.xlu0 %3700, %v2044_v17   ;;  %2081 = vperm.xlu1 %3699, %v2047_v29  }
 0x340   :  { %1959 = vperm.xlu1 %3699, %v1933_v54  }
 0x344   :  { %2071 = vperm.xlu1 %3699, %v2045_v1  }
 0x348   :  { %1949 = vperm.xlu1 %3699, %v1931_v28  }
 0x34c   :  { %2061 = vperm.xlu1 %3699, %v2043_v60  }
 0x38f   :  { %v1995_v63 = vpop.permute.xlu0 %1994 }
 0x393   :  { %v2005_v52 = vpop.permute.xlu0 %2004 }
 0x394   :  { %v2038_v11 = vmul.f32 %v2005_v52, %v5294_v26 }
 0x397   :  { %v1990_v49 = vpop.permute.xlu1 %1989  ;;  %v5482_v34 = vpop.permute.xlu0 %2019 }
 0x398   :  { %v2035_v29 = vmul.f32 %v1990_v49, %v5328_v24  ;;  %v2150_v49 = vadd.f32 %v2117_v33, %v2038_v11  ;;  %v2041_v33 = vmul.f32 %v5482_v34, %v5291_v44 }
 0x39b   :  { %v2000_v57 = vpop.permute.xlu1 %1999  ;;  %v1985_v8 = vpop.permute.xlu0 %1984 }
 0x39c   :  { %v2034_v53 = vmul.f32 %v1985_v8, %v5317_v48  ;;  %v2037_v24 = vmul.f32 %v2000_v57, %v5314_v9 }
 0x39e   :  { %v2149_v60 = vadd.f32 %v2112_v32, %v2037_v24 }
 0x39f   :  { %v2010_v37 = vpop.permute.xlu1 %2009  ;;  %v2097_v51 = vpop.permute.xlu0 %2096 }
 0x3a0   :  { %v2039_v57 = vmul.f32 %v2010_v37, %v5288_v0  ;;  %v2165_v52 = vmax.f32 %v2149_v60, 0.0 }
 0x3a2   :  { %v2151_v0 = vadd.f32 %v5478_v18, %v2039_v57 }
 0x3a3   :  { %v2015_v30 = vpop.permute.xlu1 %2014  ;;  %v1975_v38 = vpop.permute.xlu0 %1974 }
 0x3a4   :  { %v2032_v27 = vmul.f32 %v1975_v38, %v5331_v40  ;;  %v2147_v40 = vadd.f32 %v2102_v25, %v2035_v29 }
 0x3a6   :  { %v2163_v28 = vmax.f32 %v2147_v40, 0.0 }
 0x3a7   :  { %v2025_v41 = vpop.permute.xlu1 %2024  ;;  %v2087_v2 = vpop.permute.xlu0 %2086 }
 0x3a8   :  { %v2144_v55 = vadd.f32 %v2087_v2, %v2032_v27 }
 0x3aa   :  { %v2160_v1 = vmax.f32 %v2144_v55, 0.0 }
 0x3ab   :  { %v1980_v42 = vpop.permute.xlu1 %1979  ;;  %v1965_v14 = vpop.permute.xlu0 %1964 }
 0x3ac   :  { %v2030_v31 = vmul.f32 %v1965_v14, %v5343_v59  ;;  %v2033_v20 = vmul.f32 %v1980_v42, %v5340_v58 }
 0x3af   :  { %v2092_v7 = vpop.permute.xlu1 %2091  ;;  %v2077_v10 = vpop.permute.xlu0 %2076 }
 0x3b0   :  { %v2142_v19 = vadd.f32 %v2077_v10, %v2030_v31  ;;  %v2145_v59 = vadd.f32 %v2092_v7, %v2033_v20  ;;  %v3880_v10 = vld [vmem:[%s5945_s4 + $0x14] ss:$36 sps:$4 sm:$0xff]  }
 0x3b1   :  { %2854 = vmatprep.mubr.bf16.mxu0 %v3880_v10 }
 0x3b2   :  { %v2158_v35 = vmax.f32 %v2142_v19, 0.0  ;;  %v2161_v48 = vmax.f32 %v2145_v59, 0.0 }
 0x3b3   :  { %v1970_v4 = vpop.permute.xlu1 %1969  ;;  %v1955_v8 = vpop.permute.xlu0 %1954 }
 0x3b4   :  { %v2031_v50 = vmul.f32 %v1970_v4, %v5351_v16  ;;  %v2036_v16 = vmul.f32 %v1995_v63, %v5302_v39  ;;  %v2040_v63 = vmul.f32 %v2015_v30, %v5283_v3  ;;  %v2042_v3 = vmul.f32 %v2025_v41, %v5311_v45 }
 0x3b5   :  { %v2153_v45 = vadd.f32 %v5474_v15, %v2041_v33  ;;  %v2167_v41 = vmax.f32 %v2151_v0, 0.0  ;;  %v2028_v2 = vmul.f32 %v1955_v8, %v5354_v12 }
 0x3b6   :  { %v2148_v5 = vadd.f32 %v2107_v61, %v2036_v16  ;;  %v2152_v32 = vadd.f32 %v5480_v56, %v2040_v63  ;;  %v2154_v56 = vadd.f32 %v5476_v62, %v2042_v3 }
 0x3b7   :  { %v2082_v23 = vpop.permute.xlu1 %2081  ;;  %v2067_v44 = vpop.permute.xlu0 %2066  ;;  %v2169_v62 = vmax.f32 %v2153_v45, 0.0 }
 0x3b8   :  { %v2143_v22 = vadd.f32 %v2082_v23, %v2031_v50  ;;  %v2164_v9 = vmax.f32 %v2148_v5, 0.0  ;;  %v2168_v30 = vmax.f32 %v2152_v32, 0.0  ;;  %v2170_v34 = vmax.f32 %v2154_v56, 0.0  ;;  %v3871_v23 = vld [vmem:[%s5945_s4 + $0x4] ss:$36 sps:$4 sm:$0xff]  }
 0x3b9   :  { %v2140_v4 = vadd.f32 %v2067_v44, %v2028_v2  ;;  %2756 = vmatprep.mubr.bf16.mxu1 %v3871_v23 }
 0x3ba   :  { %v2159_v47 = vmax.f32 %v2143_v22, 0.0  ;;  %v5514_v61 = vpack.c.bf16 %v2164_v9, %v2163_v28  ;;  %v5534_v18 = vpack.c.bf16 %v2168_v30, %v2167_v41 }
 0x3bb   :  { %v1960_v43 = vpop.permute.xlu1 %1959  ;;  %v2156_v14 = vmax.f32 %v2140_v4, 0.0 }
 0x3bc   :  { %v2029_v6 = vmul.f32 %v1960_v43, %v5362_v36  ;;  %v2146_v36 = vadd.f32 %v2097_v51, %v2034_v53  ;;  %v5499_v58 = vpack.c.bf16 %v2160_v1, %v2159_v47  ;;  %v2166_v51 = vmax.f32 %v2150_v49, 0.0 }
 0x3bd   :  { %v2179_v43 = vlaneseq }
 0x3be   :  { %v2162_v39 = vmax.f32 %v2146_v36, 0.0  ;;  %v5525_v37 = vpack.c.bf16 %v2166_v51, %v2165_v52 }
 0x3bf   :  { %v2072_v13 = vpop.permute.xlu1 %2071  ;;  %v5599_v31 = vand.u32 127, %v2179_v43 }
 0x3c0   :  { %v2141_v46 = vadd.f32 %v2072_v13, %v2029_v6  ;;  %v5507_v25 = vpack.c.bf16 %v2162_v39, %v2161_v48 }
 0x3c1   :  { %vm2181_vm2 = vcmp.eq.s32.totalorder %v5599_v31, 0  ;;  %vm2183_vm3 = vcmp.eq.s32.totalorder %v5599_v31, 7  ;;  %vm2187_vm5 = vcmp.eq.s32.totalorder %v5599_v31, 14  ;;  %vm2191_vm7 = vcmp.eq.s32.totalorder %v5599_v31, 21 }
 0x3c2   :  { %v2157_v17 = vmax.f32 %v2141_v46, 0.0  ;;  %vm2184_vm4 = vmor %vm2181_vm2, %vm2183_vm3  ;;  %vm2195_vm9 = vcmp.eq.s32.totalorder %v5599_v31, 28  ;;  %vm2199_vm11 = vcmp.eq.s32.totalorder %v5599_v31, 35  ;;  %vm2203_vm13 = vcmp.eq.s32.totalorder %v5599_v31, 42 }
 0x3c3   :  { %v1950_v26 = vpop.permute.xlu1 %1949  ;;  %vm2188_vm6 = vmor %vm2184_vm4, %vm2187_vm5  ;;  %v5976_v46 = vmov 0   ;;  %vm2182_vm4 = vcmp.eq.s32.totalorder %v5599_v31, 6  ;;  %vm2185_vm5 = vcmp.eq.s32.totalorder %v5599_v31, 13 }
 0x3c4   :  { %v5491_v54 = vpack.c.bf16 %v2158_v35, %v2157_v17  ;;  %v2027_v42 = vmul.f32 %v1950_v26, %v5371_v21  ;;  %v5541_v21 = vpack.c.bf16 %v2170_v34, %v2169_v62  ;;  %vm2192_vm8 = vmor %vm2188_vm6, %vm2191_vm7  ;;  %v5650_v17 = vshrl.u32 %v2179_v43, 7  ;;  %v3869_v43 = vld [vmem:[%s5945_s4] ss:$36 sps:$4 sm:$0xff]  }
 0x3c5   :  { %vm2196_vm10 = vmor %vm2192_vm8, %vm2195_vm9  ;;  %vm2292_vm6 = vcmask 56320   ;;  %vm2189_vm8 = vcmp.eq.s32.totalorder %v5599_v31, 20 }
 0x3c6   :  { %2278 = vrot.lane.b32.xlu0 %v5491_v54, %s3928_s2  ;;  %2219 = vrot.lane.b32.xlu1 %v5491_v54, %s3929_s3  ;;  %vm2200_vm12 = vmor %vm2196_vm10, %vm2199_vm11  ;;  %v2265_v59 = vsub.s32 0, %v5650_v17  ;;  %vm2193_vm11 = vcmp.eq.s32.totalorder %v5599_v31, 27  ;;  %v3874_v17 = vld [vmem:[%s5945_s4 + $0x48] ss:$36 sps:$4 sm:$0xff]  }
 0x3c7   :  { %v2062_v38 = vpop.permute.xlu1 %2061  ;;  %vm2204_vm14 = vmor %vm2200_vm12, %vm2203_vm13  ;;  %vm2233_vm12 = vcmask 64512  }
 0x3c8   :  { %v2139_v7 = vadd.f32 %v2062_v38, %v2027_v42  ;;  %vm2207_vm0 = vmxor %vm2204_vm14, %vm3936_vm15 }
 0x3c9   :  { %v2259_v55 = vsel %vm2207_vm0, 1, %v5976_v46  ;;  %vm2186_vm7 = vmor %vm2182_vm4, %vm2185_vm5  ;;  %vm2197_vm0 = vcmp.eq.s32.totalorder %v5599_v31, 34  ;;  %vm2205_vm5 = vcmp.eq.s32.totalorder %v5599_v31, 48 }
 0x3ca   :  { %2280 = vrot.lane.b32.xlu0 %v5499_v58, %s3928_s2  ;;  %2221 = vrot.lane.b32.xlu1 %v5499_v58, %s3929_s3  ;;  %v2155_v15 = vmax.f32 %v2139_v7, 0.0  ;;  %vm2260_vm2 = vcmp.eq.s32.totalorder %v2259_v55, 1  ;;  %vm5661_vm9 = vmneg %vm2292_vm6 }
 0x3cb   :  { %vm2261_vm3 = vmpackc.low %vm2260_vm2, %vm2260_vm2 }
 0x3cc   :  { %v5547_v12 = vpack.c.bf16 %v2156_v14, %v2155_v15  ;;  %v2262_v47 = vsel %vm2261_vm3, 65537, %v5976_v46  ;;  %vm2190_vm10 = vmor %vm2186_vm7, %vm2189_vm8  ;;  %vm2201_vm3 = vcmp.eq.s32.totalorder %v5599_v31, 41  ;;  %v3872_v31 = vld [vmem:[%s5945_s4 + $0x4c] ss:$36 sps:$4 sm:$0xff]  }
 0x3cd   :  { %v5659_v1 = vrot.slane %v2262_v47, %v2265_v59  ;;  %vm2194_vm14 = vmor %vm2190_vm10, %vm2193_vm11  ;;  %vm2333_vm10 = vcmask 48128   ;;  %vm2391_vm11 = vcmask 7168  }
 0x3ce   :  { %2282 = vrot.lane.b32.xlu0 %v5507_v25, %s3928_s2  ;;  %2223 = vrot.lane.b32.xlu1 %v5507_v25, %s3929_s3  ;;  %vm2198_vm2 = vmor %vm2194_vm14, %vm2197_vm0  ;;  %vm2538_vm14 = vcmask 343040   ;;  %vm2489_vm0 = vcmask 351232  }
 0x3cf   :  { %vm2267_vm13 = vcmp.ne.s16.totalorder %v5659_v1, 0  ;;  %vm2202_vm4 = vmor %vm2198_vm2, %vm2201_vm3  ;;  %vm2579_vm2 = vcmask 334848   ;;  %v3892_v1 = vld [vmem:[%s5945_s4 + $0x64] ss:$36 sps:$4 sm:$0xff]  }
 0x3d0   :  { %vm2206_vm6 = vmor %vm2202_vm4, %vm2205_vm5 }
 0x3d1   :  { %vm2208_vm7 = vmxor %vm2206_vm6, %vm3936_vm15 }
 0x3d2   :  { %2284 = vrot.lane.b32.xlu0 %v5514_v61, %s3928_s2  ;;  %2225 = vrot.lane.b32.xlu1 %v5514_v61, %s3929_s3  ;;  %v2358_v30 = vsel %vm2208_vm7, 1, %v5976_v46 }
 0x3d3   :  { %vm2359_vm8 = vcmp.eq.s32.totalorder %v2358_v30, 1 }
 0x3d4   :  { %vm2360_vm15 = vmpackc.low %vm2359_vm8, %vm2359_vm8 }
 0x3d5   :  { %v2361_v62 = vsel %vm2360_vm15, 65537, %v5976_v46 }
 0x3d6   :  { %2286 = vrot.lane.b32.xlu0 %v5525_v37, %s3928_s2  ;;  %2227 = vrot.lane.b32.xlu1 %v5525_v37, %s3929_s3  ;;  %v5719_v23 = vrot.slane %v2361_v62, %v2265_v59  ;;  %v3877_v59 = vld [vmem:[%s5945_s4 + $0xc] ss:$36 sps:$4 sm:$0xff]  }
 0x3da   :  { %2288 = vrot.lane.b32.xlu0 %v5534_v18, %s3928_s2  ;;  %2229 = vrot.lane.b32.xlu1 %v5534_v18, %s3929_s3 }
 0x3de   :  { %2290 = vrot.lane.b32.xlu0 %v5541_v21, %s3928_s2  ;;  %2231 = vrot.lane.b32.xlu1 %v5541_v21, %s3929_s3 }
 0x3e2   :  { %2276 = vrot.lane.b32.xlu0 %v5547_v12, %s3928_s2  ;;  %2217 = vrot.lane.b32.xlu1 %v5547_v12, %s3929_s3 }
 0x3e6   :  { %2387 = vrot.lane.b32.xlu0 %v5534_v18, %s3930_s14  ;;  %2329 = vrot.lane.b32.xlu1 %v5534_v18, %s3931_s15 }
 0x3ea   :  { %2385 = vrot.lane.b32.xlu0 %v5525_v37, %s3930_s14  ;;  %2327 = vrot.lane.b32.xlu1 %v5525_v37, %s3931_s15 }
 0x3ee   :  { %2383 = vrot.lane.b32.xlu0 %v5514_v61, %s3930_s14  ;;  %2325 = vrot.lane.b32.xlu1 %v5514_v61, %s3931_s15 }
 0x3f2   :  { %2323 = vrot.lane.b32.xlu0 %v5507_v25, %s3931_s15  ;;  %2381 = vrot.lane.b32.xlu1 %v5507_v25, %s3930_s14 }
 0x3f6   :  { %2436 = vrot.lane.b32.xlu0 %v5534_v18, %s3932_s18  ;;  %2321 = vrot.lane.b32.xlu1 %v5499_v58, %s3931_s15 }
 0x3fa   :  { %2379 = vrot.lane.b32.xlu0 %v5499_v58, %s3930_s14  ;;  %2434 = vrot.lane.b32.xlu1 %v5525_v37, %s3932_s18 }
 0x3fe   :  { %2389 = vrot.lane.b32.xlu0 %v5541_v21, %s3930_s14  ;;  %2331 = vrot.lane.b32.xlu1 %v5541_v21, %s3931_s15 }
 0x402   :  { %2319 = vrot.lane.b32.xlu0 %v5491_v54, %s3931_s15  ;;  %2377 = vrot.lane.b32.xlu1 %v5491_v54, %s3930_s14 }
 0x406   :  { %2432 = vrot.lane.b32.xlu0 %v5514_v61, %s3932_s18  ;;  %2317 = vrot.lane.b32.xlu1 %v5547_v12, %s3931_s15 }
 0x40a   :  { %2375 = vrot.lane.b32.xlu0 %v5547_v12, %s3930_s14  ;;  %2438 = vrot.lane.b32.xlu1 %v5541_v21, %s3932_s18 }
 0x40e   :  { %2428 = vrot.lane.b32.xlu0 %v5499_v58, %s3932_s18  ;;  %2430 = vrot.lane.b32.xlu1 %v5507_v25, %s3932_s18 }
 0x412   :  { %2485 = vrot.lane.b32.xlu0 %v5534_v18, %s3933_s19  ;;  %2426 = vrot.lane.b32.xlu1 %v5491_v54, %s3932_s18 }
 0x416   :  { %2424 = vrot.lane.b32.xlu0 %v5547_v12, %s3932_s18  ;;  %2534 = vrot.lane.b32.xlu1 %v5534_v18, %s3934_s20 }
 0x41a   :  { %2532 = vrot.lane.b32.xlu0 %v5525_v37, %s3934_s20  ;;  %2483 = vrot.lane.b32.xlu1 %v5525_v37, %s3933_s19 }
 0x41e   :  { %2536 = vrot.lane.b32.xlu0 %v5541_v21, %s3934_s20  ;;  %2487 = vrot.lane.b32.xlu1 %v5541_v21, %s3933_s19 }
 0x422   :  { %2479 = vrot.lane.b32.xlu0 %v5507_v25, %s3933_s19  ;;  %2481 = vrot.lane.b32.xlu1 %v5514_v61, %s3933_s19 }
 0x426   :  { %2528 = vrot.lane.b32.xlu0 %v5507_v25, %s3934_s20  ;;  %2530 = vrot.lane.b32.xlu1 %v5514_v61, %s3934_s20 }
 0x42a   :  { %2577 = vrot.lane.b32.xlu0 %v5541_v21, %s3935_s23  ;;  %2575 = vrot.lane.b32.xlu1 %v5534_v18, %s3935_s23 }
 0x42e   :  { %2573 = vrot.lane.b32.xlu0 %v5525_v37, %s3935_s23  ;;  %2477 = vrot.lane.b32.xlu1 %v5499_v58, %s3933_s19 }
 0x432   :  { %2475 = vrot.lane.b32.xlu0 %v5491_v54, %s3933_s19  ;;  %2526 = vrot.lane.b32.xlu1 %v5499_v58, %s3934_s20 }
 0x436   :  { %2524 = vrot.lane.b32.xlu0 %v5491_v54, %s3934_s20  ;;  %2571 = vrot.lane.b32.xlu1 %v5514_v61, %s3935_s23 }
 0x438   :  { %v5628_v19 = vpop.permute.xlu1 %2219  ;;  %v5630_v50 = vpop.permute.xlu0 %2278 }
 0x439   :  { %v2239_v44 = vsel %vm2233_vm12, 0, %v5628_v19 }
 0x43a   :  { %2569 = vrot.lane.b32.xlu0 %v5507_v25, %s3935_s23  ;;  %2473 = vrot.lane.b32.xlu1 %v5547_v12, %s3933_s19  ;;  %v2269_v7 = vsel %vm2267_vm13, %v2239_v44, 0 }
 0x43c   :  { %v5636_v6 = vpop.permute.xlu1 %2221  ;;  %v5638_v13 = vpop.permute.xlu0 %2280 }
 0x43d   :  { %v2242_v38 = vsel %vm2233_vm12, 0, %v5636_v6 }
 0x43e   :  { %2567 = vrot.lane.b32.xlu0 %v5499_v58, %s3935_s23  ;;  %2522 = vrot.lane.b32.xlu1 %v5547_v12, %s3934_s20  ;;  %v2270_v42 = vsel %vm2267_vm13, %v2242_v38, 0 }
 0x440   :  { %v2224_v27 = vpop.permute.xlu1 %2223  ;;  %v2283_v22 = vpop.permute.xlu0 %2282 }
 0x441   :  { %v2245_v51 = vsel %vm2233_vm12, 0, %v2224_v27 }
 0x442   :  { %2563 = vrot.lane.b32.xlu0 %v5547_v12, %s3935_s23  ;;  %2565 = vrot.lane.b32.xlu1 %v5491_v54, %s3935_s23  ;;  %v2271_v56 = vsel %vm2267_vm13, %v2245_v51, 0 }
 0x444   :  { %v2226_v20 = vpop.permute.xlu1 %2225  ;;  %v2285_v35 = vpop.permute.xlu0 %2284 }
 0x445   :  { %v2248_v52 = vsel %vm2233_vm12, 0, %v2226_v20 }
 0x446   :  { %v2272_v8 = vsel %vm2267_vm13, %v2248_v52, 0 }
 0x448   :  { %v2228_v29 = vpop.permute.xlu1 %2227  ;;  %v2287_v53 = vpop.permute.xlu0 %2286 }
 0x449   :  { %v2251_v9 = vsel %vm2233_vm12, 0, %v2228_v29 }
 0x44a   :  { %v2273_v26 = vsel %vm2267_vm13, %v2251_v9, 0 }
 0x44c   :  { %v2230_v16 = vpop.permute.xlu1 %2229  ;;  %v2289_v36 = vpop.permute.xlu0 %2288 }
 0x44d   :  { %v2254_v39 = vsel %vm2233_vm12, 0, %v2230_v16 }
 0x44e   :  { %v2274_v63 = vsel %vm2267_vm13, %v2254_v39, 0 }
 0x450   :  { %v2232_v24 = vpop.permute.xlu1 %2231  ;;  %v2291_v48 = vpop.permute.xlu0 %2290 }
 0x451   :  { %v2257_v5 = vsel %vm2233_vm12, 0, %v2232_v24  ;;  %3515 = vmatprep.subr.msk.bf16.mxu1 %vm5661_vm9, %v2291_v48 }
 0x452   :  { %v2275_v11 = vsel %vm2267_vm13, %v2257_v5, 0 }
 0x453   :  { %3516 = vmatpush3.bf16.msra.mxu1 %v2275_v11 }
 0x454   :  { %v2218_v28 = vpop.permute.xlu1 %2217  ;;  %3517 = vmatprep.subr.msk.bf16.mxu1 %vm5661_vm9, %v2289_v36  ;;  %v2277_v60 = vpop.permute.xlu0 %2276 }
 0x455   :  { %v2236_v4 = vsel %vm2233_vm12, 0, %v2218_v28  ;;  %vm2440_vm12 = vcmask 392192  }
 0x456   :  { %v2268_v10 = vsel %vm2267_vm13, %v2236_v4, 0  ;;  %v3881_v4 = vld [vmem:[%s5945_s4 + $0x54] ss:$36 sps:$4 sm:$0xff]  }
 0x457   :  { %3518 = vmatpush3.bf16.msra.mxu1 %v2274_v63 }
 0x458   :  { %v2330_v49 = vpop.permute.xlu1 %2329  ;;  %3519 = vmatprep.subr.msk.bf16.mxu1 %vm5661_vm9, %v2287_v53  ;;  %v2388_v57 = vpop.permute.xlu0 %2387 }
 0x459   :  { %v2411_v46 = vsel %vm2391_vm11, 0, %v2388_v57 }
 0x45b   :  { %3520 = vmatpush3.bf16.msra.mxu1 %v2273_v26 }
 0x45c   :  { %v2328_v32 = vpop.permute.xlu1 %2327  ;;  %3521 = vmatprep.subr.msk.bf16.mxu1 %vm5661_vm9, %v2285_v35  ;;  %v2386_v3 = vpop.permute.xlu0 %2385 }
 0x45d   :  { %v2350_v29 = vsel %vm2333_vm10, 0, %v2328_v32  ;;  %v2408_v53 = vsel %vm2391_vm11, 0, %v2386_v3 }
 0x45f   :  { %3522 = vmatpush3.bf16.msra.mxu1 %v2272_v8 }
 0x460   :  { %v2326_v33 = vpop.permute.xlu1 %2325  ;;  %3523 = vmatprep.subr.msk.bf16.mxu1 %vm5661_vm9, %v2283_v22  ;;  %v2384_v0 = vpop.permute.xlu0 %2383  ;;  %v2353_v22 = vsel %vm2333_vm10, 0, %v2330_v49 }
 0x461   :  { %v2347_v40 = vsel %vm2333_vm10, 0, %v2326_v33  ;;  %v2405_v24 = vsel %vm2391_vm11, 0, %v2384_v0 }
 0x463   :  { %3524 = vmatpush3.bf16.msra.mxu1 %v2271_v56 }
 0x464   :  { %v2382_v45 = vpop.permute.xlu1 %2381  ;;  %3525 = vmatprep.subr.msk.bf16.mxu1 %vm5661_vm9, %v5638_v13  ;;  %v2324_v41 = vpop.permute.xlu0 %2323 }
 0x465   :  { %v2402_v28 = vsel %vm2391_vm11, 0, %v2382_v45 }
 0x467   :  { %3526 = vmatpush3.bf16.msra.mxu1 %v2270_v42 }
 0x468   :  { %v5706_v34 = vpop.permute.xlu1 %2321  ;;  %3527 = vmatprep.subr.msk.bf16.mxu1 %vm5661_vm9, %v5630_v50  ;;  %v2437_v2 = vpop.permute.xlu0 %2436 }
 0x469   :  { %v2460_v63 = vsel %vm2440_vm12, %v2437_v2, 0  ;;  %v2341_v26 = vsel %vm2333_vm10, 0, %v5706_v34  ;;  %v3875_v34 = vld [vmem:[%s5945_s4 + $0x8] ss:$36 sps:$4 sm:$0xff]  }
 0x46b   :  { %3528 = vmatpush3.bf16.msra.mxu1 %v2269_v7 }
 0x46c   :  { %v2435_v15 = vpop.permute.xlu1 %2434  ;;  %3529 = vmatprep.subr.msk.bf16.mxu1 %vm5661_vm9, %v2277_v60  ;;  %v2380_v14 = vpop.permute.xlu0 %2379  ;;  %vm2366_vm9 = vcmp.ne.s16.totalorder %v5719_v23, 0  ;;  %v2344_v60 = vsel %vm2333_vm10, 0, %v2324_v41 }
 0x46d   :  { %v2373_v35 = vsel %vm2366_vm9, %v2353_v22, 0  ;;  %v2372_v36 = vsel %vm2366_vm9, %v2350_v29, 0  ;;  %v2371_v39 = vsel %vm2366_vm9, %v2347_v40, 0  ;;  %v2370_v57 = vsel %vm2366_vm9, %v2344_v60, 0 }
 0x46e   :  { %v2457_v52 = vsel %vm2440_vm12, %v2435_v15, 0  ;;  %v2399_v32 = vsel %vm2391_vm11, 0, %v2380_v14  ;;  %v2369_v8 = vsel %vm2366_vm9, %v2341_v26, 0 }
 0x46f   :  { %3530 = vmatpush3.bf16.msra.mxu1 %v2268_v10 }
 0x470   :  { %v2332_v19 = vpop.permute.xlu1 %2331  ;;  %v2390_v50 = vpop.permute.xlu0 %2389 }
 0x471   :  { %v2356_v6 = vsel %vm2333_vm10, 0, %v2332_v19  ;;  %v2414_v13 = vsel %vm2391_vm11, 0, %v2390_v50  ;;  %v3883_v19 = vld [vmem:[%s5945_s4 + $0x50] ss:$36 sps:$4 sm:$0xff]  }
 0x472   :  { %v2374_v27 = vsel %vm2366_vm9, %v2356_v6, 0  ;;  %3657 = vmatprep.subr.msk.bf16.mxu1 %vm2267_vm13, %v2414_v13  ;;  %2757 = vmatmul.mubr.bf16.vlgmr.msra.gmra.mxu1 %v3869_v43 }
 0x473   :  { %3544 = vmatpush3.bf16.msra.mxu1 %v2374_v27  ;;  %2764 = vmatprep.mubr.bf16.mxu1 %v3872_v31  ;;  %v3889_v27 = vld [vmem:[%s5945_s4 + $0x1c] ss:$36 sps:$4 sm:$0xff]  }
 0x474   :  { %v2378_v55 = vpop.permute.xlu1 %2377  ;;  %3658 = vmatprep.subr.msk.bf16.mxu1 %vm2267_vm13, %v2411_v46  ;;  %v2320_v20 = vpop.permute.xlu0 %2319 }
 0x475   :  { %v2396_v51 = vsel %vm2391_vm11, 0, %v2378_v55  ;;  %v2338_v33 = vsel %vm2333_vm10, 0, %v2320_v20 }
 0x476   :  { %v2368_v56 = vsel %vm2366_vm9, %v2338_v33, 0 }
 0x477   :  { %3546 = vmatpush3.bf16.msra.mxu1 %v2373_v35 }
 0x478   :  { %v2318_v47 = vpop.permute.xlu1 %2317  ;;  %3659 = vmatprep.subr.msk.bf16.mxu1 %vm2267_vm13, %v2408_v53  ;;  %v2433_v16 = vpop.permute.xlu0 %2432 }
 0x479   :  { %v2454_v0 = vsel %vm2440_vm12, %v2433_v16, 0  ;;  %v2335_v38 = vsel %vm2333_vm10, 0, %v2318_v47 }
 0x47a   :  { %2765 = vmatmul.mubr.bf16.gmra.mxu1 %v3874_v17  ;;  %v2367_v44 = vsel %vm2366_vm9, %v2335_v38, 0  ;;  %v3886_v17 = vld [vmem:[%s5945_s4 + $0x5c] ss:$36 sps:$4 sm:$0xff]  }
 0x47b   :  { %3548 = vmatpush3.bf16.msra.mxu1 %v2372_v36  ;;  %2805 = vmatprep.mubr.bf16.mxu1 %v3877_v59  ;;  %v3887_v38 = vld [vmem:[%s5945_s4 + $0x18] ss:$36 sps:$4 sm:$0xff]  }
 0x47c   :  { %v2439_v48 = vpop.permute.xlu1 %2438  ;;  %3660 = vmatprep.subr.msk.bf16.mxu1 %vm2267_vm13, %v2405_v24  ;;  %v2376_v5 = vpop.permute.xlu0 %2375  ;;  %v3884_v24 = vld [vmem:[%s5945_s4 + $0x58] ss:$36 sps:$4 sm:$0xff]  }
 0x47d   :  { %v2463_v11 = vsel %vm2440_vm12, %v2439_v48, 0  ;;  %v2393_v45 = vsel %vm2391_vm11, 0, %v2376_v5 }
 0x47e   :  { %3665 = vmatprep.subr.msk.bf16.mxu0 %vm2366_vm9, %v2463_v11 }
 0x47f   :  { %3550 = vmatpush3.bf16.msra.mxu1 %v2371_v39  ;;  %3572 = vmatpush3.bf16.msra.mxu0 %v5541_v21 }
 0x480   :  { %v2431_v9 = vpop.permute.xlu1 %2430  ;;  %3661 = vmatprep.subr.msk.bf16.mxu1 %vm2267_vm13, %v2402_v28  ;;  %3666 = vmatprep.subr.msk.bf16.mxu0 %vm2366_vm9, %v2460_v63  ;;  %v2429_v49 = vpop.permute.xlu0 %2428  ;;  %v3893_v28 = vld [vmem:[%s5945_s4 + $0x20] ss:$36 sps:$4 sm:$0xff]  }
 0x481   :  { %v2451_v41 = vsel %vm2440_vm12, %v2431_v9, 0  ;;  %v2448_v2 = vsel %vm2440_vm12, %v2429_v49, 0 }
 0x483   :  { %3552 = vmatpush3.bf16.msra.mxu1 %v2370_v57  ;;  %3574 = vmatpush3.bf16.msra.mxu0 %v5534_v18 }
 0x484   :  { %v2427_v21 = vpop.permute.xlu1 %2426  ;;  %3662 = vmatprep.subr.msk.bf16.mxu1 %vm2267_vm13, %v2399_v32  ;;  %3667 = vmatprep.subr.msk.bf16.mxu0 %vm2366_vm9, %v2457_v52  ;;  %v2486_v3 = vpop.permute.xlu0 %2485 }
 0x485   :  { %v2509_v14 = vsel %vm2489_vm0, %v2486_v3, 0 }
 0x486   :  { %v2520_v31 = vsel %vm2267_vm13, %v2509_v14, 0 }
 0x487   :  { %3554 = vmatpush3.bf16.msra.mxu1 %v2369_v8  ;;  %3576 = vmatpush3.bf16.msra.mxu0 %v5525_v37 }
 0x488   :  { %v2535_v18 = vpop.permute.xlu1 %2534  ;;  %3663 = vmatprep.subr.msk.bf16.mxu1 %vm2267_vm13, %v2396_v51  ;;  %3668 = vmatprep.subr.msk.bf16.mxu0 %vm2366_vm9, %v2454_v0  ;;  %v2425_v30 = vpop.permute.xlu0 %2424 }
 0x489   :  { %v2442_v50 = vsel %vm2440_vm12, %v2425_v30, 0 }
 0x48b   :  { %3556 = vmatpush3.bf16.msra.mxu1 %v2368_v56  ;;  %3578 = vmatpush3.bf16.msra.mxu0 %v5514_v61 }
 0x48c   :  { %v2484_v37 = vpop.permute.xlu1 %2483  ;;  %3664 = vmatprep.subr.msk.bf16.mxu1 %vm2267_vm13, %v2393_v45  ;;  %3669 = vmatprep.subr.msk.bf16.mxu0 %vm2366_vm9, %v2451_v41  ;;  %v2533_v42 = vpop.permute.xlu0 %2532 }
 0x48f   :  { %3558 = vmatpush3.bf16.msra.mxu1 %v2367_v44  ;;  %3580 = vmatpush3.bf16.msra.mxu0 %v5507_v25  ;;  %v2445_v25 = vsel %vm2440_vm12, %v2427_v21, 0 }
 0x490   :  { %v2488_v61 = vpop.permute.xlu1 %2487  ;;  %3670 = vmatprep.subr.msk.bf16.mxu0 %vm2366_vm9, %v2448_v2  ;;  %v2537_v7 = vpop.permute.xlu0 %2536  ;;  %v3890_v2 = vld [vmem:[%s5945_s4 + $0x60] ss:$36 sps:$4 sm:$0xff]  }
 0x491   :  { %v2512_v62 = vsel %vm2489_vm0, %v2488_v61, 0  ;;  %3673 = vmatprep.subr.msk.bf16.mxu1 %vm2538_vm14, %v2537_v7  ;;  %v3894_v7 = vld [vmem:[%s5945_s4 + $0x68] ss:$36 sps:$4 sm:$0xff]  }
 0x492   :  { %v2521_v15 = vsel %vm2267_vm13, %v2512_v62, 0  ;;  %2806 = vmatmul.mubr.bf16.vlgmr.msra.gmra.mxu1 %v3875_v34 }
 0x493   :  { %3582 = vmatpush3.bf16.msra.mxu0 %v5499_v58  ;;  %3600 = vmatpush3.bf16.msra.mxu1 %v2521_v15  ;;  %v2506_v58 = vsel %vm2489_vm0, %v2484_v37, 0 }
 0x494   :  { %v2482_v10 = vpop.permute.xlu1 %2481  ;;  %3671 = vmatprep.subr.msk.bf16.mxu0 %vm2366_vm9, %v2445_v25  ;;  %3674 = vmatprep.subr.msk.bf16.mxu1 %vm2538_vm14, %v2535_v18  ;;  %v2480_v43 = vpop.permute.xlu0 %2479  ;;  %v2519_v22 = vsel %vm2267_vm13, %v2506_v58, 0 }
 0x495   :  { %2813 = vmatprep.mubr.bf16.mxu1 %v3881_v4  ;;  %v2503_v46 = vsel %vm2489_vm0, %v2482_v10, 0 }
 0x496   :  { %v2518_v29 = vsel %vm2267_vm13, %v2503_v46, 0 }
 0x497   :  { %3584 = vmatpush3.bf16.msra.mxu0 %v5491_v54  ;;  %3602 = vmatpush3.bf16.msra.mxu1 %v2520_v31  ;;  %v3878_v54 = vld [vmem:[%s5945_s4 + $0x10] ss:$36 sps:$4 sm:$0xff]  }
 0x498   :  { %v2531_v6 = vpop.permute.xlu1 %2530  ;;  %3672 = vmatprep.subr.msk.bf16.mxu0 %vm2366_vm9, %v2442_v50  ;;  %3675 = vmatprep.subr.msk.bf16.mxu1 %vm2538_vm14, %v2533_v42  ;;  %v2529_v13 = vpop.permute.xlu0 %2528 }
 0x49a   :  { %2814 = vmatmul.mubr.bf16.gmra.mxu1 %v3883_v19 }
 0x49b   :  { %3586 = vmatpush3.bf16.msra.mxu0 %v5547_v12  ;;  %3604 = vmatpush3.bf16.msra.mxu1 %v2519_v22  ;;  %v2500_v12 = vsel %vm2489_vm0, %v2480_v43, 0 }
 0x49c   :  { %v2576_v55 = vpop.permute.xlu1 %2575  ;;  %3676 = vmatprep.subr.msk.bf16.mxu1 %vm2538_vm14, %v2531_v6  ;;  %v2578_v20 = vpop.permute.xlu0 %2577  ;;  %2903 = vmatprep.mubr.bf16.mxu1 %v3889_v27  ;;  %v2517_v36 = vsel %vm2267_vm13, %v2500_v12, 0 }
 0x49d   :  { %v2602_v35 = vsel %vm2579_vm2, %v2578_v20, 0  ;;  %v2599_v59 = vsel %vm2579_vm2, %v2576_v55, 0 }
 0x49e   :  { %v2611_v53 = vsel %vm2366_vm9, %v2602_v35, 0  ;;  %2855 = vmatmul.mubr.bf16.vlgmr.msra.gmra.mxu0 %v3878_v54  ;;  %3681 = vmatprep.subr.msk.bf16.mxu0 %vm2366_vm9, %v2602_v35  ;;  %v2610_v40 = vsel %vm2366_vm9, %v2599_v59, 0 }
 0x49f   :  { %3606 = vmatpush3.bf16.msra.mxu1 %v2518_v29  ;;  %3638 = vmatpush3.bf16.msra.mxu0 %v2611_v53 }
 0x4a0   :  { %v2478_v47 = vpop.permute.xlu1 %2477  ;;  %3677 = vmatprep.subr.msk.bf16.mxu1 %vm2538_vm14, %v2529_v13  ;;  %3682 = vmatprep.subr.msk.bf16.mxu0 %vm2366_vm9, %v2599_v59  ;;  %v2574_v16 = vpop.permute.xlu0 %2573 }
 0x4a1   :  { %2862 = vmatprep.mubr.bf16.mxu0 %v3886_v17  ;;  %v2497_v48 = vsel %vm2489_vm0, %v2478_v47, 0  ;;  %v2596_v5 = vsel %vm2579_vm2, %v2574_v16, 0 }
 0x4a2   :  { %v2516_v60 = vsel %vm2267_vm13, %v2497_v48, 0  ;;  %v2609_v63 = vsel %vm2366_vm9, %v2596_v5, 0 }
 0x4a3   :  { %3608 = vmatpush3.bf16.msra.mxu1 %v2517_v36  ;;  %3640 = vmatpush3.bf16.msra.mxu0 %v2610_v40 }
 0x4a4   :  { %v2527_v11 = vpop.permute.xlu1 %2526  ;;  %3683 = vmatprep.subr.msk.bf16.mxu0 %vm2366_vm9, %v2596_v5  ;;  %v2476_v39 = vpop.permute.xlu0 %2475 }
 0x4a5   :  { %3678 = vmatprep.subr.msk.bf16.mxu1 %vm2538_vm14, %v2527_v11  ;;  %v2494_v9 = vsel %vm2489_vm0, %v2476_v39, 0 }
 0x4a6   :  { %2863 = vmatmul.mubr.bf16.gmra.mxu0 %v3884_v24  ;;  %v2515_v52 = vsel %vm2267_vm13, %v2494_v9, 0 }
 0x4a7   :  { %3610 = vmatpush3.bf16.msra.mxu1 %v2516_v60  ;;  %3642 = vmatpush3.bf16.msra.mxu0 %v2609_v63 }
 0x4a8   :  { %v2572_v49 = vpop.permute.xlu1 %2571  ;;  %v2525_v57 = vpop.permute.xlu0 %2524  ;;  %3653 = vmatprep.mubr.bf16.mxu0 %v3893_v28 }
 0x4a9   :  { %v2593_v26 = vsel %vm2579_vm2, %v2572_v49, 0  ;;  %3679 = vmatprep.subr.msk.bf16.mxu1 %vm2538_vm14, %v2525_v57 }
 0x4aa   :  { %v2608_v32 = vsel %vm2366_vm9, %v2593_v26, 0  ;;  %3684 = vmatprep.subr.msk.bf16.mxu0 %vm2366_vm9, %v2593_v26 }
 0x4ab   :  { %3612 = vmatpush3.bf16.msra.mxu1 %v2515_v52  ;;  %3644 = vmatpush3.bf16.msra.mxu0 %v2608_v32 }
 0x4ac   :  { %v2474_v21 = vpop.permute.xlu1 %2473  ;;  %v2570_v3 = vpop.permute.xlu0 %2569 }
 0x4ad   :  { %v2590_v8 = vsel %vm2579_vm2, %v2570_v3, 0  ;;  %v2491_v51 = vsel %vm2489_vm0, %v2474_v21, 0 }
 0x4ae   :  { %v2607_v33 = vsel %vm2366_vm9, %v2590_v8, 0  ;;  %3685 = vmatprep.subr.msk.bf16.mxu0 %vm2366_vm9, %v2590_v8  ;;  %v2514_v30 = vsel %vm2267_vm13, %v2491_v51, 0 }
 0x4af   :  { %3646 = vmatpush3.bf16.msra.mxu0 %v2607_v33 }
 0x4b0   :  { %v2523_v0 = vpop.permute.xlu1 %2522  ;;  %v2568_v18 = vpop.permute.xlu0 %2567 }
 0x4b1   :  { %v2587_v56 = vsel %vm2579_vm2, %v2568_v18, 0  ;;  %3680 = vmatprep.subr.msk.bf16.mxu1 %vm2538_vm14, %v2523_v0 }
 0x4b2   :  { %v2606_v45 = vsel %vm2366_vm9, %v2587_v56, 0  ;;  %3614 = vmatpush3.bf16.msra.mxu1 %v2514_v30  ;;  %3686 = vmatprep.subr.msk.bf16.mxu0 %vm2366_vm9, %v2587_v56 }
 0x4b3   :  { %3648 = vmatpush3.bf16.msra.mxu0 %v2606_v45 }
 0x4b4   :  { %v2566_v41 = vpop.permute.xlu1 %2565  ;;  %v2564_v37 = vpop.permute.xlu0 %2563 }
 0x4b5   :  { %v2584_v42 = vsel %vm2579_vm2, %v2566_v41, 0  ;;  %2904 = vmatmul.mubr.bf16.vlgmr.msra.gmra.mxu1 %v3887_v38  ;;  %v2581_v34 = vsel %vm2579_vm2, %v2564_v37, 0 }
 0x4b6   :  { %v2605_v44 = vsel %vm2366_vm9, %v2584_v42, 0  ;;  %3687 = vmatprep.subr.msk.bf16.mxu0 %vm2366_vm9, %v2584_v42  ;;  %2911 = vmatprep.mubr.bf16.mxu1 %v3892_v1  ;;  %v2604_v61 = vsel %vm2366_vm9, %v2581_v34, 0 }
 0x4b7   :  { %3650 = vmatpush3.bf16.msra.mxu0 %v2605_v44 }
 0x4b8   :  { %3688 = vmatprep.subr.msk.bf16.mxu0 %vm2366_vm9, %v2581_v34 }
 0x4bb   :  { %3652 = vmatpush3.bf16.msra.mxu0 %v2604_v61 }
 0x4bd   :  { %2912 = vmatmul.mubr.bf16.gmra.mxu1 %v3890_v2 }
 0x4be   :  { %3654 = vmatmul.mubr.bf16.vlgmr.msra.gmra.mxu0 %v3894_v7 }
 0x532   :  { %v3531_v62 = vpop.f32.mrf.mxu1 }
 0x534   :  { %v3532_v4 = vpop.f32.mrf.mxu1 }
 0x535   :  { %v3533_v47 = vadd.f32 %v3532_v4, %v3531_v62 }
 0x536   :  { %v3534_v15 = vpop.f32.mrf.mxu1 }
 0x538   :  { %v3535_v25 = vpop.f32.mrf.mxu1 }
 0x539   :  { %v3536_v63 = vadd.f32 %v3535_v25, %v3534_v15 }
 0x53a   :  { %v3537_v14 = vpop.f32.mrf.mxu1 }
 0x53c   :  { %v3538_v10 = vpop.f32.mrf.mxu1 }
 0x53d   :  { %v3539_v39 = vadd.f32 %v3538_v10, %v3537_v14 }
 0x53e   :  { %v3540_v43 = vpop.f32.mrf.mxu1 }
 0x540   :  { %v3541_v31 = vpop.f32.mrf.mxu1 }
 0x541   :  { %v3542_v33 = vadd.f32 %v3541_v31, %v3540_v43 }
 0x552   :  { %v3559_v19 = vpop.f32.mrf.mxu1 }
 0x554   :  { %v3560_v50 = vpop.f32.mrf.mxu1 }
 0x555   :  { %v3561_v53 = vadd.f32 %v3560_v50, %v3559_v19 }
 0x556   :  { %v3562_v58 = vpop.f32.mrf.mxu1 }
 0x557   :  { %v2808_v24 = vadd.f32 %v3561_v53, %v3533_v47 }
 0x558   :  { %v3563_v6 = vpop.f32.mrf.mxu1 }
 0x559   :  { %v3564_v48 = vadd.f32 %v3563_v6, %v3562_v58 }
 0x55a   :  { %v3565_v27 = vpop.f32.mrf.mxu1 }
 0x55b   :  { %v2811_v21 = vadd.f32 %v3564_v48, %v3536_v63 }
 0x55c   :  { %v3566_v54 = vpop.f32.mrf.mxu1 }
 0x55d   :  { %v3567_v40 = vadd.f32 %v3566_v54, %v3565_v27 }
 0x55e   :  { %v3587_v23 = vpop.f32.mrf.mxu0  ;;  %v3568_v55 = vpop.f32.mrf.mxu1 }
 0x55f   :  { %v2816_v26 = vadd.f32 %v3567_v40, %v3539_v39 }
 0x560   :  { %v3588_v13 = vpop.f32.mrf.mxu0  ;;  %v3569_v35 = vpop.f32.mrf.mxu1 }
 0x561   :  { %v3589_v16 = vadd.f32 %v3588_v13, %v3587_v23  ;;  %v3570_v52 = vadd.f32 %v3569_v35, %v3568_v55 }
 0x562   :  { %v3590_v22 = vpop.f32.mrf.mxu0 }
 0x563   :  { %v2857_v9 = vadd.f32 %v3589_v16, %v2808_v24  ;;  %v2819_v41 = vadd.f32 %v3570_v52, %v3542_v33 }
 0x564   :  { %v3591_v46 = vpop.f32.mrf.mxu0 }
 0x565   :  { %v3592_v49 = vadd.f32 %v3591_v46, %v3590_v22 }
 0x566   :  { %v3593_v20 = vpop.f32.mrf.mxu0 }
 0x567   :  { %v2860_v38 = vadd.f32 %v3592_v49, %v2811_v21 }
 0x568   :  { %v3594_v17 = vpop.f32.mrf.mxu0 }
 0x569   :  { %v3595_v28 = vadd.f32 %v3594_v17, %v3593_v20 }
 0x56a   :  { %v3596_v59 = vpop.f32.mrf.mxu0 }
 0x56b   :  { %v2865_v0 = vadd.f32 %v3595_v28, %v2816_v26 }
 0x56c   :  { %v3597_v60 = vpop.f32.mrf.mxu0 }
 0x56d   :  { %v3598_v18 = vadd.f32 %v3597_v60, %v3596_v59 }
 0x56f   :  { %v2868_v2 = vadd.f32 %v3598_v18, %v2819_v41 }
 0x575   :  { %v3615_v29 = vpop.f32.mrf.mxu1 }
 0x577   :  { %v3616_v12 = vpop.f32.mrf.mxu1 }
 0x578   :  { %v3617_v5 = vadd.f32 %v3616_v12, %v3615_v29 }
 0x579   :  { %v3618_v36 = vpop.f32.mrf.mxu1 }
 0x57a   :  { %v2906_v51 = vadd.f32 %v3617_v5, %v2857_v9 }
 0x57b   :  { %v3619_v11 = vpop.f32.mrf.mxu1 }
 0x57c   :  { %v3620_v3 = vadd.f32 %v3619_v11, %v3618_v36 }
 0x57d   :  { %v3621_v57 = vpop.f32.mrf.mxu1 }
 0x57e   :  { %v3655_v32 = vpop.f32.mrf.mxu0  ;;  %v2909_v34 = vadd.f32 %v3620_v3, %v2860_v38 }
 0x57f   :  { %v3622_v8 = vpop.f32.mrf.mxu1 }
 0x580   :  { %v3623_v30 = vadd.f32 %v3622_v8, %v3621_v57  ;;  %v2954_v56 = vpop.f32.mrf.mxu0 }
 0x581   :  { %v2955_v45 = vadd.f32 %v2954_v56, %v2906_v51  ;;  %v3624_v1 = vpop.f32.mrf.mxu1 }
 0x582   :  { %v2914_v37 = vadd.f32 %v3623_v30, %v2865_v0  ;;  %v3656_v42 = vpop.f32.mrf.mxu0 }
 0x583   :  { %2969 = vst.msk [vmem:[%s5946_s5] sm:$0xff] %vm1721_vm1, %v2955_v45  ;;  %v3625_v44 = vpop.f32.mrf.mxu1 }
 0x584   :  { %v2963_v61 = vadd.f32 %v3655_v32, %v2914_v37  ;;  %v3626_v7 = vadd.f32 %v3625_v44, %v3624_v1  ;;  %v2957_v62 = vpop.f32.mrf.mxu0 }
 0x585   :  { %v2958_v4 = vadd.f32 %v2957_v62, %v2909_v34 }
 0x586   :  { %2971 = vst.msk [vmem:[%s5946_s5 + $0x10] sm:$0xff] %vm1721_vm1, %v2963_v61  ;;  %v2917_v15 = vadd.f32 %v3626_v7, %v2868_v2 }
 0x587   :  { %2970 = vst.msk [vmem:[%s5946_s5 + $0x8] sm:$0xff] %vm1721_vm1, %v2958_v4 }
 0x588   :  { %v2966_v25 = vadd.f32 %v3656_v42, %v2917_v15 }
 0x58a   :  { %2972 = vst.msk [vmem:[%s5946_s5 + $0x18] sm:$0xff] %vm1721_vm1, %v2966_v25 }

</bundles_post_ra>
